<compile_context>
chip_gen: v5e
topology: v5e:2x2
jax: 0.10.0
libtpu: 0.0.40
codegen_flags: <defaults>
</compile_context>

<pallas_src>
import functools

import numpy as np
import jax
import jax.numpy as jnp
from jax import lax
from jax.experimental import pallas as pl
from jax.experimental.pallas import tpu as pltpu


# ----------------------------------------------------------------------------
# small helpers
# ----------------------------------------------------------------------------

def _round_up(x, m):
    return ((x + m - 1) // m) * m


_CompilerParams = (getattr(pltpu, "CompilerParams", None)
                   or getattr(pltpu, "TPUCompilerParams", None))


def _mosaic_params(n_axes):
    if _CompilerParams is None:
        return None
    return _CompilerParams(dimension_semantics=("parallel",) * n_axes)


# ----------------------------------------------------------------------------
# Pallas kernels
# ----------------------------------------------------------------------------

def _fused_linear_kernel(act, slope, has_res, *refs):
    """y = x @ w + b (+ res) ; optional LeakyReLU.  BN is pre-folded into w/b."""
    if has_res:
        x_ref, w_ref, b_ref, res_ref, o_ref = refs
    else:
        x_ref, w_ref, b_ref, o_ref = refs
        res_ref = None
    y = jnp.dot(x_ref[...].astype(jnp.bfloat16), w_ref[...],
                preferred_element_type=jnp.float32)
    y = y + b_ref[...]
    if has_res:
        y = y + res_ref[...]
    if act:
        y = jnp.where(y >= 0.0, y, slope * y)
    o_ref[...] = y


def fused_linear(x2d, w, b, res=None, act=False, slope=0.1):
    """Pointwise conv / Linear (+ folded BN) + optional residual + LeakyReLU."""
    M, Cin = x2d.shape
    Cout = w.shape[1]
    b2 = b.reshape(1, Cout).astype(jnp.float32)

    bm = min(512, _round_up(M, 8))
    Mp = _round_up(M, bm)
    if Mp != M:
        x2d = jnp.pad(x2d, ((0, Mp - M), (0, 0)))
        if res is not None:
            res = jnp.pad(res, ((0, Mp - M), (0, 0)))

    in_specs = [
        pl.BlockSpec((bm, Cin), lambda i: (i, 0)),
        pl.BlockSpec((Cin, Cout), lambda i: (0, 0)),
        pl.BlockSpec((1, Cout), lambda i: (0, 0)),
    ]
    args = [x2d, w, b2]
    if res is not None:
        in_specs.append(pl.BlockSpec((bm, Cout), lambda i: (i, 0)))
        args.append(res)

    out = pl.pallas_call(
        functools.partial(_fused_linear_kernel, act, slope, res is not None),
        out_shape=jax.ShapeDtypeStruct((Mp, Cout), jnp.float32),
        grid=(Mp // bm,),
        in_specs=in_specs,
        out_specs=pl.BlockSpec((bm, Cout), lambda i: (i, 0)),
        compiler_params=_mosaic_params(1),
    )(*args)
    return out[:M] if Mp != M else out


def _tap_conv_kernel(ntaps, wlen, act, slope, has_res, *refs):
    """k-tap 1-D conv along axis 1 of the block + bias (+res) (+LeakyReLU).

    x_ref : (R, wlen + ntaps - 1, [V,] Cin) halo-padded along axis 1.
    w_ref : (ntaps, Cin, Cout) bf16 (BN folded).
    """
    if has_res:
        x_ref, w_ref, b_ref, res_ref, o_ref = refs
    else:
        x_ref, w_ref, b_ref, o_ref = refs
        res_ref = None
    out_shape = o_ref.shape
    cout = out_shape[-1]
    cin = x_ref.shape[-1]
    rows = 1
    for d in out_shape[:-1]:
        rows *= d

    acc = jnp.zeros((rows, cout), jnp.float32)
    for j in range(ntaps):                       # static unroll over taps
        if len(x_ref.shape) == 3:
            xw = x_ref[:, j:j + wlen, :]
        else:
            xw = x_ref[:, j:j + wlen, :, :]
        xw = xw.astype(jnp.bfloat16).reshape(rows, cin)
        acc = acc + jnp.dot(xw, w_ref[j], preferred_element_type=jnp.float32)

    y = acc + b_ref[...]
    if has_res:
        y = y + res_ref[...].reshape(rows, cout)
    if act:
        y = jnp.where(y >= 0.0, y, slope * y)
    o_ref[...] = y.reshape(out_shape)


def conv_spatial(x3, w, b, res=None, act=True, slope=0.1):
    """(1, k) conv along V.  x3: (R, V, Cin) -> (R, V, Cout), taps in-kernel."""
    R, V, Cin = x3.shape
    k, _, Cout = w.shape
    pad = (k - 1) // 2
    xp = jnp.pad(x3, ((0, 0), (pad, pad), (0, 0)))
    Vp = V + 2 * pad

    # row-block sized by a ~4 MiB VMEM budget (safe for v7x's 64 MiB VMEM too)
    row_bytes = Vp * max(Cin, Cout) * 4
    br = max(8, min(128, (4 << 20) // row_bytes))
    br = max(8, (br // 8) * 8)
    br = min(br, _round_up(R, 8))
    Rp = _round_up(R, br)
    if Rp != R:
        xp = jnp.pad(xp, ((0, Rp - R), (0, 0), (0, 0)))
        if res is not None:
            res = jnp.pad(res, ((0, Rp - R), (0, 0), (0, 0)))

    b2 = b.reshape(1, Cout).astype(jnp.float32)
    in_specs = [
        pl.BlockSpec((br, Vp, Cin), lambda i: (i, 0, 0)),
        pl.BlockSpec((k, Cin, Cout), lambda i: (0, 0, 0)),
        pl.BlockSpec((1, Cout), lambda i: (0, 0)),
    ]
    args = [xp, w, b2]
    if res is not None:
        in_specs.append(pl.BlockSpec((br, V, Cout), lambda i: (i, 0, 0)))
        args.append(res)

    out = pl.pallas_call(
        functools.partial(_tap_conv_kernel, k, V, act, slope, res is not None),
        out_shape=jax.ShapeDtypeStruct((Rp, V, Cout), jnp.float32),
        grid=(Rp // br,),
        in_specs=in_specs,
        out_specs=pl.BlockSpec((br, V, Cout), lambda i: (i, 0, 0)),
        compiler_params=_mosaic_params(1),
    )(*args)
    return out[:R] if Rp != R else out


def conv_temporal(x4, w, b, res=None, act=True, slope=0.1):
    """(k, 1) conv along T.  x4: (N, T, V, Cin) -> (N, T, V, Cout)."""
    N, T, V, Cin = x4.shape
    k, _, Cout = w.shape
    pad = (k - 1) // 2
    xp = jnp.pad(x4, ((0, 0), (pad, pad), (0, 0), (0, 0)))
    Tp = T + 2 * pad
    b2 = b.reshape(1, Cout).astype(jnp.float32)

    in_specs = [
        pl.BlockSpec((1, Tp, V, Cin), lambda n: (n, 0, 0, 0)),
        pl.BlockSpec((k, Cin, Cout), lambda n: (0, 0, 0)),
        pl.BlockSpec((1, Cout), lambda n: (0, 0)),
    ]
    args = [xp, w, b2]
    if res is not None:
        in_specs.append(pl.BlockSpec((1, T, V, Cout), lambda n: (n, 0, 0, 0)))
        args.append(res)

    return pl.pallas_call(
        functools.partial(_tap_conv_kernel, k, T, act, slope, res is not None),
        out_shape=jax.ShapeDtypeStruct((N, T, V, Cout), jnp.float32),
        grid=(N,),
        in_specs=in_specs,
        out_specs=pl.BlockSpec((1, T, V, Cout), lambda n: (n, 0, 0, 0)),
        compiler_params=_mosaic_params(1),
    )(*args)


def _sta_attn_kernel(num_heads, inv_scale, vals_ref, bias_ref, q_ref, k_ref,
                     xt_ref, o_ref):
    """Spatial attention for one batch element, all heads per grid step.

    att_h = softmax(q_h^T k_h / (D*T) * values_h + bias_h)
    out_h = att_h^T @ x^T   (written as (V, C*T): C*T on the lane axis)
    """
    xt = xt_ref[0]                               # (V, C*T) f32
    for h in range(num_heads):                   # static unroll over heads
        q = q_ref[0, h]                          # (D*T, V)
        k = k_ref[0, h]                          # (D*T, V)
        logits = lax.dot_general(q, k, (((0,), (0,)), ((), ())),
                                 preferred_element_type=jnp.float32)   # (V, V)
        logits = logits * (vals_ref[h] * inv_scale) + bias_ref[h]
        m = jnp.max(logits, axis=-1, keepdims=True)
        e = jnp.exp(logits - m)
        att = e * pl.reciprocal(jnp.sum(e, axis=-1, keepdims=True), approx=True)
        o_ref[0, h] = lax.dot_general(att, xt, (((0,), (0,)), ((), ())),
                                      preferred_element_type=jnp.float32)  # (V, C*T)


def sta_attention(q, k, xt, vals, bias, qkv_dim, T):
    N, H, DT, V = q.shape
    CT = xt.shape[2]
    inv_scale = 1.0 / float(qkv_dim * T)
    return pl.pallas_call(
        functools.partial(_sta_attn_kernel, H, inv_scale),
        out_shape=jax.ShapeDtypeStruct((N, H, V, CT), jnp.float32),
        grid=(N,),
        in_specs=[
            pl.BlockSpec(memory_space=pltpu.MemorySpace.SMEM),   # per-head values
            pl.BlockSpec(memory_space=pltpu.MemorySpace.SMEM),   # per-head att bias
            pl.BlockSpec((1, H, DT, V), lambda n: (n, 0, 0, 0)),
            pl.BlockSpec((1, H, DT, V), lambda n: (n, 0, 0, 0)),
            pl.BlockSpec((1, V, CT), lambda n: (n, 0, 0)),
        ],
        out_specs=pl.BlockSpec((1, H, V, CT), lambda n: (n, 0, 0, 0)),
        compiler_params=_mosaic_params(1),
    )(vals, bias, q, k, xt)


def _mean_kernel(x_ref, o_ref):
    tv = x_ref.shape[1]
    o_ref[...] = jnp.sum(x_ref[...], axis=1, keepdims=True) * (1.0 / tv)


def mean_over_tokens(x):  # (N, T*V, C) -> (N, C)
    N, TV, C = x.shape
    out = pl.pallas_call(
        _mean_kernel,
        out_shape=jax.ShapeDtypeStruct((N, 1, C), jnp.float32),
        grid=(N,),
        in_specs=[pl.BlockSpec((1, TV, C), lambda n: (n, 0, 0))],
        out_specs=pl.BlockSpec((1, 1, C), lambda n: (n, 0, 0)),
        compiler_params=_mosaic_params(1),
    )(x)
    return out.reshape(N, C)


# ----------------------------------------------------------------------------
# Parameter construction (deterministic, BN folded, bf16 matmul weights)
# ----------------------------------------------------------------------------

def conv_params(key, cout, cin, kh, kw):
    wkey, bkey = jax.random.split(key)
    fan_out = cout * kh * kw                      # kaiming_normal_, mode='fan_out'
    std = float(np.sqrt(2.0 / fan_out))
    w = jax.random.normal(wkey, (cout, cin, kh, kw), jnp.float32) * std
    b = jax.random.normal(bkey, (cout,), jnp.float32) * 0.01
    return w, b


def sinusoidal_pe(channels, num_frames, num_joints):
    pos = np.tile(np.arange(num_joints), num_frames).astype(np.float32)[:, None]
    div = np.exp(np.arange(0, channels, 2, dtype=np.float32)
                 * -(np.log(10000.0) / channels))
    pe = np.zeros((num_frames * num_joints, channels), np.float32)
    pe[:, 0::2] = np.sin(pos * div)
    pe[:, 1::2] = np.cos(pos * div)
    pe = pe.reshape(num_frames, num_joints, channels)        # (T, V, C) chan-last
    return jnp.asarray(pe)[None]                              # (1, T, V, C)


def init_params(key, cfg, num_channels, num_classes, T, V):
    H = cfg['num_heads']
    ks = cfg['kernel_size']
    keys = iter(jax.random.split(key, 256))
    params = {}
    eps = 1e-5
    s_bn = 1.0 / float(np.sqrt(1.0 + eps))   # BN(gamma=1,beta=0,mean=0,var=1) scale

    def pointwise(cout, cin, fold_bn):
        w, b = conv_params(next(keys), cout, cin, 1, 1)
        w2 = jnp.transpose(w[:, :, 0, 0])     # (cin, cout)
        if fold_bn:
            w2 = w2 * s_bn
            b = b * s_bn
        return w2.astype(jnp.bfloat16), b

    cin0 = cfg['config'][0][0]
    params['input_w'], params['input_b'] = pointwise(cin0, num_channels, True)
    params['pe'] = sinusoidal_pe(cin0, T, V)

    blocks = []
    for (cin, cout, qdim) in cfg['config']:
        bp = {}
        bp['qkv_w'], bp['qkv_b'] = pointwise(2 * H * qdim, cin, False)
        bp['values'] = jnp.ones((H,), jnp.float32)             # torch.ones(1,H,1,1)
        bp['att_bias'] = jnp.full((H,), 1.0 / V, jnp.float32)  # ones/num_joints

        ksv = ks[1]
        w, b = conv_params(next(keys), cout, cin * H, 1, ksv)  # out_nets (1,ksv)+BN
        bp['outs_w'] = (jnp.transpose(w[:, :, 0, :], (2, 1, 0)) * s_bn
                        ).astype(jnp.bfloat16)                 # (ksv, cin*H, cout)
        bp['outs_b'] = b * s_bn

        bp['ff_w'], bp['ff_b'] = pointwise(cout, cout, True)   # ff_net 1x1 + BN

        kst = ks[0]
        w, b = conv_params(next(keys), cout, cout, kst, 1)     # out_nett (kst,1)+BN
        bp['outt_w'] = (jnp.transpose(w[:, :, :, 0], (2, 1, 0)) * s_bn
                        ).astype(jnp.bfloat16)                 # (kst, cout, cout)
        bp['outt_b'] = b * s_bn

        if cin != cout:
            bp['ress_w'], bp['ress_b'] = pointwise(cout, cin, True)
            bp['rest_w'], bp['rest_b'] = pointwise(cout, cout, True)
        blocks.append(bp)
    params['blocks'] = blocks

    cout_last = cfg['config'][-1][1]
    std = float(np.sqrt(2.0 / (cout_last + num_classes)))      # xavier_normal_
    params['cls_w'] = (jax.random.normal(next(keys), (cout_last, num_classes),
                                         jnp.float32) * std).astype(jnp.bfloat16)
    params['cls_b'] = jnp.zeros((num_classes,), jnp.float32)
    params['skel_token'] = jnp.zeros((1, cout_last), jnp.float32)
    return params


# ----------------------------------------------------------------------------
# Model forward built from the Pallas kernels
# ----------------------------------------------------------------------------

def sta_block(x, p, cin, cout, qkv_dim, H, ks):
    # x: (N, T, V, cin) channel-last
    N, T, V, _ = x.shape
    x2d = x.reshape(N * T * V, cin)

    # --- spatial attention (all heads fused per batch) ---
    qkv = fused_linear(x2d, p['qkv_w'], p['qkv_b'], act=False)          # (NTV, 2HD)
    D = qkv_dim
    qkv = qkv.reshape(N, T, V, 2 * H, D)
    q = jnp.transpose(qkv[:, :, :, :H, :], (0, 3, 4, 1, 2)).reshape(N, H, D * T, V)
    k = jnp.transpose(qkv[:, :, :, H:, :], (0, 3, 4, 1, 2)).reshape(N, H, D * T, V)
    xt = jnp.transpose(x, (0, 2, 3, 1)).reshape(N, V, cin * T)           # (N, V, C*T)
    attn = sta_attention(q, k, xt, p['values'], p['att_bias'], D, T)     # (N, H, V, C*T)
    # -> (N, T, V, H*cin), channel index = h*cin + c   (matches torch .view)
    xs = jnp.transpose(attn.reshape(N, H, V, cin, T),
                       (0, 4, 2, 1, 3)).reshape(N, T, V, H * cin)

    # --- spatial residual ress(x) ---
    if 'ress_w' in p:
        res_s = fused_linear(x2d, p['ress_w'], p['ress_b'], act=False)
        res_s = res_s.reshape(N, T, V, cout)
    else:
        res_s = x

    # out_nets: (1, ks[1]) conv along V + folded BN + residual + LeakyReLU
    xs2 = conv_spatial(xs.reshape(N * T, V, H * cin), p['outs_w'], p['outs_b'],
                       res=res_s.reshape(N * T, V, cout), act=True)
    xs2 = xs2.reshape(N, T, V, cout)

    # ff_net: 1x1 conv + folded BN + same residual + LeakyReLU
    xs3 = fused_linear(xs2.reshape(N * T * V, cout), p['ff_w'], p['ff_b'],
                       res=res_s.reshape(N * T * V, cout), act=True)
    xs3 = xs3.reshape(N, T, V, cout)

    # --- temporal residual rest(x_spatial) ---
    if 'rest_w' in p:
        res_t = fused_linear(xs3.reshape(N * T * V, cout), p['rest_w'],
                             p['rest_b'], act=False).reshape(N, T, V, cout)
    else:
        res_t = xs3

    # out_nett: (ks[0], 1) conv along T + folded BN + residual + LeakyReLU
    return conv_temporal(xs3, p['outt_w'], p['outt_b'], res=res_t, act=True)


def sttformer_backbone(xs, params, cfg):
    """Stacked skeletons (N_total, C, T_frames, V_joints) -> features (N_total, C_out)."""
    N, C, TT, Vj = xs.shape
    p_ = cfg['len_parts']
    t = TT // p_
    # rearrange 'n c (t p) v -> n c t (p v)'
    xs = xs.reshape(N, C, t, p_, Vj).reshape(N, C, t, p_ * Vj)
    xs = jnp.transpose(xs, (0, 2, 3, 1)).astype(jnp.float32)   # (N, T, V, C)
    N, T, V, C = xs.shape

    # input_map: 1x1 conv + folded BN + LeakyReLU
    h = fused_linear(xs.reshape(N * T * V, C), params['input_w'],
                     params['input_b'], act=True)
    C0 = h.shape[1]
    h = h.reshape(N, T, V, C0) + params['pe']

    for bi, (cin, cout, qdim) in enumerate(cfg['config']):
        h = sta_block(h, params['blocks'][bi], cin, cout, qdim,
                      cfg['num_heads'], cfg['kernel_size'])

    Cf = h.shape[-1]
    return mean_over_tokens(h.reshape(N, T * V, Cf))           # (N, Cf)


def sttformer_forward(x, params, cfg, backbone_fn):
    """x: (B, C, T_total, V_joints, 2)  ->  logits (B, num_classes)."""
    B = x.shape[0]
    # data-dependent two-skeleton handling (host side, outside the jitted region)
    mask = np.asarray(jax.device_get(jnp.sum(x[..., 1], axis=(1, 2, 3)) > 0))
    if not mask.any():
        xs = x[..., 0]
    else:
        xs = jnp.concatenate([x[..., 0], x[np.where(mask)[0], ..., 1]], axis=0)

    feats = backbone_fn(xs)                      # (N_total, Cf) via Pallas pipeline
    Cf = feats.shape[-1]

    # add_second_skel_token (skel_token initialised to zeros)
    first = feats[:B]
    second = jnp.zeros_like(first)
    if mask.any():
        second = second.at[np.where(mask)[0]].set(feats[B:])
    not_idx = np.where(~mask)[0]
    if not_idx.size:
        second = second.at[not_idx].set(
            jnp.broadcast_to(params['skel_token'], (not_idx.size, Cf)))
    feats = first + second

    # classifier
    return fused_linear(feats, params['cls_w'], params['cls_b'], act=False)


# ----------------------------------------------------------------------------
# Main
# ----------------------------------------------------------------------------

if __name__ == "__main__":
    key = jax.random.PRNGKey(0)
    k_in, k_par = jax.random.split(key)

    # small, consistent shapes: B=2, channels=3 (xyz), 8 frames, 4 joints, 2 skeletons
    B, Cch, TT, Vj = 2, 3, 8, 4
    cfg = dict(
        config=[[16, 16, 8], [16, 32, 8]],   # custom small config (list form)
        len_parts=4,
        num_heads=3,
        kernel_size=(3, 5),
        num_classes=10,
    )
    T = TT // cfg['len_parts']               # 2
    V = Vj * cfg['len_parts']                # 16

    x = jax.random.normal(k_in, (B, Cch, TT, Vj, 2), jnp.float32)
    x = x.at[0, ..., 1].set(0.0)                                  # no 2nd skeleton
    x = x.at[1, ..., 1].set(jnp.abs(x[1, ..., 1]) + 0.1)          # has 2nd skeleton

    params = init_params(k_par, cfg, Cch, cfg['num_classes'], T, V)

    backbone_fn = jax.jit(lambda xs: sttformer_backbone(xs, params, cfg))

    out = sttformer_forward(x, params, cfg, backbone_fn)
    out = jax.block_until_ready(out)

    assert out.shape == (B, cfg['num_classes'])
    assert bool(jnp.all(jnp.isfinite(out)))
    print("KERNEL_OK")
</pallas_src>

<mosaic_0001>
module attributes {stable_mosaic.version = 11 : i64} {
  func.func @_fused_linear_kernel(%arg0: i32, %arg1: memref<96x3xf32, #tpu.memory_space<vmem>>, %arg2: memref<3x16xbf16, #tpu.memory_space<vmem>>, %arg3: memref<1x16xf32, #tpu.memory_space<vmem>>, %arg4: memref<96x16xf32, #tpu.memory_space<vmem>>) attributes {dimension_semantics = [#tpu.dimension_semantics<parallel>], iteration_bounds = array<i64: 1>, scalar_prefetch = 0 : i64, scratch_operands = 0 : i64, tpu.core_type = #tpu.core_type<tc>, window_params = [{transform_indices = @transform_0, window_bounds = array<i64: 96, 3>}, {pipeline_mode = #tpu.pipeline_mode<synchronous>, transform_indices = @transform_1, window_bounds = array<i64: 3, 16>}, {pipeline_mode = #tpu.pipeline_mode<synchronous>, transform_indices = @transform_2, window_bounds = array<i64: 1, 16>}, {transform_indices = @transform_3, window_bounds = array<i64: 96, 16>}]} {
    %c0 = arith.constant 0 : index
    %c0_0 = arith.constant 0 : index
    %0 = vector.load %arg1[%c0, %c0_0] : memref<96x3xf32, #tpu.memory_space<vmem>>, vector<96x3xf32>
    %1 = arith.truncf %0 : vector<96x3xf32> to vector<96x3xbf16>
    %c0_1 = arith.constant 0 : index
    %c0_2 = arith.constant 0 : index
    %2 = vector.load %arg2[%c0_1, %c0_2] : memref<3x16xbf16, #tpu.memory_space<vmem>>, vector<3x16xbf16>
    %cst = arith.constant dense<0.000000e+00> : vector<96x16xf32>
    %3 = tpu.matmul %1, %2, %cst {dimension_numbers = #tpu.dot_dimension_numbers<[1], [0], [0], [1], [0, 0, 1, 1], [], []>} : vector<96x3xbf16>, vector<3x16xbf16>, vector<96x16xf32> -> vector<96x16xf32>
    %c0_3 = arith.constant 0 : index
    %c0_4 = arith.constant 0 : index
    %4 = vector.load %arg3[%c0_3, %c0_4] : memref<1x16xf32, #tpu.memory_space<vmem>>, vector<1x16xf32>
    %5 = vector.broadcast %4 : vector<1x16xf32> to vector<96x16xf32>
    %6 = arith.addf %3, %5 : vector<96x16xf32>
    %cst_5 = arith.constant 0.000000e+00 : f32
    %7 = vector.broadcast %cst_5 : f32 to vector<96x16xf32>
    %8 = arith.cmpf oge, %6, %7 : vector<96x16xf32>
    %cst_6 = arith.constant 1.000000e-01 : f32
    %9 = vector.broadcast %cst_6 : f32 to vector<96x16xf32>
    %10 = arith.mulf %9, %6 : vector<96x16xf32>
    %11 = arith.select %8, %6, %10 : vector<96x16xi1>, vector<96x16xf32>
    %c0_7 = arith.constant 0 : index
    %c0_8 = arith.constant 0 : index
    %12 = vector.load %arg4[%c0_7, %c0_8] : memref<96x16xf32, #tpu.memory_space<vmem>>, vector<96x16xf32>
    tpu.vector_store %arg4[%c0_7, %c0_8], %11 {strides = array<i32>} : memref<96x16xf32, #tpu.memory_space<vmem>>, vector<96x16xf32>,
    return
  }
  func.func @transform_0(%arg0: i32) -> (i32, i32) {
    %c0_i32 = arith.constant 0 : i32
    %c0_i32_0 = arith.constant 0 : i32
    return %arg0, %c0_i32 : i32, i32
  }
  func.func @transform_1(%arg0: i32) -> (i32, i32) {
    %c0_i32 = arith.constant 0 : i32
    %c0_i32_0 = arith.constant 0 : i32
    %c0_i32_1 = arith.constant 0 : i32
    return %c0_i32, %c0_i32_0 : i32, i32
  }
  func.func @transform_2(%arg0: i32) -> (i32, i32) {
    %c0_i32 = arith.constant 0 : i32
    %c0_i32_0 = arith.constant 0 : i32
    %c0_i32_1 = arith.constant 0 : i32
    return %c0_i32, %c0_i32_0 : i32, i32
  }
  func.func @transform_3(%arg0: i32) -> (i32, i32) {
    %c0_i32 = arith.constant 0 : i32
    %c0_i32_0 = arith.constant 0 : i32
    return %arg0, %c0_i32 : i32, i32
  }
}

module attributes {stable_mosaic.version = 11 : i64} {
  func.func @_fused_linear_kernel(%arg0: i32, %arg1: memref<96x16xf32, #tpu.memory_space<vmem>>, %arg2: memref<16x48xbf16, #tpu.memory_space<vmem>>, %arg3: memref<1x48xf32, #tpu.memory_space<vmem>>, %arg4: memref<96x48xf32, #tpu.memory_space<vmem>>) attributes {dimension_semantics = [#tpu.dimension_semantics<parallel>], iteration_bounds = array<i64: 1>, scalar_prefetch = 0 : i64, scratch_operands = 0 : i64, tpu.core_type = #tpu.core_type<tc>, window_params = [{transform_indices = @transform_0, window_bounds = array<i64: 96, 16>}, {pipeline_mode = #tpu.pipeline_mode<synchronous>, transform_indices = @transform_1, window_bounds = array<i64: 16, 48>}, {pipeline_mode = #tpu.pipeline_mode<synchronous>, transform_indices = @transform_2, window_bounds = array<i64: 1, 48>}, {transform_indices = @transform_3, window_bounds = array<i64: 96, 48>}]} {
    %c0 = arith.constant 0 : index
    %c0_0 = arith.constant 0 : index
    %0 = vector.load %arg1[%c0, %c0_0] : memref<96x16xf32, #tpu.memory_space<vmem>>, vector<96x16xf32>
    %1 = arith.truncf %0 : vector<96x16xf32> to vector<96x16xbf16>
    %c0_1 = arith.constant 0 : index
    %c0_2 = arith.constant 0 : index
    %2 = vector.load %arg2[%c0_1, %c0_2] : memref<16x48xbf16, #tpu.memory_space<vmem>>, vector<16x48xbf16>
    %cst = arith.constant dense<0.000000e+00> : vector<96x48xf32>
    %3 = tpu.matmul %1, %2, %cst {dimension_numbers = #tpu.dot_dimension_numbers<[1], [0], [0], [1], [0, 0, 1, 1], [], []>} : vector<96x16xbf16>, vector<16x48xbf16>, vector<96x48xf32> -> vector<96x48xf32>
    %c0_3 = arith.constant 0 : index
    %c0_4 = arith.constant 0 : index
    %4 = vector.load %arg3[%c0_3, %c0_4] : memref<1x48xf32, #tpu.memory_space<vmem>>, vector<1x48xf32>
    %5 = vector.broadcast %4 : vector<1x48xf32> to vector<96x48xf32>
    %6 = arith.addf %3, %5 : vector<96x48xf32>
    %c0_5 = arith.constant 0 : index
    %c0_6 = arith.constant 0 : index
    %7 = vector.load %arg4[%c0_5, %c0_6] : memref<96x48xf32, #tpu.memory_space<vmem>>, vector<96x48xf32>
    tpu.vector_store %arg4[%c0_5, %c0_6], %6 {strides = array<i32>} : memref<96x48xf32, #tpu.memory_space<vmem>>, vector<96x48xf32>,
    return
  }
  func.func @transform_0(%arg0: i32) -> (i32, i32) {
    %c0_i32 = arith.constant 0 : i32
    %c0_i32_0 = arith.constant 0 : i32
    return %arg0, %c0_i32 : i32, i32
  }
  func.func @transform_1(%arg0: i32) -> (i32, i32) {
    %c0_i32 = arith.constant 0 : i32
    %c0_i32_0 = arith.constant 0 : i32
    %c0_i32_1 = arith.constant 0 : i32
    return %c0_i32, %c0_i32_0 : i32, i32
  }
  func.func @transform_2(%arg0: i32) -> (i32, i32) {
    %c0_i32 = arith.constant 0 : i32
    %c0_i32_0 = arith.constant 0 : i32
    %c0_i32_1 = arith.constant 0 : i32
    return %c0_i32, %c0_i32_0 : i32, i32
  }
  func.func @transform_3(%arg0: i32) -> (i32, i32) {
    %c0_i32 = arith.constant 0 : i32
    %c0_i32_0 = arith.constant 0 : i32
    return %arg0, %c0_i32 : i32, i32
  }
}

module attributes {stable_mosaic.version = 11 : i64} {
  func.func @_sta_attn_kernel(%arg0: i32, %arg1: memref<3xf32, #tpu.memory_space<smem>>, %arg2: memref<3xf32, #tpu.memory_space<smem>>, %arg3: memref<1x3x16x16xf32, #tpu.memory_space<vmem>>, %arg4: memref<1x3x16x16xf32, #tpu.memory_space<vmem>>, %arg5: memref<1x16x32xf32, #tpu.memory_space<vmem>>, %arg6: memref<1x3x16x32xf32, #tpu.memory_space<vmem>>) attributes {dimension_semantics = [#tpu.dimension_semantics<parallel>], iteration_bounds = array<i64: 3>, scalar_prefetch = 0 : i64, scratch_operands = 0 : i64, tpu.core_type = #tpu.core_type<tc>, window_params = [{transform_indices = @transform_0, window_bounds = array<i64: 3>}, {transform_indices = @transform_1, window_bounds = array<i64: 3>}, {transform_indices = @transform_2, window_bounds = array<i64: 1, 3, 16, 16>}, {transform_indices = @transform_3, window_bounds = array<i64: 1, 3, 16, 16>}, {transform_indices = @transform_4, window_bounds = array<i64: 1, 16, 32>}, {transform_indices = @transform_5, window_bounds = array<i64: 1, 3, 16, 32>}]} {
    %c0 = arith.constant 0 : index
    %c0_0 = arith.constant 0 : index
    %c0_1 = arith.constant 0 : index
    %0 = vector.load %arg5[%c0, %c0_0, %c0_1] : memref<1x16x32xf32, #tpu.memory_space<vmem>>, vector<1x16x32xf32>
    %1 = vector.shape_cast %0 : vector<1x16x32xf32> to vector<16x32xf32>
    %c0_2 = arith.constant 0 : index
    %c0_3 = arith.constant 0 : index
    %c0_4 = arith.constant 0 : index
    %c0_5 = arith.constant 0 : index
    %2 = vector.load %arg3[%c0_2, %c0_3, %c0_4, %c0_5] : memref<1x3x16x16xf32, #tpu.memory_space<vmem>>, vector<1x1x16x16xf32>
    %3 = vector.shape_cast %2 : vector<1x1x16x16xf32> to vector<16x16xf32>
    %c0_6 = arith.constant 0 : index
    %c0_7 = arith.constant 0 : index
    %c0_8 = arith.constant 0 : index
    %c0_9 = arith.constant 0 : index
    %4 = vector.load %arg4[%c0_6, %c0_7, %c0_8, %c0_9] : memref<1x3x16x16xf32, #tpu.memory_space<vmem>>, vector<1x1x16x16xf32>
    %5 = vector.shape_cast %4 : vector<1x1x16x16xf32> to vector<16x16xf32>
    %cst = arith.constant dense<0.000000e+00> : vector<16x16xf32>
    %6 = tpu.matmul %3, %5, %cst {dimension_numbers = #tpu.dot_dimension_numbers<[0], [0], [1], [1], [0, 1, 1, 1], [], []>} : vector<16x16xf32>, vector<16x16xf32>, vector<16x16xf32> -> vector<16x16xf32>
    %c0_10 = arith.constant 0 : index
    %7 = memref.load %arg1[%c0_10] : memref<3xf32, #tpu.memory_space<smem>>
    %cst_11 = arith.constant 6.250000e-02 : f32
    %8 = arith.mulf %7, %cst_11 : f32
    %9 = vector.broadcast %8 : f32 to vector<16x16xf32>
    %10 = arith.mulf %6, %9 : vector<16x16xf32>
    %c0_12 = arith.constant 0 : index
    %11 = memref.load %arg2[%c0_12] : memref<3xf32, #tpu.memory_space<smem>>
    %12 = vector.broadcast %11 : f32 to vector<16x16xf32>
    %13 = arith.addf %10, %12 : vector<16x16xf32>
    %cst_13 = arith.constant dense<0xFF800000> : vector<16xf32>
    %14 = vector.multi_reduction <maximumf>, %13, %cst_13 [1] : vector<16x16xf32> to vector<16xf32>
    %15 = vector.shape_cast %14 : vector<16xf32> to vector<16x1xf32>
    %16 = vector.broadcast %15 : vector<16x1xf32> to vector<16x16xf32>
    %17 = arith.subf %13, %16 : vector<16x16xf32>
    %18 = math.exp %17 : vector<16x16xf32>
    %cst_14 = arith.constant dense<0.000000e+00> : vector<16xf32>
    %19 = vector.multi_reduction <add>, %18, %cst_14 [1] : vector<16x16xf32> to vector<16xf32>
    %20 = vector.shape_cast %19 : vector<16xf32> to vector<16x1xf32>
    %21 = tpu.reciprocal %20 {approx = true} : vector<16x1xf32> -> vector<16x1xf32>
    %22 = vector.broadcast %21 : vector<16x1xf32> to vector<16x16xf32>
    %23 = arith.mulf %18, %22 : vector<16x16xf32>
    %cst_15 = arith.constant dense<0.000000e+00> : vector<16x32xf32>
    %24 = tpu.matmul %23, %1, %cst_15 {dimension_numbers = #tpu.dot_dimension_numbers<[0], [0], [1], [1], [0, 1, 1, 1], [], []>} : vector<16x16xf32>, vector<16x32xf32>, vector<16x32xf32> -> vector<16x32xf32>
    %c0_16 = arith.constant 0 : index
    %c0_17 = arith.constant 0 : index
    %c0_18 = arith.constant 0 : index
    %c0_19 = arith.constant 0 : index
    %25 = vector.load %arg6[%c0_16, %c0_17, %c0_18, %c0_19] : memref<1x3x16x32xf32, #tpu.memory_space<vmem>>, vector<1x1x16x32xf32>
    %26 = vector.shape_cast %25 : vector<1x1x16x32xf32> to vector<16x32xf32>
    %27 = vector.shape_cast %24 : vector<16x32xf32> to vector<1x1x16x32xf32>
    tpu.vector_store %arg6[%c0_16, %c0_17, %c0_18, %c0_19], %27 {strides = array<i32>} : memref<1x3x16x32xf32, #tpu.memory_space<vmem>>, vector<1x1x16x32xf32>,
    %c0_20 = arith.constant 0 : index
    %c1 = arith.constant 1 : index
    %c0_21 = arith.constant 0 : index
    %c0_22 = arith.constant 0 : index
    %28 = vector.load %arg3[%c0_20, %c1, %c0_21, %c0_22] : memref<1x3x16x16xf32, #tpu.memory_space<vmem>>, vector<1x1x16x16xf32>
    %29 = vector.shape_cast %28 : vector<1x1x16x16xf32> to vector<16x16xf32>
    %c0_23 = arith.constant 0 : index
    %c1_24 = arith.constant 1 : index
    %c0_25 = arith.constant 0 : index
    %c0_26 = arith.constant 0 : index
    %30 = vector.load %arg4[%c0_23, %c1_24, %c0_25, %c0_26] : memref<1x3x16x16xf32, #tpu.memory_space<vmem>>, vector<1x1x16x16xf32>
    %31 = vector.shape_cast %30 : vector<1x1x16x16xf32> to vector<16x16xf32>
    %cst_27 = arith.constant dense<0.000000e+00> : vector<16x16xf32>
    %32 = tpu.matmul %29, %31, %cst_27 {dimension_numbers = #tpu.dot_dimension_numbers<[0], [0], [1], [1], [0, 1, 1, 1], [], []>} : vector<16x16xf32>, vector<16x16xf32>, vector<16x16xf32> -> vector<16x16xf32>
    %c1_28 = arith.constant 1 : index
    %33 = memref.load %arg1[%c1_28] : memref<3xf32, #tpu.memory_space<smem>>
    %cst_29 = arith.constant 6.250000e-02 : f32
    %34 = arith.mulf %33, %cst_29 : f32
    %35 = vector.broadcast %34 : f32 to vector<16x16xf32>
    %36 = arith.mulf %32, %35 : vector<16x16xf32>
    %c1_30 = arith.constant 1 : index
    %37 = memref.load %arg2[%c1_30] : memref<3xf32, #tpu.memory_space<smem>>
    %38 = vector.broadcast %37 : f32 to vector<16x16xf32>
    %39 = arith.addf %36, %38 : vector<16x16xf32>
    %cst_31 = arith.constant dense<0xFF800000> : vector<16xf32>
    %40 = vector.multi_reduction <maximumf>, %39, %cst_31 [1] : vector<16x16xf32> to vector<16xf32>
    %41 = vector.shape_cast %40 : vector<16xf32> to vector<16x1xf32>
    %42 = vector.broadcast %41 : vector<16x1xf32> to vector<16x16xf32>
    %43 = arith.subf %39, %42 : vector<16x16xf32>
    %44 = math.exp %43 : vector<16x16xf32>
    %cst_32 = arith.constant dense<0.000000e+00> : vector<16xf32>
    %45 = vector.multi_reduction <add>, %44, %cst_32 [1] : vector<16x16xf32> to vector<16xf32>
    %46 = vector.shape_cast %45 : vector<16xf32> to vector<16x1xf32>
    %47 = tpu.reciprocal %46 {approx = true} : vector<16x1xf32> -> vector<16x1xf32>
    %48 = vector.broadcast %47 : vector<16x1xf32> to vector<16x16xf32>
    %49 = arith.mulf %44, %48 : vector<16x16xf32>
    %cst_33 = arith.constant dense<0.000000e+00> : vector<16x32xf32>
    %50 = tpu.matmul %49, %1, %cst_33 {dimension_numbers = #tpu.dot_dimension_numbers<[0], [0], [1], [1], [0, 1, 1, 1], [], []>} : vector<16x16xf32>, vector<16x32xf32>, vector<16x32xf32> -> vector<16x32xf32>
    %c0_34 = arith.constant 0 : index
    %c1_35 = arith.constant 1 : index
    %c0_36 = arith.constant 0 : index
    %c0_37 = arith.constant 0 : index
    %51 = vector.load %arg6[%c0_34, %c1_35, %c0_36, %c0_37] : memref<1x3x16x32xf32, #tpu.memory_space<vmem>>, vector<1x1x16x32xf32>
    %52 = vector.shape_cast %51 : vector<1x1x16x32xf32> to vector<16x32xf32>
    %53 = vector.shape_cast %50 : vector<16x32xf32> to vector<1x1x16x32xf32>
    tpu.vector_store %arg6[%c0_34, %c1_35, %c0_36, %c0_37], %53 {strides = array<i32>} : memref<1x3x16x32xf32, #tpu.memory_space<vmem>>, vector<1x1x16x32xf32>,
    %c0_38 = arith.constant 0 : index
    %c2 = arith.constant 2 : index
    %c0_39 = arith.constant 0 : index
    %c0_40 = arith.constant 0 : index
    %54 = vector.load %arg3[%c0_38, %c2, %c0_39, %c0_40] : memref<1x3x16x16xf32, #tpu.memory_space<vmem>>, vector<1x1x16x16xf32>
    %55 = vector.shape_cast %54 : vector<1x1x16x16xf32> to vector<16x16xf32>
    %c0_41 = arith.constant 0 : index
    %c2_42 = arith.constant 2 : index
    %c0_43 = arith.constant 0 : index
    %c0_44 = arith.constant 0 : index
    %56 = vector.load %arg4[%c0_41, %c2_42, %c0_43, %c0_44] : memref<1x3x16x16xf32, #tpu.memory_space<vmem>>, vector<1x1x16x16xf32>
    %57 = vector.shape_cast %56 : vector<1x1x16x16xf32> to vector<16x16xf32>
    %cst_45 = arith.constant dense<0.000000e+00> : vector<16x16xf32>
    %58 = tpu.matmul %55, %57, %cst_45 {dimension_numbers = #tpu.dot_dimension_numbers<[0], [0], [1], [1], [0, 1, 1, 1], [], []>} : vector<16x16xf32>, vector<16x16xf32>, vector<16x16xf32> -> vector<16x16xf32>
    %c2_46 = arith.constant 2 : index
    %59 = memref.load %arg1[%c2_46] : memref<3xf32, #tpu.memory_space<smem>>
    %cst_47 = arith.constant 6.250000e-02 : f32
    %60 = arith.mulf %59, %cst_47 : f32
    %61 = vector.broadcast %60 : f32 to vector<16x16xf32>
    %62 = arith.mulf %58, %61 : vector<16x16xf32>
    %c2_48 = arith.constant 2 : index
    %63 = memref.load %arg2[%c2_48] : memref<3xf32, #tpu.memory_space<smem>>
    %64 = vector.broadcast %63 : f32 to vector<16x16xf32>
    %65 = arith.addf %62, %64 : vector<16x16xf32>
    %cst_49 = arith.constant dense<0xFF800000> : vector<16xf32>
    %66 = vector.multi_reduction <maximumf>, %65, %cst_49 [1] : vector<16x16xf32> to vector<16xf32>
    %67 = vector.shape_cast %66 : vector<16xf32> to vector<16x1xf32>
    %68 = vector.broadcast %67 : vector<16x1xf32> to vector<16x16xf32>
    %69 = arith.subf %65, %68 : vector<16x16xf32>
    %70 = math.exp %69 : vector<16x16xf32>
    %cst_50 = arith.constant dense<0.000000e+00> : vector<16xf32>
    %71 = vector.multi_reduction <add>, %70, %cst_50 [1] : vector<16x16xf32> to vector<16xf32>
    %72 = vector.shape_cast %71 : vector<16xf32> to vector<16x1xf32>
    %73 = tpu.reciprocal %72 {approx = true} : vector<16x1xf32> -> vector<16x1xf32>
    %74 = vector.broadcast %73 : vector<16x1xf32> to vector<16x16xf32>
    %75 = arith.mulf %70, %74 : vector<16x16xf32>
    %cst_51 = arith.constant dense<0.000000e+00> : vector<16x32xf32>
    %76 = tpu.matmul %75, %1, %cst_51 {dimension_numbers = #tpu.dot_dimension_numbers<[0], [0], [1], [1], [0, 1, 1, 1], [], []>} : vector<16x16xf32>, vector<16x32xf32>, vector<16x32xf32> -> vector<16x32xf32>
    %c0_52 = arith.constant 0 : index
    %c2_53 = arith.constant 2 : index
    %c0_54 = arith.constant 0 : index
    %c0_55 = arith.constant 0 : index
    %77 = vector.load %arg6[%c0_52, %c2_53, %c0_54, %c0_55] : memref<1x3x16x32xf32, #tpu.memory_space<vmem>>, vector<1x1x16x32xf32>
    %78 = vector.shape_cast %77 : vector<1x1x16x32xf32> to vector<16x32xf32>
    %79 = vector.shape_cast %76 : vector<16x32xf32> to vector<1x1x16x32xf32>
    tpu.vector_store %arg6[%c0_52, %c2_53, %c0_54, %c0_55], %79 {strides = array<i32>} : memref<1x3x16x32xf32, #tpu.memory_space<vmem>>, vector<1x1x16x32xf32>,
    return
  }
  func.func @transform_0(%arg0: i32) -> i32 {
    %c0_i32 = arith.constant 0 : i32
    %c0_i32_0 = arith.constant 0 : i32
    return %c0_i32 : i32
  }
  func.func @transform_1(%arg0: i32) -> i32 {
    %c0_i32 = arith.constant 0 : i32
    %c0_i32_0 = arith.constant 0 : i32
    return %c0_i32 : i32
  }
  func.func @transform_2(%arg0: i32) -> (i32, i32, i32, i32) {
    %c0_i32 = arith.constant 0 : i32
    %c0_i32_0 = arith.constant 0 : i32
    %c0_i32_1 = arith.constant 0 : i32
    %c0_i32_2 = arith.constant 0 : i32
    return %arg0, %c0_i32, %c0_i32_0, %c0_i32_1 : i32, i32, i32, i32
  }
  func.func @transform_3(%arg0: i32) -> (i32, i32, i32, i32) {
    %c0_i32 = arith.constant 0 : i32
    %c0_i32_0 = arith.constant 0 : i32
    %c0_i32_1 = arith.constant 0 : i32
    %c0_i32_2 = arith.constant 0 : i32
    return %arg0, %c0_i32, %c0_i32_0, %c0_i32_1 : i32, i32, i32, i32
  }
  func.func @transform_4(%arg0: i32) -> (i32, i32, i32) {
    %c0_i32 = arith.constant 0 : i32
    %c0_i32_0 = arith.constant 0 : i32
    %c0_i32_1 = arith.constant 0 : i32
    return %arg0, %c0_i32, %c0_i32_0 : i32, i32, i32
  }
  func.func @transform_5(%arg0: i32) -> (i32, i32, i32, i32) {
    %c0_i32 = arith.constant 0 : i32
    %c0_i32_0 = arith.constant 0 : i32
    %c0_i32_1 = arith.constant 0 : i32
    %c0_i32_2 = arith.constant 0 : i32
    return %arg0, %c0_i32, %c0_i32_0, %c0_i32_1 : i32, i32, i32, i32
  }
}

module attributes {stable_mosaic.version = 11 : i64} {
  func.func @_tap_conv_kernel(%arg0: i32, %arg1: memref<8x20x48xf32, #tpu.memory_space<vmem>>, %arg2: memref<5x48x16xbf16, #tpu.memory_space<vmem>>, %arg3: memref<1x16xf32, #tpu.memory_space<vmem>>, %arg4: memref<8x16x16xf32, #tpu.memory_space<vmem>>, %arg5: memref<8x16x16xf32, #tpu.memory_space<vmem>>) attributes {dimension_semantics = [#tpu.dimension_semantics<parallel>], iteration_bounds = array<i64: 1>, scalar_prefetch = 0 : i64, scratch_operands = 0 : i64, tpu.core_type = #tpu.core_type<tc>, window_params = [{transform_indices = @transform_0, window_bounds = array<i64: 8, 20, 48>}, {pipeline_mode = #tpu.pipeline_mode<synchronous>, transform_indices = @transform_1, window_bounds = array<i64: 5, 48, 16>}, {pipeline_mode = #tpu.pipeline_mode<synchronous>, transform_indices = @transform_2, window_bounds = array<i64: 1, 16>}, {transform_indices = @transform_3, window_bounds = array<i64: 8, 16, 16>}, {transform_indices = @transform_4, window_bounds = array<i64: 8, 16, 16>}]} {
    %cst = arith.constant 0.000000e+00 : f32
    %0 = vector.broadcast %cst : f32 to vector<128x16xf32>
    %c0 = arith.constant 0 : index
    %c0_0 = arith.constant 0 : index
    %c0_1 = arith.constant 0 : index
    %1 = vector.load %arg1[%c0, %c0_0, %c0_1] : memref<8x20x48xf32, #tpu.memory_space<vmem>>, vector<8x16x48xf32>
    %2 = arith.truncf %1 : vector<8x16x48xf32> to vector<8x16x48xbf16>
    %3 = vector.shape_cast %2 : vector<8x16x48xbf16> to vector<128x48xbf16>
    %c0_2 = arith.constant 0 : index
    %c0_3 = arith.constant 0 : index
    %c0_4 = arith.constant 0 : index
    %4 = vector.load %arg2[%c0_2, %c0_3, %c0_4] : memref<5x48x16xbf16, #tpu.memory_space<vmem>>, vector<1x48x16xbf16>
    %5 = vector.shape_cast %4 : vector<1x48x16xbf16> to vector<48x16xbf16>
    %cst_5 = arith.constant dense<0.000000e+00> : vector<128x16xf32>
    %6 = tpu.matmul %3, %5, %cst_5 {dimension_numbers = #tpu.dot_dimension_numbers<[1], [0], [0], [1], [0, 0, 1, 1], [], []>} : vector<128x48xbf16>, vector<48x16xbf16>, vector<128x16xf32> -> vector<128x16xf32>
    %7 = arith.addf %0, %6 : vector<128x16xf32>
    %c0_6 = arith.constant 0 : index
    %c1 = arith.constant 1 : index
    %c0_7 = arith.constant 0 : index
    %8 = vector.load %arg1[%c0_6, %c1, %c0_7] : memref<8x20x48xf32, #tpu.memory_space<vmem>>, vector<8x16x48xf32>
    %9 = arith.truncf %8 : vector<8x16x48xf32> to vector<8x16x48xbf16>
    %10 = vector.shape_cast %9 : vector<8x16x48xbf16> to vector<128x48xbf16>
    %c1_8 = arith.constant 1 : index
    %c0_9 = arith.constant 0 : index
    %c0_10 = arith.constant 0 : index
    %11 = vector.load %arg2[%c1_8, %c0_9, %c0_10] : memref<5x48x16xbf16, #tpu.memory_space<vmem>>, vector<1x48x16xbf16>
    %12 = vector.shape_cast %11 : vector<1x48x16xbf16> to vector<48x16xbf16>
    %cst_11 = arith.constant dense<0.000000e+00> : vector<128x16xf32>
    %13 = tpu.matmul %10, %12, %cst_11 {dimension_numbers = #tpu.dot_dimension_numbers<[1], [0], [0], [1], [0, 0, 1, 1], [], []>} : vector<128x48xbf16>, vector<48x16xbf16>, vector<128x16xf32> -> vector<128x16xf32>
    %14 = arith.addf %7, %13 : vector<128x16xf32>
    %c0_12 = arith.constant 0 : index
    %c2 = arith.constant 2 : index
    %c0_13 = arith.constant 0 : index
    %15 = vector.load %arg1[%c0_12, %c2, %c0_13] : memref<8x20x48xf32, #tpu.memory_space<vmem>>, vector<8x16x48xf32>
    %16 = arith.truncf %15 : vector<8x16x48xf32> to vector<8x16x48xbf16>
    %17 = vector.shape_cast %16 : vector<8x16x48xbf16> to vector<128x48xbf16>
    %c2_14 = arith.constant 2 : index
    %c0_15 = arith.constant 0 : index
    %c0_16 = arith.constant 0 : index
    %18 = vector.load %arg2[%c2_14, %c0_15, %c0_16] : memref<5x48x16xbf16, #tpu.memory_space<vmem>>, vector<1x48x16xbf16>
    %19 = vector.shape_cast %18 : vector<1x48x16xbf16> to vector<48x16xbf16>
    %cst_17 = arith.constant dense<0.000000e+00> : vector<128x16xf32>
    %20 = tpu.matmul %17, %19, %cst_17 {dimension_numbers = #tpu.dot_dimension_numbers<[1], [0], [0], [1], [0, 0, 1, 1], [], []>} : vector<128x48xbf16>, vector<48x16xbf16>, vector<128x16xf32> -> vector<128x16xf32>
    %21 = arith.addf %14, %20 : vector<128x16xf32>
    %c0_18 = arith.constant 0 : index
    %c3 = arith.constant 3 : index
    %c0_19 = arith.constant 0 : index
    %22 = vector.load %arg1[%c0_18, %c3, %c0_19] : memref<8x20x48xf32, #tpu.memory_space<vmem>>, vector<8x16x48xf32>
    %23 = arith.truncf %22 : vector<8x16x48xf32> to vector<8x16x48xbf16>
    %24 = vector.shape_cast %23 : vector<8x16x48xbf16> to vector<128x48xbf16>
    %c3_20 = arith.constant 3 : index
    %c0_21 = arith.constant 0 : index
    %c0_22 = arith.constant 0 : index
    %25 = vector.load %arg2[%c3_20, %c0_21, %c0_22] : memref<5x48x16xbf16, #tpu.memory_space<vmem>>, vector<1x48x16xbf16>
    %26 = vector.shape_cast %25 : vector<1x48x16xbf16> to vector<48x16xbf16>
    %cst_23 = arith.constant dense<0.000000e+00> : vector<128x16xf32>
    %27 = tpu.matmul %24, %26, %cst_23 {dimension_numbers = #tpu.dot_dimension_numbers<[1], [0], [0], [1], [0, 0, 1, 1], [], []>} : vector<128x48xbf16>, vector<48x16xbf16>, vector<128x16xf32> -> vector<128x16xf32>
    %28 = arith.addf %21, %27 : vector<128x16xf32>
    %c0_24 = arith.constant 0 : index
    %c4 = arith.constant 4 : index
    %c0_25 = arith.constant 0 : index
    %29 = vector.load %arg1[%c0_24, %c4, %c0_25] : memref<8x20x48xf32, #tpu.memory_space<vmem>>, vector<8x16x48xf32>
    %30 = arith.truncf %29 : vector<8x16x48xf32> to vector<8x16x48xbf16>
    %31 = vector.shape_cast %30 : vector<8x16x48xbf16> to vector<128x48xbf16>
    %c4_26 = arith.constant 4 : index
    %c0_27 = arith.constant 0 : index
    %c0_28 = arith.constant 0 : index
    %32 = vector.load %arg2[%c4_26, %c0_27, %c0_28] : memref<5x48x16xbf16, #tpu.memory_space<vmem>>, vector<1x48x16xbf16>
    %33 = vector.shape_cast %32 : vector<1x48x16xbf16> to vector<48x16xbf16>
    %cst_29 = arith.constant dense<0.000000e+00> : vector<128x16xf32>
    %34 = tpu.matmul %31, %33, %cst_29 {dimension_numbers = #tpu.dot_dimension_numbers<[1], [0], [0], [1], [0, 0, 1, 1], [], []>} : vector<128x48xbf16>, vector<48x16xbf16>, vector<128x16xf32> -> vector<128x16xf32>
    %35 = arith.addf %28, %34 : vector<128x16xf32>
    %c0_30 = arith.constant 0 : index
    %c0_31 = arith.constant 0 : index
    %36 = vector.load %arg3[%c0_30, %c0_31] : memref<1x16xf32, #tpu.memory_space<vmem>>, vector<1x16xf32>
    %37 = vector.broadcast %36 : vector<1x16xf32> to vector<128x16xf32>
    %38 = arith.addf %35, %37 : vector<128x16xf32>
    %c0_32 = arith.constant 0 : index
    %c0_33 = arith.constant 0 : index
    %c0_34 = arith.constant 0 : index
    %39 = vector.load %arg4[%c0_32, %c0_33, %c0_34] : memref<8x16x16xf32, #tpu.memory_space<vmem>>, vector<8x16x16xf32>
    %40 = vector.shape_cast %39 : vector<8x16x16xf32> to vector<128x16xf32>
    %41 = arith.addf %38, %40 : vector<128x16xf32>
    %cst_35 = arith.constant 0.000000e+00 : f32
    %42 = vector.broadcast %cst_35 : f32 to vector<128x16xf32>
    %43 = arith.cmpf oge, %41, %42 : vector<128x16xf32>
    %cst_36 = arith.constant 1.000000e-01 : f32
    %44 = vector.broadcast %cst_36 : f32 to vector<128x16xf32>
    %45 = arith.mulf %44, %41 : vector<128x16xf32>
    %46 = arith.select %43, %41, %45 : vector<128x16xi1>, vector<128x16xf32>
    %47 = vector.shape_cast %46 : vector<128x16xf32> to vector<8x16x16xf32>
    %c0_37 = arith.constant 0 : index
    %c0_38 = arith.constant 0 : index
    %c0_39 = arith.constant 0 : index
    %48 = vector.load %arg5[%c0_37, %c0_38, %c0_39] : memref<8x16x16xf32, #tpu.memory_space<vmem>>, vector<8x16x16xf32>
    tpu.vector_store %arg5[%c0_37, %c0_38, %c0_39], %47 {strides = array<i32>} : memref<8x16x16xf32, #tpu.memory_space<vmem>>, vector<8x16x16xf32>,
    return
  }
  func.func @transform_0(%arg0: i32) -> (i32, i32, i32) {
    %c0_i32 = arith.constant 0 : i32
    %c0_i32_0 = arith.constant 0 : i32
    %c0_i32_1 = arith.constant 0 : i32
    return %arg0, %c0_i32, %c0_i32_0 : i32, i32, i32
  }
  func.func @transform_1(%arg0: i32) -> (i32, i32, i32) {
    %c0_i32 = arith.constant 0 : i32
    %c0_i32_0 = arith.constant 0 : i32
    %c0_i32_1 = arith.constant 0 : i32
    %c0_i32_2 = arith.constant 0 : i32
    return %c0_i32, %c0_i32_0, %c0_i32_1 : i32, i32, i32
  }
  func.func @transform_2(%arg0: i32) -> (i32, i32) {
    %c0_i32 = arith.constant 0 : i32
    %c0_i32_0 = arith.constant 0 : i32
    %c0_i32_1 = arith.constant 0 : i32
    return %c0_i32, %c0_i32_0 : i32, i32
  }
  func.func @transform_3(%arg0: i32) -> (i32, i32, i32) {
    %c0_i32 = arith.constant 0 : i32
    %c0_i32_0 = arith.constant 0 : i32
    %c0_i32_1 = arith.constant 0 : i32
    return %arg0, %c0_i32, %c0_i32_0 : i32, i32, i32
  }
  func.func @transform_4(%arg0: i32) -> (i32, i32, i32) {
    %c0_i32 = arith.constant 0 : i32
    %c0_i32_0 = arith.constant 0 : i32
    %c0_i32_1 = arith.constant 0 : i32
    return %arg0, %c0_i32, %c0_i32_0 : i32, i32, i32
  }
}

module attributes {stable_mosaic.version = 11 : i64} {
  func.func @_fused_linear_kernel(%arg0: i32, %arg1: memref<96x16xf32, #tpu.memory_space<vmem>>, %arg2: memref<16x16xbf16, #tpu.memory_space<vmem>>, %arg3: memref<1x16xf32, #tpu.memory_space<vmem>>, %arg4: memref<96x16xf32, #tpu.memory_space<vmem>>, %arg5: memref<96x16xf32, #tpu.memory_space<vmem>>) attributes {dimension_semantics = [#tpu.dimension_semantics<parallel>], iteration_bounds = array<i64: 1>, scalar_prefetch = 0 : i64, scratch_operands = 0 : i64, tpu.core_type = #tpu.core_type<tc>, window_params = [{transform_indices = @transform_0, window_bounds = array<i64: 96, 16>}, {pipeline_mode = #tpu.pipeline_mode<synchronous>, transform_indices = @transform_1, window_bounds = array<i64: 16, 16>}, {pipeline_mode = #tpu.pipeline_mode<synchronous>, transform_indices = @transform_2, window_bounds = array<i64: 1, 16>}, {transform_indices = @transform_3, window_bounds = array<i64: 96, 16>}, {transform_indices = @transform_4, window_bounds = array<i64: 96, 16>}]} {
    %c0 = arith.constant 0 : index
    %c0_0 = arith.constant 0 : index
    %0 = vector.load %arg1[%c0, %c0_0] : memref<96x16xf32, #tpu.memory_space<vmem>>, vector<96x16xf32>
    %1 = arith.truncf %0 : vector<96x16xf32> to vector<96x16xbf16>
    %c0_1 = arith.constant 0 : index
    %c0_2 = arith.constant 0 : index
    %2 = vector.load %arg2[%c0_1, %c0_2] : memref<16x16xbf16, #tpu.memory_space<vmem>>, vector<16x16xbf16>
    %cst = arith.constant dense<0.000000e+00> : vector<96x16xf32>
    %3 = tpu.matmul %1, %2, %cst {dimension_numbers = #tpu.dot_dimension_numbers<[1], [0], [0], [1], [0, 0, 1, 1], [], []>} : vector<96x16xbf16>, vector<16x16xbf16>, vector<96x16xf32> -> vector<96x16xf32>
    %c0_3 = arith.constant 0 : index
    %c0_4 = arith.constant 0 : index
    %4 = vector.load %arg3[%c0_3, %c0_4] : memref<1x16xf32, #tpu.memory_space<vmem>>, vector<1x16xf32>
    %5 = vector.broadcast %4 : vector<1x16xf32> to vector<96x16xf32>
    %6 = arith.addf %3, %5 : vector<96x16xf32>
    %c0_5 = arith.constant 0 : index
    %c0_6 = arith.constant 0 : index
    %7 = vector.load %arg4[%c0_5, %c0_6] : memref<96x16xf32, #tpu.memory_space<vmem>>, vector<96x16xf32>
    %8 = arith.addf %6, %7 : vector<96x16xf32>
    %cst_7 = arith.constant 0.000000e+00 : f32
    %9 = vector.broadcast %cst_7 : f32 to vector<96x16xf32>
    %10 = arith.cmpf oge, %8, %9 : vector<96x16xf32>
    %cst_8 = arith.constant 1.000000e-01 : f32
    %11 = vector.broadcast %cst_8 : f32 to vector<96x16xf32>
    %12 = arith.mulf %11, %8 : vector<96x16xf32>
    %13 = arith.select %10, %8, %12 : vector<96x16xi1>, vector<96x16xf32>
    %c0_9 = arith.constant 0 : index
    %c0_10 = arith.constant 0 : index
    %14 = vector.load %arg5[%c0_9, %c0_10] : memref<96x16xf32, #tpu.memory_space<vmem>>, vector<96x16xf32>
    tpu.vector_store %arg5[%c0_9, %c0_10], %13 {strides = array<i32>} : memref<96x16xf32, #tpu.memory_space<vmem>>, vector<96x16xf32>,
    return
  }
  func.func @transform_0(%arg0: i32) -> (i32, i32) {
    %c0_i32 = arith.constant 0 : i32
    %c0_i32_0 = arith.constant 0 : i32
    return %arg0, %c0_i32 : i32, i32
  }
  func.func @transform_1(%arg0: i32) -> (i32, i32) {
    %c0_i32 = arith.constant 0 : i32
    %c0_i32_0 = arith.constant 0 : i32
    %c0_i32_1 = arith.constant 0 : i32
    return %c0_i32, %c0_i32_0 : i32, i32
  }
  func.func @transform_2(%arg0: i32) -> (i32, i32) {
    %c0_i32 = arith.constant 0 : i32
    %c0_i32_0 = arith.constant 0 : i32
    %c0_i32_1 = arith.constant 0 : i32
    return %c0_i32, %c0_i32_0 : i32, i32
  }
  func.func @transform_3(%arg0: i32) -> (i32, i32) {
    %c0_i32 = arith.constant 0 : i32
    %c0_i32_0 = arith.constant 0 : i32
    return %arg0, %c0_i32 : i32, i32
  }
  func.func @transform_4(%arg0: i32) -> (i32, i32) {
    %c0_i32 = arith.constant 0 : i32
    %c0_i32_0 = arith.constant 0 : i32
    return %arg0, %c0_i32 : i32, i32
  }
}

module attributes {stable_mosaic.version = 11 : i64} {
  func.func @_tap_conv_kernel(%arg0: i32, %arg1: memref<1x4x16x16xf32, #tpu.memory_space<vmem>>, %arg2: memref<3x16x16xbf16, #tpu.memory_space<vmem>>, %arg3: memref<1x16xf32, #tpu.memory_space<vmem>>, %arg4: memref<1x2x16x16xf32, #tpu.memory_space<vmem>>, %arg5: memref<1x2x16x16xf32, #tpu.memory_space<vmem>>) attributes {dimension_semantics = [#tpu.dimension_semantics<parallel>], iteration_bounds = array<i64: 3>, scalar_prefetch = 0 : i64, scratch_operands = 0 : i64, tpu.core_type = #tpu.core_type<tc>, window_params = [{transform_indices = @transform_0, window_bounds = array<i64: 1, 4, 16, 16>}, {pipeline_mode = #tpu.pipeline_mode<synchronous>, transform_indices = @transform_1, window_bounds = array<i64: 3, 16, 16>}, {pipeline_mode = #tpu.pipeline_mode<synchronous>, transform_indices = @transform_2, window_bounds = array<i64: 1, 16>}, {transform_indices = @transform_3, window_bounds = array<i64: 1, 2, 16, 16>}, {transform_indices = @transform_4, window_bounds = array<i64: 1, 2, 16, 16>}]} {
    %cst = arith.constant 0.000000e+00 : f32
    %0 = vector.broadcast %cst : f32 to vector<32x16xf32>
    %c0 = arith.constant 0 : index
    %c0_0 = arith.constant 0 : index
    %c0_1 = arith.constant 0 : index
    %c0_2 = arith.constant 0 : index
    %1 = vector.load %arg1[%c0, %c0_0, %c0_1, %c0_2] : memref<1x4x16x16xf32, #tpu.memory_space<vmem>>, vector<1x2x16x16xf32>
    %2 = arith.truncf %1 : vector<1x2x16x16xf32> to vector<1x2x16x16xbf16>
    %3 = vector.shape_cast %2 : vector<1x2x16x16xbf16> to vector<32x16xbf16>
    %c0_3 = arith.constant 0 : index
    %c0_4 = arith.constant 0 : index
    %c0_5 = arith.constant 0 : index
    %4 = vector.load %arg2[%c0_3, %c0_4, %c0_5] : memref<3x16x16xbf16, #tpu.memory_space<vmem>>, vector<1x16x16xbf16>
    %5 = vector.shape_cast %4 : vector<1x16x16xbf16> to vector<16x16xbf16>
    %cst_6 = arith.constant dense<0.000000e+00> : vector<32x16xf32>
    %6 = tpu.matmul %3, %5, %cst_6 {dimension_numbers = #tpu.dot_dimension_numbers<[1], [0], [0], [1], [0, 0, 1, 1], [], []>} : vector<32x16xbf16>, vector<16x16xbf16>, vector<32x16xf32> -> vector<32x16xf32>
    %7 = arith.addf %0, %6 : vector<32x16xf32>
    %c0_7 = arith.constant 0 : index
    %c1 = arith.constant 1 : index
    %c0_8 = arith.constant 0 : index
    %c0_9 = arith.constant 0 : index
    %8 = vector.load %arg1[%c0_7, %c1, %c0_8, %c0_9] : memref<1x4x16x16xf32, #tpu.memory_space<vmem>>, vector<1x2x16x16xf32>
    %9 = arith.truncf %8 : vector<1x2x16x16xf32> to vector<1x2x16x16xbf16>
    %10 = vector.shape_cast %9 : vector<1x2x16x16xbf16> to vector<32x16xbf16>
    %c1_10 = arith.constant 1 : index
    %c0_11 = arith.constant 0 : index
    %c0_12 = arith.constant 0 : index
    %11 = vector.load %arg2[%c1_10, %c0_11, %c0_12] : memref<3x16x16xbf16, #tpu.memory_space<vmem>>, vector<1x16x16xbf16>
    %12 = vector.shape_cast %11 : vector<1x16x16xbf16> to vector<16x16xbf16>
    %cst_13 = arith.constant dense<0.000000e+00> : vector<32x16xf32>
    %13 = tpu.matmul %10, %12, %cst_13 {dimension_numbers = #tpu.dot_dimension_numbers<[1], [0], [0], [1], [0, 0, 1, 1], [], []>} : vector<32x16xbf16>, vector<16x16xbf16>, vector<32x16xf32> -> vector<32x16xf32>
    %14 = arith.addf %7, %13 : vector<32x16xf32>
    %c0_14 = arith.constant 0 : index
    %c2 = arith.constant 2 : index
    %c0_15 = arith.constant 0 : index
    %c0_16 = arith.constant 0 : index
    %15 = vector.load %arg1[%c0_14, %c2, %c0_15, %c0_16] : memref<1x4x16x16xf32, #tpu.memory_space<vmem>>, vector<1x2x16x16xf32>
    %16 = arith.truncf %15 : vector<1x2x16x16xf32> to vector<1x2x16x16xbf16>
    %17 = vector.shape_cast %16 : vector<1x2x16x16xbf16> to vector<32x16xbf16>
    %c2_17 = arith.constant 2 : index
    %c0_18 = arith.constant 0 : index
    %c0_19 = arith.constant 0 : index
    %18 = vector.load %arg2[%c2_17, %c0_18, %c0_19] : memref<3x16x16xbf16, #tpu.memory_space<vmem>>, vector<1x16x16xbf16>
    %19 = vector.shape_cast %18 : vector<1x16x16xbf16> to vector<16x16xbf16>
    %cst_20 = arith.constant dense<0.000000e+00> : vector<32x16xf32>
    %20 = tpu.matmul %17, %19, %cst_20 {dimension_numbers = #tpu.dot_dimension_numbers<[1], [0], [0], [1], [0, 0, 1, 1], [], []>} : vector<32x16xbf16>, vector<16x16xbf16>, vector<32x16xf32> -> vector<32x16xf32>
    %21 = arith.addf %14, %20 : vector<32x16xf32>
    %c0_21 = arith.constant 0 : index
    %c0_22 = arith.constant 0 : index
    %22 = vector.load %arg3[%c0_21, %c0_22] : memref<1x16xf32, #tpu.memory_space<vmem>>, vector<1x16xf32>
    %23 = vector.broadcast %22 : vector<1x16xf32> to vector<32x16xf32>
    %24 = arith.addf %21, %23 : vector<32x16xf32>
    %c0_23 = arith.constant 0 : index
    %c0_24 = arith.constant 0 : index
    %c0_25 = arith.constant 0 : index
    %c0_26 = arith.constant 0 : index
    %25 = vector.load %arg4[%c0_23, %c0_24, %c0_25, %c0_26] : memref<1x2x16x16xf32, #tpu.memory_space<vmem>>, vector<1x2x16x16xf32>
    %26 = vector.shape_cast %25 : vector<1x2x16x16xf32> to vector<32x16xf32>
    %27 = arith.addf %24, %26 : vector<32x16xf32>
    %cst_27 = arith.constant 0.000000e+00 : f32
    %28 = vector.broadcast %cst_27 : f32 to vector<32x16xf32>
    %29 = arith.cmpf oge, %27, %28 : vector<32x16xf32>
    %cst_28 = arith.constant 1.000000e-01 : f32
    %30 = vector.broadcast %cst_28 : f32 to vector<32x16xf32>
    %31 = arith.mulf %30, %27 : vector<32x16xf32>
    %32 = arith.select %29, %27, %31 : vector<32x16xi1>, vector<32x16xf32>
    %33 = vector.shape_cast %32 : vector<32x16xf32> to vector<1x2x16x16xf32>
    %c0_29 = arith.constant 0 : index
    %c0_30 = arith.constant 0 : index
    %c0_31 = arith.constant 0 : index
    %c0_32 = arith.constant 0 : index
    %34 = vector.load %arg5[%c0_29, %c0_30, %c0_31, %c0_32] : memref<1x2x16x16xf32, #tpu.memory_space<vmem>>, vector<1x2x16x16xf32>
    tpu.vector_store %arg5[%c0_29, %c0_30, %c0_31, %c0_32], %33 {strides = array<i32>} : memref<1x2x16x16xf32, #tpu.memory_space<vmem>>, vector<1x2x16x16xf32>,
    return
  }
  func.func @transform_0(%arg0: i32) -> (i32, i32, i32, i32) {
    %c0_i32 = arith.constant 0 : i32
    %c0_i32_0 = arith.constant 0 : i32
    %c0_i32_1 = arith.constant 0 : i32
    %c0_i32_2 = arith.constant 0 : i32
    return %arg0, %c0_i32, %c0_i32_0, %c0_i32_1 : i32, i32, i32, i32
  }
  func.func @transform_1(%arg0: i32) -> (i32, i32, i32) {
    %c0_i32 = arith.constant 0 : i32
    %c0_i32_0 = arith.constant 0 : i32
    %c0_i32_1 = arith.constant 0 : i32
    %c0_i32_2 = arith.constant 0 : i32
    return %c0_i32, %c0_i32_0, %c0_i32_1 : i32, i32, i32
  }
  func.func @transform_2(%arg0: i32) -> (i32, i32) {
    %c0_i32 = arith.constant 0 : i32
    %c0_i32_0 = arith.constant 0 : i32
    %c0_i32_1 = arith.constant 0 : i32
    return %c0_i32, %c0_i32_0 : i32, i32
  }
  func.func @transform_3(%arg0: i32) -> (i32, i32, i32, i32) {
    %c0_i32 = arith.constant 0 : i32
    %c0_i32_0 = arith.constant 0 : i32
    %c0_i32_1 = arith.constant 0 : i32
    %c0_i32_2 = arith.constant 0 : i32
    return %arg0, %c0_i32, %c0_i32_0, %c0_i32_1 : i32, i32, i32, i32
  }
  func.func @transform_4(%arg0: i32) -> (i32, i32, i32, i32) {
    %c0_i32 = arith.constant 0 : i32
    %c0_i32_0 = arith.constant 0 : i32
    %c0_i32_1 = arith.constant 0 : i32
    %c0_i32_2 = arith.constant 0 : i32
    return %arg0, %c0_i32, %c0_i32_0, %c0_i32_1 : i32, i32, i32, i32
  }
}

module attributes {stable_mosaic.version = 11 : i64} {
  func.func @_fused_linear_kernel(%arg0: i32, %arg1: memref<96x16xf32, #tpu.memory_space<vmem>>, %arg2: memref<16x32xbf16, #tpu.memory_space<vmem>>, %arg3: memref<1x32xf32, #tpu.memory_space<vmem>>, %arg4: memref<96x32xf32, #tpu.memory_space<vmem>>) attributes {dimension_semantics = [#tpu.dimension_semantics<parallel>], iteration_bounds = array<i64: 1>, scalar_prefetch = 0 : i64, scratch_operands = 0 : i64, tpu.core_type = #tpu.core_type<tc>, window_params = [{transform_indices = @transform_0, window_bounds = array<i64: 96, 16>}, {pipeline_mode = #tpu.pipeline_mode<synchronous>, transform_indices = @transform_1, window_bounds = array<i64: 16, 32>}, {pipeline_mode = #tpu.pipeline_mode<synchronous>, transform_indices = @transform_2, window_bounds = array<i64: 1, 32>}, {transform_indices = @transform_3, window_bounds = array<i64: 96, 32>}]} {
    %c0 = arith.constant 0 : index
    %c0_0 = arith.constant 0 : index
    %0 = vector.load %arg1[%c0, %c0_0] : memref<96x16xf32, #tpu.memory_space<vmem>>, vector<96x16xf32>
    %1 = arith.truncf %0 : vector<96x16xf32> to vector<96x16xbf16>
    %c0_1 = arith.constant 0 : index
    %c0_2 = arith.constant 0 : index
    %2 = vector.load %arg2[%c0_1, %c0_2] : memref<16x32xbf16, #tpu.memory_space<vmem>>, vector<16x32xbf16>
    %cst = arith.constant dense<0.000000e+00> : vector<96x32xf32>
    %3 = tpu.matmul %1, %2, %cst {dimension_numbers = #tpu.dot_dimension_numbers<[1], [0], [0], [1], [0, 0, 1, 1], [], []>} : vector<96x16xbf16>, vector<16x32xbf16>, vector<96x32xf32> -> vector<96x32xf32>
    %c0_3 = arith.constant 0 : index
    %c0_4 = arith.constant 0 : index
    %4 = vector.load %arg3[%c0_3, %c0_4] : memref<1x32xf32, #tpu.memory_space<vmem>>, vector<1x32xf32>
    %5 = vector.broadcast %4 : vector<1x32xf32> to vector<96x32xf32>
    %6 = arith.addf %3, %5 : vector<96x32xf32>
    %c0_5 = arith.constant 0 : index
    %c0_6 = arith.constant 0 : index
    %7 = vector.load %arg4[%c0_5, %c0_6] : memref<96x32xf32, #tpu.memory_space<vmem>>, vector<96x32xf32>
    tpu.vector_store %arg4[%c0_5, %c0_6], %6 {strides = array<i32>} : memref<96x32xf32, #tpu.memory_space<vmem>>, vector<96x32xf32>,
    return
  }
  func.func @transform_0(%arg0: i32) -> (i32, i32) {
    %c0_i32 = arith.constant 0 : i32
    %c0_i32_0 = arith.constant 0 : i32
    return %arg0, %c0_i32 : i32, i32
  }
  func.func @transform_1(%arg0: i32) -> (i32, i32) {
    %c0_i32 = arith.constant 0 : i32
    %c0_i32_0 = arith.constant 0 : i32
    %c0_i32_1 = arith.constant 0 : i32
    return %c0_i32, %c0_i32_0 : i32, i32
  }
  func.func @transform_2(%arg0: i32) -> (i32, i32) {
    %c0_i32 = arith.constant 0 : i32
    %c0_i32_0 = arith.constant 0 : i32
    %c0_i32_1 = arith.constant 0 : i32
    return %c0_i32, %c0_i32_0 : i32, i32
  }
  func.func @transform_3(%arg0: i32) -> (i32, i32) {
    %c0_i32 = arith.constant 0 : i32
    %c0_i32_0 = arith.constant 0 : i32
    return %arg0, %c0_i32 : i32, i32
  }
}

module attributes {stable_mosaic.version = 11 : i64} {
  func.func @_tap_conv_kernel(%arg0: i32, %arg1: memref<8x20x48xf32, #tpu.memory_space<vmem>>, %arg2: memref<5x48x32xbf16, #tpu.memory_space<vmem>>, %arg3: memref<1x32xf32, #tpu.memory_space<vmem>>, %arg4: memref<8x16x32xf32, #tpu.memory_space<vmem>>, %arg5: memref<8x16x32xf32, #tpu.memory_space<vmem>>) attributes {dimension_semantics = [#tpu.dimension_semantics<parallel>], iteration_bounds = array<i64: 1>, scalar_prefetch = 0 : i64, scratch_operands = 0 : i64, tpu.core_type = #tpu.core_type<tc>, window_params = [{transform_indices = @transform_0, window_bounds = array<i64: 8, 20, 48>}, {pipeline_mode = #tpu.pipeline_mode<synchronous>, transform_indices = @transform_1, window_bounds = array<i64: 5, 48, 32>}, {pipeline_mode = #tpu.pipeline_mode<synchronous>, transform_indices = @transform_2, window_bounds = array<i64: 1, 32>}, {transform_indices = @transform_3, window_bounds = array<i64: 8, 16, 32>}, {transform_indices = @transform_4, window_bounds = array<i64: 8, 16, 32>}]} {
    %cst = arith.constant 0.000000e+00 : f32
    %0 = vector.broadcast %cst : f32 to vector<128x32xf32>
    %c0 = arith.constant 0 : index
    %c0_0 = arith.constant 0 : index
    %c0_1 = arith.constant 0 : index
    %1 = vector.load %arg1[%c0, %c0_0, %c0_1] : memref<8x20x48xf32, #tpu.memory_space<vmem>>, vector<8x16x48xf32>
    %2 = arith.truncf %1 : vector<8x16x48xf32> to vector<8x16x48xbf16>
    %3 = vector.shape_cast %2 : vector<8x16x48xbf16> to vector<128x48xbf16>
    %c0_2 = arith.constant 0 : index
    %c0_3 = arith.constant 0 : index
    %c0_4 = arith.constant 0 : index
    %4 = vector.load %arg2[%c0_2, %c0_3, %c0_4] : memref<5x48x32xbf16, #tpu.memory_space<vmem>>, vector<1x48x32xbf16>
    %5 = vector.shape_cast %4 : vector<1x48x32xbf16> to vector<48x32xbf16>
    %cst_5 = arith.constant dense<0.000000e+00> : vector<128x32xf32>
    %6 = tpu.matmul %3, %5, %cst_5 {dimension_numbers = #tpu.dot_dimension_numbers<[1], [0], [0], [1], [0, 0, 1, 1], [], []>} : vector<128x48xbf16>, vector<48x32xbf16>, vector<128x32xf32> -> vector<128x32xf32>
    %7 = arith.addf %0, %6 : vector<128x32xf32>
    %c0_6 = arith.constant 0 : index
    %c1 = arith.constant 1 : index
    %c0_7 = arith.constant 0 : index
    %8 = vector.load %arg1[%c0_6, %c1, %c0_7] : memref<8x20x48xf32, #tpu.memory_space<vmem>>, vector<8x16x48xf32>
    %9 = arith.truncf %8 : vector<8x16x48xf32> to vector<8x16x48xbf16>
    %10 = vector.shape_cast %9 : vector<8x16x48xbf16> to vector<128x48xbf16>
    %c1_8 = arith.constant 1 : index
    %c0_9 = arith.constant 0 : index
    %c0_10 = arith.constant 0 : index
    %11 = vector.load %arg2[%c1_8, %c0_9, %c0_10] : memref<5x48x32xbf16, #tpu.memory_space<vmem>>, vector<1x48x32xbf16>
    %12 = vector.shape_cast %11 : vector<1x48x32xbf16> to vector<48x32xbf16>
    %cst_11 = arith.constant dense<0.000000e+00> : vector<128x32xf32>
    %13 = tpu.matmul %10, %12, %cst_11 {dimension_numbers = #tpu.dot_dimension_numbers<[1], [0], [0], [1], [0, 0, 1, 1], [], []>} : vector<128x48xbf16>, vector<48x32xbf16>, vector<128x32xf32> -> vector<128x32xf32>
    %14 = arith.addf %7, %13 : vector<128x32xf32>
    %c0_12 = arith.constant 0 : index
    %c2 = arith.constant 2 : index
    %c0_13 = arith.constant 0 : index
    %15 = vector.load %arg1[%c0_12, %c2, %c0_13] : memref<8x20x48xf32, #tpu.memory_space<vmem>>, vector<8x16x48xf32>
    %16 = arith.truncf %15 : vector<8x16x48xf32> to vector<8x16x48xbf16>
    %17 = vector.shape_cast %16 : vector<8x16x48xbf16> to vector<128x48xbf16>
    %c2_14 = arith.constant 2 : index
    %c0_15 = arith.constant 0 : index
    %c0_16 = arith.constant 0 : index
    %18 = vector.load %arg2[%c2_14, %c0_15, %c0_16] : memref<5x48x32xbf16, #tpu.memory_space<vmem>>, vector<1x48x32xbf16>
    %19 = vector.shape_cast %18 : vector<1x48x32xbf16> to vector<48x32xbf16>
    %cst_17 = arith.constant dense<0.000000e+00> : vector<128x32xf32>
    %20 = tpu.matmul %17, %19, %cst_17 {dimension_numbers = #tpu.dot_dimension_numbers<[1], [0], [0], [1], [0, 0, 1, 1], [], []>} : vector<128x48xbf16>, vector<48x32xbf16>, vector<128x32xf32> -> vector<128x32xf32>
    %21 = arith.addf %14, %20 : vector<128x32xf32>
    %c0_18 = arith.constant 0 : index
    %c3 = arith.constant 3 : index
    %c0_19 = arith.constant 0 : index
    %22 = vector.load %arg1[%c0_18, %c3, %c0_19] : memref<8x20x48xf32, #tpu.memory_space<vmem>>, vector<8x16x48xf32>
    %23 = arith.truncf %22 : vector<8x16x48xf32> to vector<8x16x48xbf16>
    %24 = vector.shape_cast %23 : vector<8x16x48xbf16> to vector<128x48xbf16>
    %c3_20 = arith.constant 3 : index
    %c0_21 = arith.constant 0 : index
    %c0_22 = arith.constant 0 : index
    %25 = vector.load %arg2[%c3_20, %c0_21, %c0_22] : memref<5x48x32xbf16, #tpu.memory_space<vmem>>, vector<1x48x32xbf16>
    %26 = vector.shape_cast %25 : vector<1x48x32xbf16> to vector<48x32xbf16>
    %cst_23 = arith.constant dense<0.000000e+00> : vector<128x32xf32>
    %27 = tpu.matmul %24, %26, %cst_23 {dimension_numbers = #tpu.dot_dimension_numbers<[1], [0], [0], [1], [0, 0, 1, 1], [], []>} : vector<128x48xbf16>, vector<48x32xbf16>, vector<128x32xf32> -> vector<128x32xf32>
    %28 = arith.addf %21, %27 : vector<128x32xf32>
    %c0_24 = arith.constant 0 : index
    %c4 = arith.constant 4 : index
    %c0_25 = arith.constant 0 : index
    %29 = vector.load %arg1[%c0_24, %c4, %c0_25] : memref<8x20x48xf32, #tpu.memory_space<vmem>>, vector<8x16x48xf32>
    %30 = arith.truncf %29 : vector<8x16x48xf32> to vector<8x16x48xbf16>
    %31 = vector.shape_cast %30 : vector<8x16x48xbf16> to vector<128x48xbf16>
    %c4_26 = arith.constant 4 : index
    %c0_27 = arith.constant 0 : index
    %c0_28 = arith.constant 0 : index
    %32 = vector.load %arg2[%c4_26, %c0_27, %c0_28] : memref<5x48x32xbf16, #tpu.memory_space<vmem>>, vector<1x48x32xbf16>
    %33 = vector.shape_cast %32 : vector<1x48x32xbf16> to vector<48x32xbf16>
    %cst_29 = arith.constant dense<0.000000e+00> : vector<128x32xf32>
    %34 = tpu.matmul %31, %33, %cst_29 {dimension_numbers = #tpu.dot_dimension_numbers<[1], [0], [0], [1], [0, 0, 1, 1], [], []>} : vector<128x48xbf16>, vector<48x32xbf16>, vector<128x32xf32> -> vector<128x32xf32>
    %35 = arith.addf %28, %34 : vector<128x32xf32>
    %c0_30 = arith.constant 0 : index
    %c0_31 = arith.constant 0 : index
    %36 = vector.load %arg3[%c0_30, %c0_31] : memref<1x32xf32, #tpu.memory_space<vmem>>, vector<1x32xf32>
    %37 = vector.broadcast %36 : vector<1x32xf32> to vector<128x32xf32>
    %38 = arith.addf %35, %37 : vector<128x32xf32>
    %c0_32 = arith.constant 0 : index
    %c0_33 = arith.constant 0 : index
    %c0_34 = arith.constant 0 : index
    %39 = vector.load %arg4[%c0_32, %c0_33, %c0_34] : memref<8x16x32xf32, #tpu.memory_space<vmem>>, vector<8x16x32xf32>
    %40 = vector.shape_cast %39 : vector<8x16x32xf32> to vector<128x32xf32>
    %41 = arith.addf %38, %40 : vector<128x32xf32>
    %cst_35 = arith.constant 0.000000e+00 : f32
    %42 = vector.broadcast %cst_35 : f32 to vector<128x32xf32>
    %43 = arith.cmpf oge, %41, %42 : vector<128x32xf32>
    %cst_36 = arith.constant 1.000000e-01 : f32
    %44 = vector.broadcast %cst_36 : f32 to vector<128x32xf32>
    %45 = arith.mulf %44, %41 : vector<128x32xf32>
    %46 = arith.select %43, %41, %45 : vector<128x32xi1>, vector<128x32xf32>
    %47 = vector.shape_cast %46 : vector<128x32xf32> to vector<8x16x32xf32>
    %c0_37 = arith.constant 0 : index
    %c0_38 = arith.constant 0 : index
    %c0_39 = arith.constant 0 : index
    %48 = vector.load %arg5[%c0_37, %c0_38, %c0_39] : memref<8x16x32xf32, #tpu.memory_space<vmem>>, vector<8x16x32xf32>
    tpu.vector_store %arg5[%c0_37, %c0_38, %c0_39], %47 {strides = array<i32>} : memref<8x16x32xf32, #tpu.memory_space<vmem>>, vector<8x16x32xf32>,
    return
  }
  func.func @transform_0(%arg0: i32) -> (i32, i32, i32) {
    %c0_i32 = arith.constant 0 : i32
    %c0_i32_0 = arith.constant 0 : i32
    %c0_i32_1 = arith.constant 0 : i32
    return %arg0, %c0_i32, %c0_i32_0 : i32, i32, i32
  }
  func.func @transform_1(%arg0: i32) -> (i32, i32, i32) {
    %c0_i32 = arith.constant 0 : i32
    %c0_i32_0 = arith.constant 0 : i32
    %c0_i32_1 = arith.constant 0 : i32
    %c0_i32_2 = arith.constant 0 : i32
    return %c0_i32, %c0_i32_0, %c0_i32_1 : i32, i32, i32
  }
  func.func @transform_2(%arg0: i32) -> (i32, i32) {
    %c0_i32 = arith.constant 0 : i32
    %c0_i32_0 = arith.constant 0 : i32
    %c0_i32_1 = arith.constant 0 : i32
    return %c0_i32, %c0_i32_0 : i32, i32
  }
  func.func @transform_3(%arg0: i32) -> (i32, i32, i32) {
    %c0_i32 = arith.constant 0 : i32
    %c0_i32_0 = arith.constant 0 : i32
    %c0_i32_1 = arith.constant 0 : i32
    return %arg0, %c0_i32, %c0_i32_0 : i32, i32, i32
  }
  func.func @transform_4(%arg0: i32) -> (i32, i32, i32) {
    %c0_i32 = arith.constant 0 : i32
    %c0_i32_0 = arith.constant 0 : i32
    %c0_i32_1 = arith.constant 0 : i32
    return %arg0, %c0_i32, %c0_i32_0 : i32, i32, i32
  }
}

module attributes {stable_mosaic.version = 11 : i64} {
  func.func @_fused_linear_kernel(%arg0: i32, %arg1: memref<96x32xf32, #tpu.memory_space<vmem>>, %arg2: memref<32x32xbf16, #tpu.memory_space<vmem>>, %arg3: memref<1x32xf32, #tpu.memory_space<vmem>>, %arg4: memref<96x32xf32, #tpu.memory_space<vmem>>, %arg5: memref<96x32xf32, #tpu.memory_space<vmem>>) attributes {dimension_semantics = [#tpu.dimension_semantics<parallel>], iteration_bounds = array<i64: 1>, scalar_prefetch = 0 : i64, scratch_operands = 0 : i64, tpu.core_type = #tpu.core_type<tc>, window_params = [{transform_indices = @transform_0, window_bounds = array<i64: 96, 32>}, {pipeline_mode = #tpu.pipeline_mode<synchronous>, transform_indices = @transform_1, window_bounds = array<i64: 32, 32>}, {pipeline_mode = #tpu.pipeline_mode<synchronous>, transform_indices = @transform_2, window_bounds = array<i64: 1, 32>}, {transform_indices = @transform_3, window_bounds = array<i64: 96, 32>}, {transform_indices = @transform_4, window_bounds = array<i64: 96, 32>}]} {
    %c0 = arith.constant 0 : index
    %c0_0 = arith.constant 0 : index
    %0 = vector.load %arg1[%c0, %c0_0] : memref<96x32xf32, #tpu.memory_space<vmem>>, vector<96x32xf32>
    %1 = arith.truncf %0 : vector<96x32xf32> to vector<96x32xbf16>
    %c0_1 = arith.constant 0 : index
    %c0_2 = arith.constant 0 : index
    %2 = vector.load %arg2[%c0_1, %c0_2] : memref<32x32xbf16, #tpu.memory_space<vmem>>, vector<32x32xbf16>
    %cst = arith.constant dense<0.000000e+00> : vector<96x32xf32>
    %3 = tpu.matmul %1, %2, %cst {dimension_numbers = #tpu.dot_dimension_numbers<[1], [0], [0], [1], [0, 0, 1, 1], [], []>} : vector<96x32xbf16>, vector<32x32xbf16>, vector<96x32xf32> -> vector<96x32xf32>
    %c0_3 = arith.constant 0 : index
    %c0_4 = arith.constant 0 : index
    %4 = vector.load %arg3[%c0_3, %c0_4] : memref<1x32xf32, #tpu.memory_space<vmem>>, vector<1x32xf32>
    %5 = vector.broadcast %4 : vector<1x32xf32> to vector<96x32xf32>
    %6 = arith.addf %3, %5 : vector<96x32xf32>
    %c0_5 = arith.constant 0 : index
    %c0_6 = arith.constant 0 : index
    %7 = vector.load %arg4[%c0_5, %c0_6] : memref<96x32xf32, #tpu.memory_space<vmem>>, vector<96x32xf32>
    %8 = arith.addf %6, %7 : vector<96x32xf32>
    %cst_7 = arith.constant 0.000000e+00 : f32
    %9 = vector.broadcast %cst_7 : f32 to vector<96x32xf32>
    %10 = arith.cmpf oge, %8, %9 : vector<96x32xf32>
    %cst_8 = arith.constant 1.000000e-01 : f32
    %11 = vector.broadcast %cst_8 : f32 to vector<96x32xf32>
    %12 = arith.mulf %11, %8 : vector<96x32xf32>
    %13 = arith.select %10, %8, %12 : vector<96x32xi1>, vector<96x32xf32>
    %c0_9 = arith.constant 0 : index
    %c0_10 = arith.constant 0 : index
    %14 = vector.load %arg5[%c0_9, %c0_10] : memref<96x32xf32, #tpu.memory_space<vmem>>, vector<96x32xf32>
    tpu.vector_store %arg5[%c0_9, %c0_10], %13 {strides = array<i32>} : memref<96x32xf32, #tpu.memory_space<vmem>>, vector<96x32xf32>,
    return
  }
  func.func @transform_0(%arg0: i32) -> (i32, i32) {
    %c0_i32 = arith.constant 0 : i32
    %c0_i32_0 = arith.constant 0 : i32
    return %arg0, %c0_i32 : i32, i32
  }
  func.func @transform_1(%arg0: i32) -> (i32, i32) {
    %c0_i32 = arith.constant 0 : i32
    %c0_i32_0 = arith.constant 0 : i32
    %c0_i32_1 = arith.constant 0 : i32
    return %c0_i32, %c0_i32_0 : i32, i32
  }
  func.func @transform_2(%arg0: i32) -> (i32, i32) {
    %c0_i32 = arith.constant 0 : i32
    %c0_i32_0 = arith.constant 0 : i32
    %c0_i32_1 = arith.constant 0 : i32
    return %c0_i32, %c0_i32_0 : i32, i32
  }
  func.func @transform_3(%arg0: i32) -> (i32, i32) {
    %c0_i32 = arith.constant 0 : i32
    %c0_i32_0 = arith.constant 0 : i32
    return %arg0, %c0_i32 : i32, i32
  }
  func.func @transform_4(%arg0: i32) -> (i32, i32) {
    %c0_i32 = arith.constant 0 : i32
    %c0_i32_0 = arith.constant 0 : i32
    return %arg0, %c0_i32 : i32, i32
  }
}

module attributes {stable_mosaic.version = 11 : i64} {
  func.func @_fused_linear_kernel(%arg0: i32, %arg1: memref<96x32xf32, #tpu.memory_space<vmem>>, %arg2: memref<32x32xbf16, #tpu.memory_space<vmem>>, %arg3: memref<1x32xf32, #tpu.memory_space<vmem>>, %arg4: memref<96x32xf32, #tpu.memory_space<vmem>>) attributes {dimension_semantics = [#tpu.dimension_semantics<parallel>], iteration_bounds = array<i64: 1>, scalar_prefetch = 0 : i64, scratch_operands = 0 : i64, tpu.core_type = #tpu.core_type<tc>, window_params = [{transform_indices = @transform_0, window_bounds = array<i64: 96, 32>}, {pipeline_mode = #tpu.pipeline_mode<synchronous>, transform_indices = @transform_1, window_bounds = array<i64: 32, 32>}, {pipeline_mode = #tpu.pipeline_mode<synchronous>, transform_indices = @transform_2, window_bounds = array<i64: 1, 32>}, {transform_indices = @transform_3, window_bounds = array<i64: 96, 32>}]} {
    %c0 = arith.constant 0 : index
    %c0_0 = arith.constant 0 : index
    %0 = vector.load %arg1[%c0, %c0_0] : memref<96x32xf32, #tpu.memory_space<vmem>>, vector<96x32xf32>
    %1 = arith.truncf %0 : vector<96x32xf32> to vector<96x32xbf16>
    %c0_1 = arith.constant 0 : index
    %c0_2 = arith.constant 0 : index
    %2 = vector.load %arg2[%c0_1, %c0_2] : memref<32x32xbf16, #tpu.memory_space<vmem>>, vector<32x32xbf16>
    %cst = arith.constant dense<0.000000e+00> : vector<96x32xf32>
    %3 = tpu.matmul %1, %2, %cst {dimension_numbers = #tpu.dot_dimension_numbers<[1], [0], [0], [1], [0, 0, 1, 1], [], []>} : vector<96x32xbf16>, vector<32x32xbf16>, vector<96x32xf32> -> vector<96x32xf32>
    %c0_3 = arith.constant 0 : index
    %c0_4 = arith.constant 0 : index
    %4 = vector.load %arg3[%c0_3, %c0_4] : memref<1x32xf32, #tpu.memory_space<vmem>>, vector<1x32xf32>
    %5 = vector.broadcast %4 : vector<1x32xf32> to vector<96x32xf32>
    %6 = arith.addf %3, %5 : vector<96x32xf32>
    %c0_5 = arith.constant 0 : index
    %c0_6 = arith.constant 0 : index
    %7 = vector.load %arg4[%c0_5, %c0_6] : memref<96x32xf32, #tpu.memory_space<vmem>>, vector<96x32xf32>
    tpu.vector_store %arg4[%c0_5, %c0_6], %6 {strides = array<i32>} : memref<96x32xf32, #tpu.memory_space<vmem>>, vector<96x32xf32>,
    return
  }
  func.func @transform_0(%arg0: i32) -> (i32, i32) {
    %c0_i32 = arith.constant 0 : i32
    %c0_i32_0 = arith.constant 0 : i32
    return %arg0, %c0_i32 : i32, i32
  }
  func.func @transform_1(%arg0: i32) -> (i32, i32) {
    %c0_i32 = arith.constant 0 : i32
    %c0_i32_0 = arith.constant 0 : i32
    %c0_i32_1 = arith.constant 0 : i32
    return %c0_i32, %c0_i32_0 : i32, i32
  }
  func.func @transform_2(%arg0: i32) -> (i32, i32) {
    %c0_i32 = arith.constant 0 : i32
    %c0_i32_0 = arith.constant 0 : i32
    %c0_i32_1 = arith.constant 0 : i32
    return %c0_i32, %c0_i32_0 : i32, i32
  }
  func.func @transform_3(%arg0: i32) -> (i32, i32) {
    %c0_i32 = arith.constant 0 : i32
    %c0_i32_0 = arith.constant 0 : i32
    return %arg0, %c0_i32 : i32, i32
  }
}

module attributes {stable_mosaic.version = 11 : i64} {
  func.func @_tap_conv_kernel(%arg0: i32, %arg1: memref<1x4x16x32xf32, #tpu.memory_space<vmem>>, %arg2: memref<3x32x32xbf16, #tpu.memory_space<vmem>>, %arg3: memref<1x32xf32, #tpu.memory_space<vmem>>, %arg4: memref<1x2x16x32xf32, #tpu.memory_space<vmem>>, %arg5: memref<1x2x16x32xf32, #tpu.memory_space<vmem>>) attributes {dimension_semantics = [#tpu.dimension_semantics<parallel>], iteration_bounds = array<i64: 3>, scalar_prefetch = 0 : i64, scratch_operands = 0 : i64, tpu.core_type = #tpu.core_type<tc>, window_params = [{transform_indices = @transform_0, window_bounds = array<i64: 1, 4, 16, 32>}, {pipeline_mode = #tpu.pipeline_mode<synchronous>, transform_indices = @transform_1, window_bounds = array<i64: 3, 32, 32>}, {pipeline_mode = #tpu.pipeline_mode<synchronous>, transform_indices = @transform_2, window_bounds = array<i64: 1, 32>}, {transform_indices = @transform_3, window_bounds = array<i64: 1, 2, 16, 32>}, {transform_indices = @transform_4, window_bounds = array<i64: 1, 2, 16, 32>}]} {
    %cst = arith.constant 0.000000e+00 : f32
    %0 = vector.broadcast %cst : f32 to vector<32x32xf32>
    %c0 = arith.constant 0 : index
    %c0_0 = arith.constant 0 : index
    %c0_1 = arith.constant 0 : index
    %c0_2 = arith.constant 0 : index
    %1 = vector.load %arg1[%c0, %c0_0, %c0_1, %c0_2] : memref<1x4x16x32xf32, #tpu.memory_space<vmem>>, vector<1x2x16x32xf32>
    %2 = arith.truncf %1 : vector<1x2x16x32xf32> to vector<1x2x16x32xbf16>
    %3 = vector.shape_cast %2 : vector<1x2x16x32xbf16> to vector<32x32xbf16>
    %c0_3 = arith.constant 0 : index
    %c0_4 = arith.constant 0 : index
    %c0_5 = arith.constant 0 : index
    %4 = vector.load %arg2[%c0_3, %c0_4, %c0_5] : memref<3x32x32xbf16, #tpu.memory_space<vmem>>, vector<1x32x32xbf16>
    %5 = vector.shape_cast %4 : vector<1x32x32xbf16> to vector<32x32xbf16>
    %cst_6 = arith.constant dense<0.000000e+00> : vector<32x32xf32>
    %6 = tpu.matmul %3, %5, %cst_6 {dimension_numbers = #tpu.dot_dimension_numbers<[1], [0], [0], [1], [0, 0, 1, 1], [], []>} : vector<32x32xbf16>, vector<32x32xbf16>, vector<32x32xf32> -> vector<32x32xf32>
    %7 = arith.addf %0, %6 : vector<32x32xf32>
    %c0_7 = arith.constant 0 : index
    %c1 = arith.constant 1 : index
    %c0_8 = arith.constant 0 : index
    %c0_9 = arith.constant 0 : index
    %8 = vector.load %arg1[%c0_7, %c1, %c0_8, %c0_9] : memref<1x4x16x32xf32, #tpu.memory_space<vmem>>, vector<1x2x16x32xf32>
    %9 = arith.truncf %8 : vector<1x2x16x32xf32> to vector<1x2x16x32xbf16>
    %10 = vector.shape_cast %9 : vector<1x2x16x32xbf16> to vector<32x32xbf16>
    %c1_10 = arith.constant 1 : index
    %c0_11 = arith.constant 0 : index
    %c0_12 = arith.constant 0 : index
    %11 = vector.load %arg2[%c1_10, %c0_11, %c0_12] : memref<3x32x32xbf16, #tpu.memory_space<vmem>>, vector<1x32x32xbf16>
    %12 = vector.shape_cast %11 : vector<1x32x32xbf16> to vector<32x32xbf16>
    %cst_13 = arith.constant dense<0.000000e+00> : vector<32x32xf32>
    %13 = tpu.matmul %10, %12, %cst_13 {dimension_numbers = #tpu.dot_dimension_numbers<[1], [0], [0], [1], [0, 0, 1, 1], [], []>} : vector<32x32xbf16>, vector<32x32xbf16>, vector<32x32xf32> -> vector<32x32xf32>
    %14 = arith.addf %7, %13 : vector<32x32xf32>
    %c0_14 = arith.constant 0 : index
    %c2 = arith.constant 2 : index
    %c0_15 = arith.constant 0 : index
    %c0_16 = arith.constant 0 : index
    %15 = vector.load %arg1[%c0_14, %c2, %c0_15, %c0_16] : memref<1x4x16x32xf32, #tpu.memory_space<vmem>>, vector<1x2x16x32xf32>
    %16 = arith.truncf %15 : vector<1x2x16x32xf32> to vector<1x2x16x32xbf16>
    %17 = vector.shape_cast %16 : vector<1x2x16x32xbf16> to vector<32x32xbf16>
    %c2_17 = arith.constant 2 : index
    %c0_18 = arith.constant 0 : index
    %c0_19 = arith.constant 0 : index
    %18 = vector.load %arg2[%c2_17, %c0_18, %c0_19] : memref<3x32x32xbf16, #tpu.memory_space<vmem>>, vector<1x32x32xbf16>
    %19 = vector.shape_cast %18 : vector<1x32x32xbf16> to vector<32x32xbf16>
    %cst_20 = arith.constant dense<0.000000e+00> : vector<32x32xf32>
    %20 = tpu.matmul %17, %19, %cst_20 {dimension_numbers = #tpu.dot_dimension_numbers<[1], [0], [0], [1], [0, 0, 1, 1], [], []>} : vector<32x32xbf16>, vector<32x32xbf16>, vector<32x32xf32> -> vector<32x32xf32>
    %21 = arith.addf %14, %20 : vector<32x32xf32>
    %c0_21 = arith.constant 0 : index
    %c0_22 = arith.constant 0 : index
    %22 = vector.load %arg3[%c0_21, %c0_22] : memref<1x32xf32, #tpu.memory_space<vmem>>, vector<1x32xf32>
    %23 = vector.broadcast %22 : vector<1x32xf32> to vector<32x32xf32>
    %24 = arith.addf %21, %23 : vector<32x32xf32>
    %c0_23 = arith.constant 0 : index
    %c0_24 = arith.constant 0 : index
    %c0_25 = arith.constant 0 : index
    %c0_26 = arith.constant 0 : index
    %25 = vector.load %arg4[%c0_23, %c0_24, %c0_25, %c0_26] : memref<1x2x16x32xf32, #tpu.memory_space<vmem>>, vector<1x2x16x32xf32>
    %26 = vector.shape_cast %25 : vector<1x2x16x32xf32> to vector<32x32xf32>
    %27 = arith.addf %24, %26 : vector<32x32xf32>
    %cst_27 = arith.constant 0.000000e+00 : f32
    %28 = vector.broadcast %cst_27 : f32 to vector<32x32xf32>
    %29 = arith.cmpf oge, %27, %28 : vector<32x32xf32>
    %cst_28 = arith.constant 1.000000e-01 : f32
    %30 = vector.broadcast %cst_28 : f32 to vector<32x32xf32>
    %31 = arith.mulf %30, %27 : vector<32x32xf32>
    %32 = arith.select %29, %27, %31 : vector<32x32xi1>, vector<32x32xf32>
    %33 = vector.shape_cast %32 : vector<32x32xf32> to vector<1x2x16x32xf32>
    %c0_29 = arith.constant 0 : index
    %c0_30 = arith.constant 0 : index
    %c0_31 = arith.constant 0 : index
    %c0_32 = arith.constant 0 : index
    %34 = vector.load %arg5[%c0_29, %c0_30, %c0_31, %c0_32] : memref<1x2x16x32xf32, #tpu.memory_space<vmem>>, vector<1x2x16x32xf32>
    tpu.vector_store %arg5[%c0_29, %c0_30, %c0_31, %c0_32], %33 {strides = array<i32>} : memref<1x2x16x32xf32, #tpu.memory_space<vmem>>, vector<1x2x16x32xf32>,
    return
  }
  func.func @transform_0(%arg0: i32) -> (i32, i32, i32, i32) {
    %c0_i32 = arith.constant 0 : i32
    %c0_i32_0 = arith.constant 0 : i32
    %c0_i32_1 = arith.constant 0 : i32
    %c0_i32_2 = arith.constant 0 : i32
    return %arg0, %c0_i32, %c0_i32_0, %c0_i32_1 : i32, i32, i32, i32
  }
  func.func @transform_1(%arg0: i32) -> (i32, i32, i32) {
    %c0_i32 = arith.constant 0 : i32
    %c0_i32_0 = arith.constant 0 : i32
    %c0_i32_1 = arith.constant 0 : i32
    %c0_i32_2 = arith.constant 0 : i32
    return %c0_i32, %c0_i32_0, %c0_i32_1 : i32, i32, i32
  }
  func.func @transform_2(%arg0: i32) -> (i32, i32) {
    %c0_i32 = arith.constant 0 : i32
    %c0_i32_0 = arith.constant 0 : i32
    %c0_i32_1 = arith.constant 0 : i32
    return %c0_i32, %c0_i32_0 : i32, i32
  }
  func.func @transform_3(%arg0: i32) -> (i32, i32, i32, i32) {
    %c0_i32 = arith.constant 0 : i32
    %c0_i32_0 = arith.constant 0 : i32
    %c0_i32_1 = arith.constant 0 : i32
    %c0_i32_2 = arith.constant 0 : i32
    return %arg0, %c0_i32, %c0_i32_0, %c0_i32_1 : i32, i32, i32, i32
  }
  func.func @transform_4(%arg0: i32) -> (i32, i32, i32, i32) {
    %c0_i32 = arith.constant 0 : i32
    %c0_i32_0 = arith.constant 0 : i32
    %c0_i32_1 = arith.constant 0 : i32
    %c0_i32_2 = arith.constant 0 : i32
    return %arg0, %c0_i32, %c0_i32_0, %c0_i32_1 : i32, i32, i32, i32
  }
}

module attributes {stable_mosaic.version = 11 : i64} {
  func.func @_mean_kernel(%arg0: i32, %arg1: memref<1x32x32xf32, #tpu.memory_space<vmem>>, %arg2: memref<1x1x32xf32, #tpu.memory_space<vmem>>) attributes {dimension_semantics = [#tpu.dimension_semantics<parallel>], iteration_bounds = array<i64: 3>, scalar_prefetch = 0 : i64, scratch_operands = 0 : i64, tpu.core_type = #tpu.core_type<tc>, window_params = [{transform_indices = @transform_0, window_bounds = array<i64: 1, 32, 32>}, {transform_indices = @transform_1, window_bounds = array<i64: 1, 1, 32>}]} {
    %c0 = arith.constant 0 : index
    %c0_0 = arith.constant 0 : index
    %c0_1 = arith.constant 0 : index
    %0 = vector.load %arg1[%c0, %c0_0, %c0_1] : memref<1x32x32xf32, #tpu.memory_space<vmem>>, vector<1x32x32xf32>
    %cst = arith.constant dense<0.000000e+00> : vector<1x32xf32>
    %1 = vector.multi_reduction <add>, %0, %cst [1] : vector<1x32x32xf32> to vector<1x32xf32>
    %2 = vector.shape_cast %1 : vector<1x32xf32> to vector<1x1x32xf32>
    %cst_2 = arith.constant 3.125000e-02 : f32
    %3 = vector.broadcast %cst_2 : f32 to vector<1x1x32xf32>
    %4 = arith.mulf %2, %3 : vector<1x1x32xf32>
    %c0_3 = arith.constant 0 : index
    %c0_4 = arith.constant 0 : index
    %c0_5 = arith.constant 0 : index
    %5 = vector.load %arg2[%c0_3, %c0_4, %c0_5] : memref<1x1x32xf32, #tpu.memory_space<vmem>>, vector<1x1x32xf32>
    tpu.vector_store %arg2[%c0_3, %c0_4, %c0_5], %4 {strides = array<i32>} : memref<1x1x32xf32, #tpu.memory_space<vmem>>, vector<1x1x32xf32>,
    return
  }
  func.func @transform_0(%arg0: i32) -> (i32, i32, i32) {
    %c0_i32 = arith.constant 0 : i32
    %c0_i32_0 = arith.constant 0 : i32
    %c0_i32_1 = arith.constant 0 : i32
    return %arg0, %c0_i32, %c0_i32_0 : i32, i32, i32
  }
  func.func @transform_1(%arg0: i32) -> (i32, i32, i32) {
    %c0_i32 = arith.constant 0 : i32
    %c0_i32_0 = arith.constant 0 : i32
    %c0_i32_1 = arith.constant 0 : i32
    return %arg0, %c0_i32, %c0_i32_0 : i32, i32, i32
  }
}

</mosaic_0001>

<bundles_post_ra>
// kernel: _lambda_.15
= control target key start
LH: loop header
LB: loop body
LE: loop exit
PB: predicated region body
PF: predicated region fallthrough
CT: control target
= control target key end

     0   :  { %vm45_vm0 = vcmask 130048   ;;  %vm103_vm1 = vcmask 392192   ;;  %s251_s1 = inlined_call_operand.vmem [shape: bf16[16,48], index: 1, kind: input, shape index: {}]   ;;  %s252_s0 = inlined_call_operand.vmem [shape: f32[96,16], index: 0, kind: input, shape index: {}]   ;;  %s253_s2 = inlined_call_operand.vmem [shape: f32[1,48], index: 2, kind: input, shape index: {}]   ;;  %s254_s3 = inlined_call_operand.vmem [shape: f32[96,48], index: 3, kind: output, shape index: {}]  }
   0x1   :  { %v130_v0 = vld [vmem:[%s251_s1] sm:$0xff]  ;;  %v17_v1 = vld [vmem:[%s252_s0 + $0x10] sm:$0xff]  ;;  %v18_v2 = vld [vmem:[%s252_s0 + $0x18] sm:$0xff] }
   0x2   :  { %v28_v3 = vpack.c.bf16 %v18_v2, %v17_v1  ;;  %v21_v4 = vld [vmem:[%s252_s0 + $0x30] sm:$0xff]  ;;  %v22_v5 = vld [vmem:[%s252_s0 + $0x38] sm:$0xff]  ;;  %131 = vmatpush.bf16.msra.mxu1 %v130_v0  ;;  %132 = vmatpush.bf16.msra.mxu2 %v130_v0  ;;  %v15_v9 = vld [vmem:[%s252_s0] sm:$0xff] }
   0x3   :  { %v25_v6 = vld [vmem:[%s252_s0 + $0x50] sm:$0xff]  ;;  %v30_v7 = vpack.c.bf16 %v22_v5, %v21_v4  ;;  %v26_v8 = vld [vmem:[%s252_s0 + $0x58] sm:$0xff]  ;;  %v16_v10 = vld [vmem:[%s252_s0 + $0x8] sm:$0xff]  ;;  %133 = vmatpush.bf16.msra.mxu3 %v130_v0  ;;  %71 = vmatpush.bf16.msra.mxu0 %v130_v0 }
   0x4   :  { %v32_v11 = vpack.c.bf16 %v26_v8, %v25_v6  ;;  %v27_v12 = vpack.c.bf16 %v16_v10, %v15_v9  ;;  %v19_v13 = vld [vmem:[%s252_s0 + $0x20] sm:$0xff]  ;;  %v20_v14 = vld [vmem:[%s252_s0 + $0x28] sm:$0xff] }
   0x5   :  { %125 = vmatmul.msk.bf16.vlgmr.msra.gmra.mxu1 %vm45_vm0, %v28_v3  ;;  %127 = vmatmul.msk.bf16.vlgmr.msra.gmra.mxu2 %vm45_vm0, %v30_v7  ;;  %v23_v15 = vld [vmem:[%s252_s0 + $0x40] sm:$0xff]  ;;  %v24_v16 = vld [vmem:[%s252_s0 + $0x48] sm:$0xff]  ;;  %v29_v17 = vpack.c.bf16 %v20_v14, %v19_v13 }
   0x6   :  { %129 = vmatmul.msk.bf16.vlgmr.msra.gmra.mxu3 %vm45_vm0, %v32_v11  ;;  %124 = vmatmul.msk.bf16.vlgmr.msra.gmra.mxu0 %vm45_vm0, %v27_v12  ;;  %v31_v18 = vpack.c.bf16 %v24_v16, %v23_v15  ;;  %v134_v19 = vld [vmem:[%s253_s2] ss:$0 sm:$0xff] }
  0x15   :  { %126 = vmatmul.msk.bf16.gmra.mxu1 %vm45_vm0, %v29_v17  ;;  %128 = vmatmul.msk.bf16.gmra.mxu2 %vm45_vm0, %v31_v18 }
  0x82   :  { %v78_v20 = vpop.f32.mrf.mxu1 }
  0x83   :  { %v79_v21 = vadd.f32 %v134_v19, %v78_v20  ;;  %v73_v22 = vpop.f32.mrf.mxu0 }
  0x84   :  { %v74_v23 = vadd.f32 %v134_v19, %v73_v22 }
  0x85   :  { %106 = vst.msk [vmem:[%s254_s3 + $0x10] sm:$0xff] %vm103_vm1, %v79_v21 }
  0x86   :  { %104 = vst.msk [vmem:[%s254_s3] sm:$0xff] %vm103_vm1, %v74_v23 }
  0x88   :  { %v88_v24 = vpop.f32.mrf.mxu2 }
  0x89   :  { %v89_v25 = vadd.f32 %v134_v19, %v88_v24  ;;  %v98_v26 = vpop.f32.mrf.mxu3 }
  0x8a   :  { %v80_v27 = vpop.f32.mrf.mxu1  ;;  %v99_v28 = vadd.f32 %v134_v19, %v98_v26 }
  0x8b   :  { %110 = vst.msk [vmem:[%s254_s3 + $0x30] sm:$0xff] %vm103_vm1, %v89_v25  ;;  %v81_v29 = vadd.f32 %v134_v19, %v80_v27  ;;  %v75_v30 = vpop.f32.mrf.mxu0 }
  0x8c   :  { %114 = vst.msk [vmem:[%s254_s3 + $0x50] sm:$0xff] %vm103_vm1, %v99_v28  ;;  %v76_v31 = vadd.f32 %v134_v19, %v75_v30 }
  0x8d   :  { %107 = vst.msk [vmem:[%s254_s3 + $0x18] sm:$0xff] %vm103_vm1, %v81_v29 }
  0x8e   :  { %105 = vst.msk [vmem:[%s254_s3 + $0x8] sm:$0xff] %vm103_vm1, %v76_v31 }
  0x90   :  { %v90_v32 = vpop.f32.mrf.mxu2 }
  0x91   :  { %v91_v33 = vadd.f32 %v134_v19, %v90_v32  ;;  %v100_v34 = vpop.f32.mrf.mxu3 }
  0x92   :  { %v83_v35 = vpop.f32.mrf.mxu1  ;;  %v101_v36 = vadd.f32 %v134_v19, %v100_v34 }
  0x93   :  { %111 = vst.msk [vmem:[%s254_s3 + $0x38] sm:$0xff] %vm103_vm1, %v91_v33  ;;  %v84_v37 = vadd.f32 %v134_v19, %v83_v35 }
  0x94   :  { %115 = vst.msk [vmem:[%s254_s3 + $0x58] sm:$0xff] %vm103_vm1, %v101_v36 }
  0x95   :  { %108 = vst.msk [vmem:[%s254_s3 + $0x20] sm:$0xff] %vm103_vm1, %v84_v37 }
  0x98   :  { %v93_v38 = vpop.f32.mrf.mxu2 }
  0x99   :  { %v94_v39 = vadd.f32 %v134_v19, %v93_v38 }
  0x9a   :  { %v85_v40 = vpop.f32.mrf.mxu1 }
  0x9b   :  { %112 = vst.msk [vmem:[%s254_s3 + $0x40] sm:$0xff] %vm103_vm1, %v94_v39  ;;  %v86_v41 = vadd.f32 %v134_v19, %v85_v40 }
  0x9d   :  { %109 = vst.msk [vmem:[%s254_s3 + $0x28] sm:$0xff] %vm103_vm1, %v86_v41 }
  0xa0   :  { %v95_v42 = vpop.f32.mrf.mxu2 }
  0xa1   :  { %v96_v43 = vadd.f32 %v134_v19, %v95_v42 }
  0xa3   :  { %113 = vst.msk [vmem:[%s254_s3 + $0x48] sm:$0xff] %vm103_vm1, %v96_v43 }

// kernel: _lambda_.14
= control target key start
LH: loop header
LB: loop body
LE: loop exit
PB: predicated region body
PF: predicated region fallthrough
CT: control target
= control target key end

     0   :  { %vm57_vm0 = vcmask 1040384   ;;  %vm58_vm1 = vcmask 1041408   ;;  %v167_v1 = vmov 65535   ;;  %vm38_vm2 = vcmask 23552   ;;  %s298_s1 = inlined_call_operand.vmem [shape: bf16[3,16], index: 1, kind: input, shape index: {}]   ;;  %s299_s0 = inlined_call_operand.vmem [shape: f32[96,3], index: 0, kind: input, shape index: {}]   ;;  %s300_s2 = inlined_call_operand.vmem [shape: f32[1,16], index: 2, kind: input, shape index: {}]   ;;  %s301_s3 = inlined_call_operand.vmem [shape: f32[96,16], index: 3, kind: output, shape index: {}]  }
   0x1   :  { %v33_v0 = vld [vmem:[%s298_s1] sm:$0x3]  ;;  %v59_v2 = vsel %vm57_vm0, 4294967295, %v167_v1  ;;  %v17_v3 = vld [vmem:[%s299_s0 + $0x10] sm:$0xff]  ;;  %v18_v4 = vld [vmem:[%s299_s0 + $0x18] sm:$0xff]  ;;  %vm139_vm4 = vcmask 130048  }
   0x2   :  { %v60_v5 = vsel %vm58_vm1, %v59_v2, 0  ;;  %v21_v6 = vld [vmem:[%s299_s0 + $0x30] sm:$0xff]  ;;  %v22_v7 = vld [vmem:[%s299_s0 + $0x38] sm:$0xff]  ;;  %v15_v11 = vld [vmem:[%s299_s0] sm:$0xff]  ;;  %v28_v13 = vpack.c.bf16 %v18_v4, %v17_v3 }
   0x3   :  { %v25_v8 = vld [vmem:[%s299_s0 + $0x50] sm:$0xff]  ;;  %v62_v9 = vand.u32 %v60_v5, %v33_v0  ;;  %v26_v10 = vld [vmem:[%s299_s0 + $0x58] sm:$0xff]  ;;  %v16_v12 = vld [vmem:[%s299_s0 + $0x8] sm:$0xff]  ;;  %v30_v14 = vpack.c.bf16 %v22_v7, %v21_v6 }
   0x4   :  { %v32_v15 = vpack.c.bf16 %v26_v10, %v25_v8  ;;  %v27_v16 = vpack.c.bf16 %v16_v12, %v15_v11  ;;  %v19_v17 = vld [vmem:[%s299_s0 + $0x20] sm:$0xff]  ;;  %v20_v18 = vld [vmem:[%s299_s0 + $0x28] sm:$0xff] }
   0x5   :  { %162 = vmatpush.bf16.msra.mxu1 %v62_v9  ;;  %163 = vmatpush.bf16.msra.mxu2 %v62_v9  ;;  %v23_v19 = vld [vmem:[%s299_s0 + $0x40] sm:$0xff]  ;;  %v24_v20 = vld [vmem:[%s299_s0 + $0x48] sm:$0xff]  ;;  %v29_v21 = vpack.c.bf16 %v20_v18, %v19_v17 }
   0x6   :  { %164 = vmatpush.bf16.msra.mxu3 %v62_v9  ;;  %71 = vmatpush.bf16.msra.mxu0 %v62_v9  ;;  %v31_v22 = vpack.c.bf16 %v24_v20, %v23_v19  ;;  %v236_v23 = vld [vmem:[%s300_s2] ss:$0 sm:$0xff] }
   0x8   :  { %157 = vmatmul.msk.bf16.vlgmr.msra.gmra.mxu1 %vm38_vm2, %v28_v13  ;;  %159 = vmatmul.msk.bf16.vlgmr.msra.gmra.mxu2 %vm38_vm2, %v30_v14 }
   0x9   :  { %161 = vmatmul.msk.bf16.vlgmr.msra.gmra.mxu3 %vm38_vm2, %v32_v15  ;;  %156 = vmatmul.msk.bf16.vlgmr.msra.gmra.mxu0 %vm38_vm2, %v27_v16 }
  0x18   :  { %158 = vmatmul.msk.bf16.gmra.mxu1 %vm38_vm2, %v29_v21  ;;  %160 = vmatmul.msk.bf16.gmra.mxu2 %vm38_vm2, %v31_v22 }
  0x85   :  { %v78_v24 = vpop.f32.mrf.mxu1 }
  0x86   :  { %v79_v25 = vadd.f32 %v236_v23, %v78_v24  ;;  %v73_v26 = vpop.f32.mrf.mxu0 }
  0x87   :  { %v74_v27 = vadd.f32 %v236_v23, %v73_v26 }
  0x88   :  { %vm105_vm3 = vcmp.ge.f32.partialorder %v79_v25, 0.0  ;;  %v117_v28 = vmul.f32 0.1, %v79_v25 }
  0x89   :  { %vm103_vm5 = vcmp.ge.f32.partialorder %v74_v27, 0.0  ;;  %v115_v29 = vmul.f32 0.1, %v74_v27 }
  0x8a   :  { %v129_v30 = vsel %vm105_vm3, %v79_v25, %v117_v28 }
  0x8b   :  { %142 = vst.msk [vmem:[%s301_s3 + $0x10] sm:$0xff] %vm139_vm4, %v129_v30  ;;  %v88_v31 = vpop.f32.mrf.mxu2  ;;  %v127_v32 = vsel %vm103_vm5, %v74_v27, %v115_v29 }
  0x8c   :  { %v89_v33 = vadd.f32 %v236_v23, %v88_v31  ;;  %140 = vst.msk [vmem:[%s301_s3] sm:$0xff] %vm139_vm4, %v127_v32  ;;  %v98_v34 = vpop.f32.mrf.mxu3 }
  0x8d   :  { %v80_v35 = vpop.f32.mrf.mxu1  ;;  %v99_v36 = vadd.f32 %v236_v23, %v98_v34 }
  0x8e   :  { %vm109_vm6 = vcmp.ge.f32.partialorder %v89_v33, 0.0  ;;  %v121_v37 = vmul.f32 0.1, %v89_v33  ;;  %v81_v38 = vadd.f32 %v236_v23, %v80_v35  ;;  %v75_v39 = vpop.f32.mrf.mxu0 }
  0x8f   :  { %vm113_vm7 = vcmp.ge.f32.partialorder %v99_v36, 0.0  ;;  %v125_v40 = vmul.f32 0.1, %v99_v36  ;;  %v76_v41 = vadd.f32 %v236_v23, %v75_v39 }
  0x90   :  { %v133_v42 = vsel %vm109_vm6, %v89_v33, %v121_v37  ;;  %vm106_vm8 = vcmp.ge.f32.partialorder %v81_v38, 0.0  ;;  %v118_v43 = vmul.f32 0.1, %v81_v38 }
  0x91   :  { %146 = vst.msk [vmem:[%s301_s3 + $0x30] sm:$0xff] %vm139_vm4, %v133_v42  ;;  %v137_v44 = vsel %vm113_vm7, %v99_v36, %v125_v40  ;;  %vm104_vm9 = vcmp.ge.f32.partialorder %v76_v41, 0.0  ;;  %v116_v45 = vmul.f32 0.1, %v76_v41 }
  0x92   :  { %v130_v46 = vsel %vm106_vm8, %v81_v38, %v118_v43  ;;  %150 = vst.msk [vmem:[%s301_s3 + $0x50] sm:$0xff] %vm139_vm4, %v137_v44 }
  0x93   :  { %143 = vst.msk [vmem:[%s301_s3 + $0x18] sm:$0xff] %vm139_vm4, %v130_v46  ;;  %v90_v47 = vpop.f32.mrf.mxu2  ;;  %v128_v48 = vsel %vm104_vm9, %v76_v41, %v116_v45 }
  0x94   :  { %v91_v49 = vadd.f32 %v236_v23, %v90_v47  ;;  %141 = vst.msk [vmem:[%s301_s3 + $0x8] sm:$0xff] %vm139_vm4, %v128_v48  ;;  %v100_v50 = vpop.f32.mrf.mxu3 }
  0x95   :  { %v83_v51 = vpop.f32.mrf.mxu1  ;;  %v101_v52 = vadd.f32 %v236_v23, %v100_v50 }
  0x96   :  { %vm110_vm10 = vcmp.ge.f32.partialorder %v91_v49, 0.0  ;;  %v122_v53 = vmul.f32 0.1, %v91_v49  ;;  %v84_v54 = vadd.f32 %v236_v23, %v83_v51 }
  0x97   :  { %vm114_vm11 = vcmp.ge.f32.partialorder %v101_v52, 0.0  ;;  %v126_v55 = vmul.f32 0.1, %v101_v52 }
  0x98   :  { %v134_v56 = vsel %vm110_vm10, %v91_v49, %v122_v53  ;;  %vm107_vm12 = vcmp.ge.f32.partialorder %v84_v54, 0.0  ;;  %v119_v57 = vmul.f32 0.1, %v84_v54 }
  0x99   :  { %147 = vst.msk [vmem:[%s301_s3 + $0x38] sm:$0xff] %vm139_vm4, %v134_v56  ;;  %v138_v58 = vsel %vm114_vm11, %v101_v52, %v126_v55 }
  0x9a   :  { %v131_v59 = vsel %vm107_vm12, %v84_v54, %v119_v57  ;;  %151 = vst.msk [vmem:[%s301_s3 + $0x58] sm:$0xff] %vm139_vm4, %v138_v58 }
  0x9b   :  { %144 = vst.msk [vmem:[%s301_s3 + $0x20] sm:$0xff] %vm139_vm4, %v131_v59  ;;  %v93_v60 = vpop.f32.mrf.mxu2 }
  0x9c   :  { %v94_v61 = vadd.f32 %v236_v23, %v93_v60 }
  0x9d   :  { %v85_v62 = vpop.f32.mrf.mxu1 }
  0x9e   :  { %vm111_vm13 = vcmp.ge.f32.partialorder %v94_v61, 0.0  ;;  %v123_v63 = vmul.f32 0.1, %v94_v61  ;;  %v86_v0 = vadd.f32 %v236_v23, %v85_v62 }
  0xa0   :  { %v135_v1 = vsel %vm111_vm13, %v94_v61, %v123_v63  ;;  %vm108_vm14 = vcmp.ge.f32.partialorder %v86_v0, 0.0  ;;  %v120_v2 = vmul.f32 0.1, %v86_v0 }
  0xa1   :  { %148 = vst.msk [vmem:[%s301_s3 + $0x40] sm:$0xff] %vm139_vm4, %v135_v1 }
  0xa2   :  { %v132_v3 = vsel %vm108_vm14, %v86_v0, %v120_v2 }
  0xa3   :  { %145 = vst.msk [vmem:[%s301_s3 + $0x28] sm:$0xff] %vm139_vm4, %v132_v3  ;;  %v95_v4 = vpop.f32.mrf.mxu2 }
  0xa4   :  { %v96_v5 = vadd.f32 %v236_v23, %v95_v4 }
  0xa6   :  { %vm112_vm15 = vcmp.ge.f32.partialorder %v96_v5, 0.0  ;;  %v124_v6 = vmul.f32 0.1, %v96_v5 }
  0xa8   :  { %v136_v7 = vsel %vm112_vm15, %v96_v5, %v124_v6 }
  0xa9   :  { %149 = vst.msk [vmem:[%s301_s3 + $0x48] sm:$0xff] %vm139_vm4, %v136_v7 }

// kernel: _lambda_.16
= control target key start
LH: loop header
LB: loop body
LE: loop exit
PB: predicated region body
PF: predicated region fallthrough
CT: control target
= control target key end

     0   :  { %10 = vsyncpa [#allocation3], 0  ;;  %s1129_s0 = inlined_call_operand.vmem [shape: f32[3], index: 0, kind: input, shape index: {}]   ;;  %s1130_s1 = inlined_call_operand.vmem [shape: f32[3], index: 1, kind: input, shape index: {}]   ;;  %s1131_s2 = inlined_call_operand.vmem [shape: f32[3,3,16,16], index: 2, kind: input, shape index: {}]   ;;  %s1132_s3 = inlined_call_operand.vmem [shape: f32[3,3,16,16], index: 3, kind: input, shape index: {}]   ;;  %s1133_s4 = inlined_call_operand.vmem [shape: f32[3,16,32], index: 4, kind: input, shape index: {}]   ;;  %s1134_s5 = inlined_call_operand.vmem [shape: f32[3,3,16,32], index: 5, kind: output, shape index: {}]  }
   0x1   :  { %11 = vsyncpa [#allocation5], 0  ;;  %s1062_s18 = smov 0  }
   0x2 LB: > { %s880_s19 = sadd.s32 4294967295, %s1028_s18   ;;  %p882_p0 = scmp.ge.s32.totalorder %s1028_s18, 1  ;;  %s1028_s18 = sphi %s1062_s18, %s17_s18  }
   0x3   : > { %p168_p1 = scmp.lt.s32.totalorder %s1028_s18, 4  ;;  %s180_s22 = sshll.u32 %s1129_s0, 4  ;;  %s181_s22 = int_to_ptr.vmem [resolvable:$true] %s180_s22 }
   0x4   : > { %p945_p3 = scmp.eq.s32.totalorder %s880_s19, 0  ;;  %s190_s25 = sshll.u32 %s1130_s1, 4  ;;  %s191_s25 = int_to_ptr.vmem [resolvable:$true] %s190_s25 }
   0x5   : > { %p169_p2 = pnand %p882_p0, %p168_p1  ;;  %s1030_s26 = smov [#allocation2]  }
   0x6   : > { %s1031_s27 = smov [#allocation4]  }
   0x7   : > { %p938_p4 = pneg %p169_p2 }
   0x8   : > { %227 = sbr.rel (%p169_p2) target bundleno = 915 (0x393), region = 40 }
   0x9   : > { %p939_p5 = pnand %p945_p3, %p938_p4 }
   0xb   : > { %941 = dma.vmem_to_smem (!%p939_p5), %s181_s22, 16, %s1030_s26, [#allocation3]  }
   0xc   : > { %944 = dma.vmem_to_smem (!%p939_p5), %s191_s25, 16, %s1031_s27, [#allocation5]  }
   0xd   : > { %1019 = dma.done.wait (%p945_p3), [#allocation3], 16  }
   0xe   : > { %1021 = vsyncadd (%p945_p3), [#allocation3], 4294967280 }
   0xf   : > { %1023 = dma.done.wait (%p945_p3), [#allocation5], 16  }
  0x10   : > { %1025 = vsyncadd (%p945_p3), [#allocation5], 4294967280 }
  0x11   : > { %239 = sfence }
  0x12   : > { %p272_p6 = scmp.lt.s32.totalorder %s880_s19, 2  ;;  %vm330_vm0 = vcmask 130048   ;;  %s360_s10 = sld [smem:[#allocation2]]  ;;  %vm452_vm1 = vcmask 261120  }
  0x13   : > { %s365_s11 = sld [smem:[#allocation4]] }
  0x14   : > { %s1136_s19 = smov (!%p272_p6, %s880_s19), 2  ;;  %s916_s13 = sld [smem:[#allocation2 + $0x2]] }
  0x15   : > { %s1084_s28 = smul.u32 48, %s1136_s19  ;;  %s904_s14 = sld [smem:[#allocation2 + $0x1]] }
  0x16   : > { %s917_s16 = sld [smem:[#allocation4 + $0x2]]  ;;  %s924_s21 = sshll.u32 %s1136_s19, 4 }
  0x17   : > { %s276_s6 = scalar_lea.vmem %s1131_s2, %s1084_s28  ;;  %s281_s9 = scalar_lea.vmem %s1132_s3, %s1084_s28 }
  0x18   : > { %v294_v0 = vld [vmem:[%s276_s6] sm:$0xff]  ;;  %v898_v1 = vld [vmem:[%s276_s6 + $0x10] sm:$0xff]  ;;  %v297_v3 = vld [vmem:[%s281_s9 + $0x8] sm:$0xff]  ;;  %s361_s12 = smul.f32 0.0625, %s360_s10  ;;  %s905_s17 = sld [smem:[#allocation4 + $0x1]] }
  0x19   : > { %298 = vxpose.xlu0.b32.start [1/2] (short) (narrow) %v294_v0, 16  ;;  %461 = vxpose.xlu1.b32.start [1/2] (short) (narrow) %v898_v1, 16  ;;  %v910_v2 = vld [vmem:[%s276_s6 + $0x20] sm:$0xff]  ;;  %v295_v5 = vld [vmem:[%s276_s6 + $0x8] sm:$0xff]  ;;  %v899_v6 = vld [vmem:[%s276_s6 + $0x18] sm:$0xff]  ;;  %v366_v20 = vstv %s365_s11  ;;  %s286_s24 = scalar_lea.vmem %s1133_s4, %s924_s21  ;;  %s291_s26 = scalar_lea.vmem %s1134_s5, %s1084_s28 }
  0x1a   : > { %623 = vxpose.xlu2.b32.start [1/2] (short) (narrow) %v910_v2, 16  ;;  %v296_v4 = vld [vmem:[%s281_s9] sm:$0xff]  ;;  %351 = vmatpush.msra.mxu0 %v297_v3  ;;  %v911_v7 = vld [vmem:[%s276_s6 + $0x28] sm:$0xff]  ;;  %v901_v8 = vld [vmem:[%s281_s9 + $0x18] sm:$0xff]  ;;  %v362_v18 = vstv %s361_s12  ;;  %s685_s15 = smul.f32 0.0625, %s916_s13 }
  0x1b   : > { %925 = vmatpush.msra.mxu2 %v297_v3  ;;  %v900_v9 = vld [vmem:[%s281_s9 + $0x10] sm:$0xff]  ;;  %v913_v10 = vld [vmem:[%s281_s9 + $0x28] sm:$0xff]  ;;  %v912_v11 = vld [vmem:[%s281_s9 + $0x20] sm:$0xff]  ;;  %s523_s20 = smul.f32 0.0625, %s904_s14 }
  0x1c   : > { %352 = vmatpush.msra.mxu0 %v296_v4  ;;  %v686_v26 = vstv %s685_s15  ;;  %v690_v30 = vstv %s917_s16 }
  0x1d   : > { %926 = vmatpush.msra.mxu2 %v296_v4  ;;  %v524_v32 = vstv %s523_s20 }
  0x1e   : > { %675 = vmatpush.msrb.mxu0 %v913_v10  ;;  %v528_v35 = vstv %s905_s17 }
  0x1f   : > { %513 = vmatpush.msrb.mxu2 %v901_v8 }
  0x20   : > { %676 = vmatpush.msrb.mxu0 %v912_v11 }
  0x21   : > { %299 = vxpose.xlu0.b32.end [2/2] (short) (narrow) %v295_v5, 16  ;;  %462 = vxpose.xlu1.b32.end [2/2] (short) (narrow) %v899_v6, 16 }
  0x22   : > { %624 = vxpose.xlu2.b32.end [2/2] (short) (narrow) %v911_v7, 16  ;;  %514 = vmatpush.msrb.mxu2 %v900_v9 }
  0xb3   : > { %v639_v13 = vpop.trf.xlu2 }
  0xbb   : > { %v640_v16 = vpop.trf.xlu2 }
  0xbd   : > { %v314_v12 = vpop.trf.xlu0  ;;  %v477_v15 = vpop.trf.xlu1 }
  0xbe   : > { %894 = vmatmul.msk.f32.vlgmr.msra.gmra.mxu0 %vm330_vm0, %v314_v12 }
  0xc5   : > { %v315_v14 = vpop.trf.xlu0  ;;  %v478_v17 = vpop.trf.xlu1 }
  0xc6   : > { %895 = vmatmul.msk.f32.vlgmr.msra.gmra.mxu2 %vm330_vm0, %v315_v14  ;;  %914 = vmatmul.msk.f32.vlgmr.msrb.gmra.mxu0 %vm330_vm0, %v639_v13 }
  0xce   : > { %902 = vmatmul.msk.f32.vlgmr.msrb.gmra.mxu2 %vm330_vm0, %v477_v15  ;;  %915 = vmatmul.msk.f32.gmra.mxu0 %vm330_vm0, %v640_v16 }
  0xd6   : > { %903 = vmatmul.msk.f32.gmra.mxu2 %vm330_vm0, %v478_v17 }
 0x13b   : > { %v354_v19 = vpop.f32.mrf.mxu0 }
 0x13c   : > { %v363_v21 = vmul.f32 %v362_v18, %v354_v19 }
 0x13e   : > { %v367_v22 = vadd.f32 %v366_v20, %v363_v21 }
 0x140   : > { %v369_v23 = vsel %vm330_vm0, %v367_v22, -inf }
 0x141   : > { %370 = vmax.xlane.f32.xlu0 %v369_v23  ;;  %v293_v23 = vld [vmem:[%s286_s24 + $0x8] sm:$0xff] }
 0x142   : > { %443 = vmatpush.msra.mxu1 %v293_v23  ;;  %927 = vmatpush.msra.mxu3 %v293_v23 }
 0x143   : > { %v678_v25 = vpop.f32.mrf.mxu0 }
 0x144   : > { %v687_v29 = vmul.f32 %v686_v26, %v678_v25 }
 0x146   : > { %v691_v33 = vadd.f32 %v690_v30, %v687_v29 }
 0x148   : > { %v693_v38 = vsel %vm330_vm0, %v691_v33, -inf }
 0x149   : > { %v357_v24 = vpop.f32.mrf.mxu2 }
 0x14a   : > { %v364_v27 = vmul.f32 %v362_v18, %v357_v24  ;;  %v292_v24 = vld [vmem:[%s286_s24] sm:$0xff] }
 0x14b   : > { %v681_v41 = vpop.f32.mrf.mxu0  ;;  %444 = vmatpush.msra.mxu1 %v292_v24  ;;  %928 = vmatpush.msra.mxu3 %v292_v24 }
 0x14c   : > { %v368_v28 = vadd.f32 %v366_v20, %v364_v27  ;;  %v688_v44 = vmul.f32 %v686_v26, %v681_v41 }
 0x14d   : > { %767 = vmatpush.msrb.mxu1 %v293_v23  ;;  %605 = vmatpush.msrb.mxu3 %v293_v23 }
 0x14e   : > { %v372_v31 = vsel %vm330_vm0, %v368_v28, -inf  ;;  %v692_v46 = vadd.f32 %v690_v30, %v688_v44 }
 0x14f   : > { %373 = vmax.xlane.f32.xlu1 %v372_v31  ;;  %768 = vmatpush.msrb.mxu1 %v292_v24 }
 0x150   : > { %v696_v47 = vsel %vm330_vm0, %v692_v46, -inf  ;;  %606 = vmatpush.msrb.mxu3 %v292_v24 }
 0x151   : > { %v516_v34 = vpop.f32.mrf.mxu2 }
 0x152   : > { %v525_v36 = vmul.f32 %v524_v32, %v516_v34 }
 0x154   : > { %v529_v37 = vadd.f32 %v528_v35, %v525_v36 }
 0x156   : > { %v531_v39 = vsel %vm330_vm0, %v529_v37, -inf }
 0x157   : > { %532 = vmax.xlane.f32.xlu2 %v531_v39  ;;  %694 = vmax.xlane.f32.xlu1 %v693_v38 }
 0x159   : > { %v519_v40 = vpop.f32.mrf.mxu2 }
 0x15a   : > { %v526_v42 = vmul.f32 %v524_v32, %v519_v40 }
 0x15c   : > { %v530_v43 = vadd.f32 %v528_v35, %v526_v42 }
 0x15e   : > { %v534_v45 = vsel %vm330_vm0, %v530_v43, -inf }
 0x15f   : > { %535 = vmax.xlane.f32.xlu1 %v534_v45 }
 0x167   : > { %697 = vmax.xlane.f32.xlu1 %v696_v47 }
 0x1b4   : > { %v371_v48 = vpop.xlane.xlu0 %370 }
 0x1b5   : > { %v375_v49 = vsub.f32 %v367_v22, %v371_v48 }
 0x1b7   : > { %v377_v50 = vmul.f32 1.442695, %v375_v49 }
 0x1b9   : > { %960 = vpow2.f32 %v377_v50 }
 0x1bf   : > { %v961_v51 = vpop.eup %960 }
 0x1c0   : > { %v381_v52 = vsel %vm330_vm0, %v961_v51, 0.0 }
 0x1c1   : > { %382 = vadd.xlane.f32.xlu0 %v381_v52 }
 0x1c2   : > { %v374_v53 = vpop.xlane.xlu1 %373 }
 0x1c3   : > { %v376_v54 = vsub.f32 %v368_v28, %v374_v53 }
 0x1c5   : > { %v379_v55 = vmul.f32 1.442695, %v376_v54 }
 0x1c7   : > { %962 = vpow2.f32 %v379_v55 }
 0x1ca   : > { %v695_v56 = vpop.xlane.xlu1 %694  ;;  %v533_v2 = vpop.xlane.xlu2 %532 }
 0x1cb   : > { %v699_v57 = vsub.f32 %v691_v33, %v695_v56  ;;  %v537_v6 = vsub.f32 %v529_v37, %v533_v2 }
 0x1cd   : > { %v963_v58 = vpop.eup %962  ;;  %v701_v59 = vmul.f32 1.442695, %v699_v57  ;;  %v539_v9 = vmul.f32 1.442695, %v537_v6 }
 0x1ce   : > { %v384_v60 = vsel %vm330_vm0, %v963_v58, 0.0 }
 0x1cf   : > { %385 = vadd.xlane.f32.xlu2 %v384_v60  ;;  %964 = vpow2.f32 %v701_v59 }
 0x1d2   : > { %v536_v61 = vpop.xlane.xlu1 %535 }
 0x1d3   : > { %v538_v62 = vsub.f32 %v530_v43, %v536_v61 }
 0x1d5   : > { %v541_v63 = vmul.f32 1.442695, %v538_v62  ;;  %v965_v0 = vpop.eup %964 }
 0x1d6   : > { %v705_v1 = vsel %vm330_vm0, %v965_v0, 0.0 }
 0x1d7   : > { %966 = vpow2.f32 %v541_v63  ;;  %706 = vadd.xlane.f32.xlu2 %v705_v1 }
 0x1da   : > { %v698_v3 = vpop.xlane.xlu1 %697 }
 0x1db   : > { %v700_v4 = vsub.f32 %v692_v46, %v698_v3 }
 0x1dd   : > { %v967_v5 = vpop.eup %966  ;;  %v703_v7 = vmul.f32 1.442695, %v700_v4 }
 0x1de   : > { %v546_v8 = vsel %vm330_vm0, %v967_v5, 0.0 }
 0x1df   : > { %968 = vpow2.f32 %v703_v7  ;;  %547 = vadd.xlane.f32.xlu0 %v546_v8 }
 0x1e0   : > { %970 = vpow2.f32 %v539_v9 }
 0x1e5   : > { %v969_v10 = vpop.eup %968 }
 0x1e6   : > { %v708_v11 = vsel %vm330_vm0, %v969_v10, 0.0  ;;  %v971_v12 = vpop.eup %970 }
 0x1e7   : > { %709 = vadd.xlane.f32.xlu1 %v708_v11  ;;  %v543_v13 = vsel %vm330_vm0, %v971_v12, 0.0 }
 0x1ef   : > { %544 = vadd.xlane.f32.xlu1 %v543_v13 }
 0x234   : > { %v383_v14 = vpop.xlane.xlu0 %382 }
 0x235   : > { %972 = vrcp.f32 %v383_v14 }
 0x23b   : > { %v973_v15 = vpop.eup %972 }
 0x23c   : > { %v389_v16 = vmul.f32 %v973_v15, %v961_v51 }
 0x23e   : > { %391 = vxpose.xlu0.b32.start [1/2] (short) (narrow) %v389_v16, 16 }
 0x242   : > { %v386_v17 = vpop.xlane.xlu2 %385 }
 0x243   : > { %974 = vrcp.f32 %v386_v17 }
 0x249   : > { %v975_v18 = vpop.eup %974 }
 0x24a   : > { %v390_v19 = vmul.f32 %v975_v18, %v963_v58  ;;  %v707_v20 = vpop.xlane.xlu2 %706 }
 0x24b   : > { %976 = vrcp.f32 %v707_v20 }
 0x24c   : > { %392 = vxpose.xlu0.b32.end [2/2] (short) (narrow) %v390_v19, 16 }
 0x251   : > { %v977_v21 = vpop.eup %976 }
 0x252   : > { %v713_v22 = vmul.f32 %v977_v21, %v965_v0  ;;  %v548_v29 = vpop.xlane.xlu0 %547 }
 0x254   : > { %715 = vxpose.xlu1.b32.start [1/2] (short) (narrow) %v713_v22, 16 }
 0x25a   : > { %v710_v25 = vpop.xlane.xlu1 %709 }
 0x25b   : > { %978 = vrcp.f32 %v710_v25 }
 0x261   : > { %v979_v26 = vpop.eup %978 }
 0x262   : > { %v545_v27 = vpop.xlane.xlu1 %544  ;;  %v714_v28 = vmul.f32 %v979_v26, %v969_v10 }
 0x263   : > { %980 = vrcp.f32 %v545_v27 }
 0x264   : > { %716 = vxpose.xlu1.b32.end [2/2] (short) (narrow) %v714_v28, 16  ;;  %982 = vrcp.f32 %v548_v29 }
 0x269   : > { %v981_v30 = vpop.eup %980 }
 0x26a   : > { %v551_v31 = vmul.f32 %v981_v30, %v971_v12  ;;  %v983_v32 = vpop.eup %982 }
 0x26b   : > { %v552_v33 = vmul.f32 %v983_v32, %v967_v5 }
 0x26c   : > { %553 = vxpose.xlu2.b32.start [1/2] (short) (narrow) %v551_v31, 16 }
 0x274   : > { %554 = vxpose.xlu2.b32.end [2/2] (short) (narrow) %v552_v33, 16 }
 0x2e8   : > { %v407_v34 = vpop.trf.xlu0 }
 0x2e9   : > { %896 = vmatmul.msk.f32.vlgmr.msra.gmra.mxu1 %vm330_vm0, %v407_v34 }
 0x2f0   : > { %v408_v35 = vpop.trf.xlu0 }
 0x2f1   : > { %897 = vmatmul.msk.f32.vlgmr.msra.gmra.mxu3 %vm330_vm0, %v408_v35 }
 0x300   : > { %v731_v36 = vpop.trf.xlu1 }
 0x301   : > { %918 = vmatmul.msk.f32.vlgmr.msrb.gmra.mxu1 %vm330_vm0, %v731_v36 }
 0x305   : > { %v569_v37 = vpop.trf.xlu2 }
 0x306   : > { %906 = vmatmul.msk.f32.vlgmr.msrb.gmra.mxu3 %vm330_vm0, %v569_v37 }
 0x308   : > { %v732_v38 = vpop.trf.xlu1 }
 0x309   : > { %919 = vmatmul.msk.f32.gmra.mxu1 %vm330_vm0, %v732_v38 }
 0x30d   : > { %v570_v39 = vpop.trf.xlu2 }
 0x30e   : > { %907 = vmatmul.msk.f32.gmra.mxu3 %vm330_vm0, %v570_v39 }
 0x366   : > { %v446_v40 = vpop.f32.mrf.mxu1 }
 0x367   : > { %453 = vst.msk [vmem:[%s291_s26] sm:$0xff] %vm452_vm1, %v446_v40 }
 0x374   : > { %v449_v41 = vpop.f32.mrf.mxu3 }
 0x375   : > { %454 = vst.msk [vmem:[%s291_s26 + $0x8] sm:$0xff] %vm452_vm1, %v449_v41 }
 0x37e   : > { %v770_v42 = vpop.f32.mrf.mxu1 }
 0x37f   : > { %920 = vst.msk [vmem:[%s291_s26 + $0x20] sm:$0xff] %vm452_vm1, %v770_v42 }
 0x386   : > { %v773_v43 = vpop.f32.mrf.mxu1 }
 0x387   : > { %921 = vst.msk [vmem:[%s291_s26 + $0x28] sm:$0xff] %vm452_vm1, %v773_v43 }
 0x389   : > { %v608_v44 = vpop.f32.mrf.mxu3 }
 0x38a   : > { %908 = vst.msk [vmem:[%s291_s26 + $0x10] sm:$0xff] %vm452_vm1, %v608_v44 }
 0x391   : > { %v611_v45 = vpop.f32.mrf.mxu3 }
 0x392   : > { %909 = vst.msk [vmem:[%s291_s26 + $0x18] sm:$0xff] %vm452_vm1, %v611_v45 }
 0x393 PF: > { %s17_s18 = sadd.s32 1, %s1028_s18  }
 0x394   : > { %p14_p7 = scmp.ge.s32.totalorder %s17_s18, 5  }
 0x396   :  { %16 = sbr.rel (!%p14_p7) target bundleno = 2 (0x2), region = 91 }
 0x39b   :  { %800 = vsyncpa [#allocation3], 1 }
 0x39c   :  { %802 = vsyncpa [#allocation3 + $0x1], 1 }
 0x39d   :  { %803 = vsyncpa [#allocation5], 1 }

// kernel: _lambda_.18
= control target key start
LH: loop header
LB: loop body
LE: loop exit
PB: predicated region body
PF: predicated region fallthrough
CT: control target
= control target key end

     0   :  { %vm48_vm0 = vcmask 130048   ;;  %s368_s1 = inlined_call_operand.vmem [shape: bf16[16,16], index: 1, kind: input, shape index: {}]   ;;  %s369_s0 = inlined_call_operand.vmem [shape: f32[96,16], index: 0, kind: input, shape index: {}]   ;;  %s370_s2 = inlined_call_operand.vmem [shape: f32[1,16], index: 2, kind: input, shape index: {}]   ;;  %s371_s3 = inlined_call_operand.vmem [shape: f32[96,16], index: 3, kind: input, shape index: {}]   ;;  %s372_s4 = inlined_call_operand.vmem [shape: f32[96,16], index: 4, kind: output, shape index: {}]  }
   0x1   :  { %v192_v0 = vld [vmem:[%s368_s1] sm:$0xff]  ;;  %v20_v1 = vld [vmem:[%s369_s0 + $0x10] sm:$0xff]  ;;  %v21_v2 = vld [vmem:[%s369_s0 + $0x18] sm:$0xff] }
   0x2   :  { %v31_v3 = vpack.c.bf16 %v21_v2, %v20_v1  ;;  %v24_v4 = vld [vmem:[%s369_s0 + $0x30] sm:$0xff]  ;;  %v25_v5 = vld [vmem:[%s369_s0 + $0x38] sm:$0xff]  ;;  %193 = vmatpush.bf16.msra.mxu1 %v192_v0  ;;  %194 = vmatpush.bf16.msra.mxu2 %v192_v0  ;;  %v18_v9 = vld [vmem:[%s369_s0] sm:$0xff] }
   0x3   :  { %v28_v6 = vld [vmem:[%s369_s0 + $0x50] sm:$0xff]  ;;  %v33_v7 = vpack.c.bf16 %v25_v5, %v24_v4  ;;  %v29_v8 = vld [vmem:[%s369_s0 + $0x58] sm:$0xff]  ;;  %v19_v10 = vld [vmem:[%s369_s0 + $0x8] sm:$0xff]  ;;  %195 = vmatpush.bf16.msra.mxu3 %v192_v0  ;;  %74 = vmatpush.bf16.msra.mxu0 %v192_v0 }
   0x4   :  { %v35_v11 = vpack.c.bf16 %v29_v8, %v28_v6  ;;  %v30_v12 = vpack.c.bf16 %v19_v10, %v18_v9  ;;  %v22_v13 = vld [vmem:[%s369_s0 + $0x20] sm:$0xff]  ;;  %v23_v14 = vld [vmem:[%s369_s0 + $0x28] sm:$0xff]  ;;  %v108_v21 = vld [vmem:[%s371_s3 + $0x10] sm:$0xff] }
   0x5   :  { %187 = vmatmul.msk.bf16.vlgmr.msra.gmra.mxu1 %vm48_vm0, %v31_v3  ;;  %189 = vmatmul.msk.bf16.vlgmr.msra.gmra.mxu2 %vm48_vm0, %v33_v7  ;;  %v26_v15 = vld [vmem:[%s369_s0 + $0x40] sm:$0xff]  ;;  %v27_v16 = vld [vmem:[%s369_s0 + $0x48] sm:$0xff]  ;;  %v32_v17 = vpack.c.bf16 %v23_v14, %v22_v13  ;;  %v112_v30 = vld [vmem:[%s371_s3 + $0x30] sm:$0xff] }
   0x6   :  { %191 = vmatmul.msk.bf16.vlgmr.msra.gmra.mxu3 %vm48_vm0, %v35_v11  ;;  %186 = vmatmul.msk.bf16.vlgmr.msra.gmra.mxu0 %vm48_vm0, %v30_v12  ;;  %v34_v18 = vpack.c.bf16 %v27_v16, %v26_v15  ;;  %v270_v19 = vld [vmem:[%s370_s2] ss:$0 sm:$0xff]  ;;  %v116_v35 = vld [vmem:[%s371_s3 + $0x50] sm:$0xff]  ;;  %v109_v37 = vld [vmem:[%s371_s3 + $0x18] sm:$0xff] }
   0x7   :  { %v106_v24 = vld [vmem:[%s371_s3] sm:$0xff]  ;;  %v107_v43 = vld [vmem:[%s371_s3 + $0x8] sm:$0xff]  ;;  %v113_v54 = vld [vmem:[%s371_s3 + $0x38] sm:$0xff] }
   0x8   :  { %v117_v59 = vld [vmem:[%s371_s3 + $0x58] sm:$0xff]  ;;  %v110_v61 = vld [vmem:[%s371_s3 + $0x20] sm:$0xff]  ;;  %v111_v14 = vld [vmem:[%s371_s3 + $0x28] sm:$0xff] }
   0x9   :  { %v114_v10 = vld [vmem:[%s371_s3 + $0x40] sm:$0xff] }
  0x15   :  { %188 = vmatmul.msk.bf16.gmra.mxu1 %vm48_vm0, %v32_v17  ;;  %190 = vmatmul.msk.bf16.gmra.mxu2 %vm48_vm0, %v34_v18 }
  0x82   :  { %v81_v20 = vpop.f32.mrf.mxu1 }
  0x83   :  { %v82_v22 = vadd.f32 %v270_v19, %v81_v20  ;;  %v76_v23 = vpop.f32.mrf.mxu0 }
  0x84   :  { %v77_v25 = vadd.f32 %v270_v19, %v76_v23  ;;  %v115_v23 = vld [vmem:[%s371_s3 + $0x48] sm:$0xff] }
  0x85   :  { %v120_v26 = vadd.f32 %v108_v21, %v82_v22 }
  0x86   :  { %v118_v27 = vadd.f32 %v106_v24, %v77_v25 }
  0x87   :  { %vm132_vm1 = vcmp.ge.f32.partialorder %v120_v26, 0.0  ;;  %v144_v28 = vmul.f32 0.1, %v120_v26 }
  0x88   :  { %v91_v29 = vpop.f32.mrf.mxu2  ;;  %vm130_vm2 = vcmp.ge.f32.partialorder %v118_v27, 0.0  ;;  %v142_v31 = vmul.f32 0.1, %v118_v27 }
  0x89   :  { %v156_v32 = vsel %vm132_vm1, %v120_v26, %v144_v28  ;;  %v92_v33 = vadd.f32 %v270_v19, %v91_v29  ;;  %v101_v34 = vpop.f32.mrf.mxu3 }
  0x8a   :  { %168 = vst.msk [vmem:[%s372_s4 + $0x10] sm:$0xff] %vm48_vm0, %v156_v32  ;;  %v83_v36 = vpop.f32.mrf.mxu1  ;;  %v154_v38 = vsel %vm130_vm2, %v118_v27, %v142_v31  ;;  %v102_v39 = vadd.f32 %v270_v19, %v101_v34 }
  0x8b   :  { %v124_v40 = vadd.f32 %v112_v30, %v92_v33  ;;  %v84_v41 = vadd.f32 %v270_v19, %v83_v36  ;;  %166 = vst.msk [vmem:[%s372_s4] sm:$0xff] %vm48_vm0, %v154_v38  ;;  %v78_v42 = vpop.f32.mrf.mxu0 }
  0x8c   :  { %v128_v44 = vadd.f32 %v116_v35, %v102_v39  ;;  %v79_v45 = vadd.f32 %v270_v19, %v78_v42 }
  0x8d   :  { %vm136_vm3 = vcmp.ge.f32.partialorder %v124_v40, 0.0  ;;  %v148_v46 = vmul.f32 0.1, %v124_v40  ;;  %v121_v47 = vadd.f32 %v109_v37, %v84_v41 }
  0x8e   :  { %vm140_vm4 = vcmp.ge.f32.partialorder %v128_v44, 0.0  ;;  %v152_v48 = vmul.f32 0.1, %v128_v44  ;;  %v119_v49 = vadd.f32 %v107_v43, %v79_v45 }
  0x8f   :  { %v160_v50 = vsel %vm136_vm3, %v124_v40, %v148_v46  ;;  %vm133_vm5 = vcmp.ge.f32.partialorder %v121_v47, 0.0  ;;  %v145_v51 = vmul.f32 0.1, %v121_v47 }
  0x90   :  { %172 = vst.msk [vmem:[%s372_s4 + $0x30] sm:$0xff] %vm48_vm0, %v160_v50  ;;  %v164_v52 = vsel %vm140_vm4, %v128_v44, %v152_v48  ;;  %v93_v53 = vpop.f32.mrf.mxu2  ;;  %vm131_vm6 = vcmp.ge.f32.partialorder %v119_v49, 0.0  ;;  %v143_v55 = vmul.f32 0.1, %v119_v49 }
  0x91   :  { %v157_v56 = vsel %vm133_vm5, %v121_v47, %v145_v51  ;;  %176 = vst.msk [vmem:[%s372_s4 + $0x50] sm:$0xff] %vm48_vm0, %v164_v52  ;;  %v94_v57 = vadd.f32 %v270_v19, %v93_v53  ;;  %v103_v58 = vpop.f32.mrf.mxu3 }
  0x92   :  { %169 = vst.msk [vmem:[%s372_s4 + $0x18] sm:$0xff] %vm48_vm0, %v157_v56  ;;  %v86_v60 = vpop.f32.mrf.mxu1  ;;  %v155_v62 = vsel %vm131_vm6, %v119_v49, %v143_v55  ;;  %v104_v63 = vadd.f32 %v270_v19, %v103_v58 }
  0x93   :  { %v125_v0 = vadd.f32 %v113_v54, %v94_v57  ;;  %v87_v1 = vadd.f32 %v270_v19, %v86_v60  ;;  %167 = vst.msk [vmem:[%s372_s4 + $0x8] sm:$0xff] %vm48_vm0, %v155_v62 }
  0x94   :  { %v129_v2 = vadd.f32 %v117_v59, %v104_v63 }
  0x95   :  { %vm137_vm7 = vcmp.ge.f32.partialorder %v125_v0, 0.0  ;;  %v149_v3 = vmul.f32 0.1, %v125_v0  ;;  %v122_v4 = vadd.f32 %v110_v61, %v87_v1 }
  0x96   :  { %vm141_vm8 = vcmp.ge.f32.partialorder %v129_v2, 0.0  ;;  %v153_v5 = vmul.f32 0.1, %v129_v2 }
  0x97   :  { %v161_v6 = vsel %vm137_vm7, %v125_v0, %v149_v3  ;;  %vm134_vm9 = vcmp.ge.f32.partialorder %v122_v4, 0.0  ;;  %v146_v7 = vmul.f32 0.1, %v122_v4 }
  0x98   :  { %173 = vst.msk [vmem:[%s372_s4 + $0x38] sm:$0xff] %vm48_vm0, %v161_v6  ;;  %v165_v8 = vsel %vm141_vm8, %v129_v2, %v153_v5  ;;  %v96_v9 = vpop.f32.mrf.mxu2 }
  0x99   :  { %v158_v11 = vsel %vm134_vm9, %v122_v4, %v146_v7  ;;  %177 = vst.msk [vmem:[%s372_s4 + $0x58] sm:$0xff] %vm48_vm0, %v165_v8  ;;  %v97_v12 = vadd.f32 %v270_v19, %v96_v9 }
  0x9a   :  { %170 = vst.msk [vmem:[%s372_s4 + $0x20] sm:$0xff] %vm48_vm0, %v158_v11  ;;  %v88_v13 = vpop.f32.mrf.mxu1 }
  0x9b   :  { %v126_v15 = vadd.f32 %v114_v10, %v97_v12  ;;  %v89_v16 = vadd.f32 %v270_v19, %v88_v13 }
  0x9d   :  { %vm138_vm10 = vcmp.ge.f32.partialorder %v126_v15, 0.0  ;;  %v150_v17 = vmul.f32 0.1, %v126_v15  ;;  %v123_v18 = vadd.f32 %v111_v14, %v89_v16 }
  0x9f   :  { %v162_v20 = vsel %vm138_vm10, %v126_v15, %v150_v17  ;;  %vm135_vm11 = vcmp.ge.f32.partialorder %v123_v18, 0.0  ;;  %v147_v21 = vmul.f32 0.1, %v123_v18 }
  0xa0   :  { %174 = vst.msk [vmem:[%s372_s4 + $0x40] sm:$0xff] %vm48_vm0, %v162_v20  ;;  %v98_v22 = vpop.f32.mrf.mxu2 }
  0xa1   :  { %v159_v24 = vsel %vm135_vm11, %v123_v18, %v147_v21  ;;  %v99_v25 = vadd.f32 %v270_v19, %v98_v22 }
  0xa2   :  { %171 = vst.msk [vmem:[%s372_s4 + $0x28] sm:$0xff] %vm48_vm0, %v159_v24 }
  0xa3   :  { %v127_v26 = vadd.f32 %v115_v23, %v99_v25 }
  0xa5   :  { %vm139_vm12 = vcmp.ge.f32.partialorder %v127_v26, 0.0  ;;  %v151_v27 = vmul.f32 0.1, %v127_v26 }
  0xa7   :  { %v163_v28 = vsel %vm139_vm12, %v127_v26, %v151_v27 }
  0xa8   :  { %175 = vst.msk [vmem:[%s372_s4 + $0x48] sm:$0xff] %vm48_vm0, %v163_v28 }

// kernel: _lambda_.17
= control target key start
LH: loop header
LB: loop body
LE: loop exit
PB: predicated region body
PF: predicated region fallthrough
CT: control target
= control target key end

     0   :  { %vm153_vm0 = vcmask 392192   ;;  %vm1016_vm2 = vcmask 130048   ;;  %s1705_s1 = inlined_call_operand.vmem [shape: bf16[5,48,16], index: 1, kind: input, shape index: {}]   ;;  %s1706_s0 = inlined_call_operand.vmem [shape: f32[8,20,48], index: 0, kind: input, shape index: {}]   ;;  %s1707_s2 = inlined_call_operand.vmem [shape: f32[1,16], index: 2, kind: input, shape index: {}]   ;;  %s1708_s3 = inlined_call_operand.vmem [shape: f32[8,16,16], index: 3, kind: input, shape index: {}]   ;;  %s1709_s4 = inlined_call_operand.vmem [shape: f32[8,16,16], index: 4, kind: output, shape index: {}]  }
   0x1   :  { %v1166_v0 = vld [vmem:[%s1705_s1 + $0x28] sm:$0xff]  ;;  %v1165_v1 = vld [vmem:[%s1705_s1 + $0x20] sm:$0xff]  ;;  %v60_v2 = vld [vmem:[%s1706_s0 + $0x31] sm:$0xff] }
   0x2   :  { %v61_v3 = vld [vmem:[%s1706_s0 + $0x39] sm:$0xff]  ;;  %v64_v4 = vld [vmem:[%s1706_s0 + $0x61] sm:$0xff]  ;;  %1176 = vmatpush.bf16.msra.mxu1 %v1166_v0  ;;  %1177 = vmatpush.bf16.msra.mxu2 %v1166_v0  ;;  %v76_v5 = vpack.c.bf16 %v60_v2, %v60_v2  ;;  %v65_v7 = vld [vmem:[%s1706_s0 + $0x69] sm:$0xff] }
   0x3   :  { %v77_v6 = vpack.c.bf16 %v61_v3, %v61_v3  ;;  %v80_v8 = vpack.c.bf16 %v64_v4, %v64_v4  ;;  %v68_v9 = vld [vmem:[%s1706_s0 + $0x91] sm:$0xff]  ;;  %v69_v10 = vld [vmem:[%s1706_s0 + $0x99] sm:$0xff]  ;;  %1178 = vmatpush.bf16.msra.mxu3 %v1166_v0  ;;  %183 = vmatpush.bf16.msra.mxu0 %v1166_v0  ;;  %v81_v11 = vpack.c.bf16 %v65_v7, %v65_v7  ;;  %v56_v14 = vld [vmem:[%s1706_s0 + $0x1] sm:$0xff] }
   0x4   :  { %v84_v12 = vpack.c.bf16 %v68_v9, %v68_v9  ;;  %v85_v13 = vpack.c.bf16 %v69_v10, %v69_v10  ;;  %v57_v15 = vld [vmem:[%s1706_s0 + $0x9] sm:$0xff]  ;;  %v115_v16 = vunpack.c.l.b16 %v76_v5  ;;  %v72_v17 = vpack.c.bf16 %v56_v14, %v56_v14  ;;  %v1164_v22 = vld [vmem:[%s1705_s1 + $0x18] sm:$0xff]  ;;  %v1169_v27 = vld [vmem:[%s1705_s1 + $0x40] sm:$0xff] }
   0x5   :  { %v116_v18 = vunpack.c.l.b16 %v77_v6  ;;  %v119_v19 = vunpack.c.l.b16 %v80_v8  ;;  %v120_v20 = vunpack.c.l.b16 %v81_v11  ;;  %v73_v21 = vpack.c.bf16 %v57_v15, %v57_v15  ;;  %v1172_v28 = vld [vmem:[%s1705_s1 + $0x58] sm:$0xff]  ;;  %v1163_v33 = vld [vmem:[%s1705_s1 + $0x10] sm:$0xff]  ;;  %v1162_v37 = vld [vmem:[%s1705_s1 + $0x8] sm:$0xff] }
   0x6   :  { %1179 = vmatpush.bf16.msra.mxu1 %v1165_v1  ;;  %1180 = vmatpush.bf16.msra.mxu2 %v1165_v1  ;;  %v123_v23 = vunpack.c.l.b16 %v84_v12  ;;  %v124_v24 = vunpack.c.l.b16 %v85_v13  ;;  %v111_v25 = vunpack.c.l.b16 %v72_v17  ;;  %v1175_v34 = vld [vmem:[%s1705_s1 + $0x70] sm:$0xff]  ;;  %v1168_v35 = vld [vmem:[%s1705_s1 + $0x38] sm:$0xff]  ;;  %v67_v41 = vld [vmem:[%s1706_s0 + $0x81] sm:$0xff] }
   0x7   :  { %1181 = vmatpush.bf16.msra.mxu3 %v1165_v1  ;;  %184 = vmatpush.bf16.msra.mxu0 %v1165_v1  ;;  %v112_v26 = vunpack.c.l.b16 %v73_v21  ;;  %v129_v29 = vpack.c.b16 %v116_v18, %v115_v16  ;;  %v131_v30 = vpack.c.b16 %v120_v20, %v119_v19  ;;  %v1171_v36 = vld [vmem:[%s1705_s1 + $0x50] sm:$0xff]  ;;  %v66_v40 = vld [vmem:[%s1706_s0 + $0x79] sm:$0xff]  ;;  %v59_v45 = vld [vmem:[%s1706_s0 + $0x21] sm:$0xff]  ;;  %v83_v52 = vpack.c.bf16 %v67_v41, %v67_v41 }
   0x8   :  { %v133_v31 = vpack.c.b16 %v124_v24, %v123_v23  ;;  %v62_v38 = vld [vmem:[%s1706_s0 + $0x49] sm:$0xff]  ;;  %v63_v39 = vld [vmem:[%s1706_s0 + $0x51] sm:$0xff]  ;;  %v58_v44 = vld [vmem:[%s1706_s0 + $0x19] sm:$0xff]  ;;  %v82_v51 = vpack.c.bf16 %v66_v40, %v66_v40  ;;  %v75_v56 = vpack.c.bf16 %v59_v45, %v59_v45 }
   0x9   :  { %v127_v32 = vpack.c.b16 %v112_v26, %v111_v25  ;;  %v70_v42 = vld [vmem:[%s1706_s0 + $0xa9] sm:$0xff]  ;;  %v71_v43 = vld [vmem:[%s1706_s0 + $0xb1] sm:$0xff]  ;;  %v78_v49 = vpack.c.bf16 %v62_v38, %v62_v38  ;;  %v79_v50 = vpack.c.bf16 %v63_v39, %v63_v39  ;;  %v74_v55 = vpack.c.bf16 %v58_v44, %v58_v44  ;;  %v1161_v57 = vld [vmem:[%s1705_s1] sm:$0xff] }
   0xa   :  { %1182 = vmatpush.bf16.msra.mxu1 %v1164_v22  ;;  %1183 = vmatpush.bf16.msra.mxu2 %v1164_v22  ;;  %v1174_v46 = vld [vmem:[%s1705_s1 + $0x68] sm:$0xff]  ;;  %v1167_v47 = vld [vmem:[%s1705_s1 + $0x30] sm:$0xff]  ;;  %v86_v53 = vpack.c.bf16 %v70_v42, %v70_v42  ;;  %v87_v54 = vpack.c.bf16 %v71_v43, %v71_v43  ;;  %v1173_v58 = vld [vmem:[%s1705_s1 + $0x60] sm:$0xff]  ;;  %v121_v61 = vunpack.c.l.b16 %v82_v51  ;;  %v122_v62 = vunpack.c.l.b16 %v83_v52 }
   0xb   :  { %1184 = vmatpush.bf16.msra.mxu3 %v1164_v22  ;;  %185 = vmatpush.bf16.msra.mxu0 %v1164_v22  ;;  %v1170_v48 = vld [vmem:[%s1705_s1 + $0x48] sm:$0xff]  ;;  %v117_v59 = vunpack.c.l.b16 %v78_v49  ;;  %v118_v60 = vunpack.c.l.b16 %v79_v50  ;;  %v113_v1 = vunpack.c.l.b16 %v74_v55  ;;  %v114_v2 = vunpack.c.l.b16 %v75_v56  ;;  %v18_v7 = vld [vmem:[%s1706_s0] sm:$0xff] }
   0xc   :  { %v125_v63 = vunpack.c.l.b16 %v86_v53  ;;  %v126_v0 = vunpack.c.l.b16 %v87_v54  ;;  %v132_v4 = vpack.c.b16 %v122_v62, %v121_v61  ;;  %v19_v8 = vld [vmem:[%s1706_s0 + $0x8] sm:$0xff]  ;;  %v34_v15 = vpack.c.bf16 %v18_v7, %v18_v7  ;;  %v546_v39 = vld [vmem:[%s1706_s0 + $0x1b] sm:$0xff] }
   0xd   :  { %1057 = vmatmul.msk.bf16.vlgmr.msra.gmra.mxu1 %vm153_vm0, %v129_v29  ;;  %1059 = vmatmul.msk.bf16.vlgmr.msra.gmra.mxu2 %vm153_vm0, %v131_v30  ;;  %v130_v3 = vpack.c.b16 %v118_v60, %v117_v59  ;;  %v128_v6 = vpack.c.b16 %v114_v2, %v113_v1  ;;  %v358_v9 = vld [vmem:[%s1706_s0 + $0x2] sm:$0xff]  ;;  %v359_v10 = vld [vmem:[%s1706_s0 + $0xa] sm:$0xff]  ;;  %v35_v16 = vpack.c.bf16 %v19_v8, %v19_v8  ;;  %v362_v1 = vld [vmem:[%s1706_s0 + $0x32] sm:$0xff] }
   0xe   :  { %484 = vmatpush.bf16.msrb.mxu2 %v1169_v27  ;;  %1061 = vmatmul.msk.bf16.vlgmr.msra.gmra.mxu3 %vm153_vm0, %v133_v31  ;;  %v134_v5 = vpack.c.b16 %v126_v0, %v125_v63  ;;  %v544_v11 = vld [vmem:[%s1706_s0 + $0x3] sm:$0xff]  ;;  %v545_v12 = vld [vmem:[%s1706_s0 + $0xb] sm:$0xff]  ;;  %v374_v17 = vpack.c.bf16 %v358_v9, %v358_v9  ;;  %v375_v18 = vpack.c.bf16 %v359_v10, %v359_v10  ;;  %v243_v23 = vunpack.c.l.b16 %v34_v15  ;;  %v23_v0 = vld [vmem:[%s1706_s0 + $0x38] sm:$0xff] }
   0xf   :  { %670 = vmatpush.bf16.msrb.mxu3 %v1172_v28  ;;  %1055 = vmatmul.msk.bf16.vlgmr.msra.gmra.mxu0 %vm153_vm0, %v127_v32  ;;  %v730_v13 = vld [vmem:[%s1706_s0 + $0x4] sm:$0xff]  ;;  %v731_v14 = vld [vmem:[%s1706_s0 + $0xc] sm:$0xff]  ;;  %v560_v19 = vpack.c.bf16 %v544_v11, %v544_v11  ;;  %v561_v20 = vpack.c.bf16 %v545_v12, %v545_v12  ;;  %v244_v24 = vunpack.c.l.b16 %v35_v16  ;;  %v732_v41 = vld [vmem:[%s1706_s0 + $0x1c] sm:$0xff]  ;;  %v39_v8 = vpack.c.bf16 %v23_v0, %v23_v0 }
  0x10   :  { %314 = vmatpush.bf16.msrb.mxu1 %v1163_v33  ;;  %856 = vmatpush.bf16.msrb.mxu0 %v1175_v34  ;;  %v746_v21 = vpack.c.bf16 %v730_v13, %v730_v13  ;;  %v747_v22 = vpack.c.bf16 %v731_v14, %v731_v14  ;;  %v413_v25 = vunpack.c.l.b16 %v374_v17  ;;  %v414_v26 = vunpack.c.l.b16 %v375_v18  ;;  %v361_v38 = vld [vmem:[%s1706_s0 + $0x22] sm:$0xff]  ;;  %v22_v63 = vld [vmem:[%s1706_s0 + $0x30] sm:$0xff]  ;;  %v363_v2 = vld [vmem:[%s1706_s0 + $0x3a] sm:$0xff] }
  0x11   :  { %v599_v27 = vunpack.c.l.b16 %v560_v19  ;;  %v600_v28 = vunpack.c.l.b16 %v561_v20  ;;  %v259_v31 = vpack.c.b16 %v244_v24, %v243_v23  ;;  %v547_v40 = vld [vmem:[%s1706_s0 + $0x23] sm:$0xff]  ;;  %v748_v49 = vpack.c.bf16 %v732_v41, %v732_v41 }
  0x12   :  { %485 = vmatpush.bf16.msrb.mxu2 %v1168_v35  ;;  %v785_v29 = vunpack.c.l.b16 %v746_v21  ;;  %v786_v30 = vunpack.c.l.b16 %v747_v22  ;;  %v429_v32 = vpack.c.b16 %v414_v26, %v413_v25  ;;  %v20_v35 = vld [vmem:[%s1706_s0 + $0x18] sm:$0xff]  ;;  %v733_v42 = vld [vmem:[%s1706_s0 + $0x24] sm:$0xff]  ;;  %v38_v7 = vpack.c.bf16 %v22_v63, %v22_v63 }
  0x13   :  { %671 = vmatpush.bf16.msrb.mxu3 %v1171_v36  ;;  %v615_v33 = vpack.c.b16 %v600_v28, %v599_v27  ;;  %v21_v36 = vld [vmem:[%s1706_s0 + $0x20] sm:$0xff]  ;;  %v36_v43 = vpack.c.bf16 %v20_v35, %v20_v35  ;;  %v749_v50 = vpack.c.bf16 %v733_v42, %v733_v42  ;;  %v378_v9 = vpack.c.bf16 %v362_v1, %v362_v1  ;;  %v24_v27 = vld [vmem:[%s1706_s0 + $0x48] sm:$0xff]  ;;  %v25_v28 = vld [vmem:[%s1706_s0 + $0x50] sm:$0xff] }
  0x14   :  { %315 = vmatpush.bf16.msrb.mxu1 %v1162_v37  ;;  %857 = vmatpush.bf16.msrb.mxu0 %v1174_v46  ;;  %v801_v34 = vpack.c.b16 %v786_v30, %v785_v29  ;;  %v360_v37 = vld [vmem:[%s1706_s0 + $0x1a] sm:$0xff]  ;;  %v37_v44 = vpack.c.bf16 %v21_v36, %v21_v36  ;;  %v377_v46 = vpack.c.bf16 %v361_v38, %v361_v38  ;;  %v247_v15 = vunpack.c.l.b16 %v38_v7  ;;  %v364_v29 = vld [vmem:[%s1706_s0 + $0x4a] sm:$0xff]  ;;  %v365_v30 = vld [vmem:[%s1706_s0 + $0x52] sm:$0xff] }
  0x15   :  { %v376_v45 = vpack.c.bf16 %v360_v37, %v360_v37  ;;  %v245_v51 = vunpack.c.l.b16 %v36_v43  ;;  %v379_v10 = vpack.c.bf16 %v363_v2, %v363_v2  ;;  %v248_v16 = vunpack.c.l.b16 %v39_v8 }
  0x16   :  { %486 = vmatpush.bf16.msrb.mxu2 %v1167_v47  ;;  %v562_v47 = vpack.c.bf16 %v546_v39, %v546_v39  ;;  %v246_v52 = vunpack.c.l.b16 %v37_v44  ;;  %v416_v54 = vunpack.c.l.b16 %v377_v46  ;;  %v417_v17 = vunpack.c.l.b16 %v378_v9 }
  0x17   :  { %672 = vmatpush.bf16.msrb.mxu3 %v1170_v48  ;;  %v563_v48 = vpack.c.bf16 %v547_v40, %v547_v40  ;;  %v415_v53 = vunpack.c.l.b16 %v376_v45  ;;  %v418_v18 = vunpack.c.l.b16 %v379_v10  ;;  %v261_v23 = vpack.c.b16 %v248_v16, %v247_v15 }
  0x18   :  { %316 = vmatpush.bf16.msrb.mxu1 %v1161_v57  ;;  %858 = vmatpush.bf16.msrb.mxu0 %v1173_v58  ;;  %v601_v55 = vunpack.c.l.b16 %v562_v47  ;;  %v787_v57 = vunpack.c.l.b16 %v748_v49  ;;  %v788_v58 = vunpack.c.l.b16 %v749_v50  ;;  %v260_v59 = vpack.c.b16 %v246_v52, %v245_v51 }
  0x19   :  { %v602_v56 = vunpack.c.l.b16 %v563_v48  ;;  %v430_v60 = vpack.c.b16 %v416_v54, %v415_v53  ;;  %v431_v24 = vpack.c.b16 %v418_v18, %v417_v17  ;;  %v40_v35 = vpack.c.bf16 %v24_v27, %v24_v27 }
  0x1a   :  { %v802_v62 = vpack.c.b16 %v788_v58, %v787_v57  ;;  %v41_v36 = vpack.c.bf16 %v25_v28, %v25_v28  ;;  %v380_v37 = vpack.c.bf16 %v364_v29, %v364_v29  ;;  %v381_v38 = vpack.c.bf16 %v365_v30, %v365_v30  ;;  %v366_v57 = vld [vmem:[%s1706_s0 + $0x62] sm:$0xff]  ;;  %v367_v58 = vld [vmem:[%s1706_s0 + $0x6a] sm:$0xff] }
  0x1b   :  { %v616_v61 = vpack.c.b16 %v602_v56, %v601_v55  ;;  %v249_v43 = vunpack.c.l.b16 %v40_v35  ;;  %v26_v55 = vld [vmem:[%s1706_s0 + $0x60] sm:$0xff]  ;;  %v27_v56 = vld [vmem:[%s1706_s0 + $0x68] sm:$0xff]  ;;  %v382_v1 = vpack.c.bf16 %v366_v57, %v366_v57  ;;  %v383_v2 = vpack.c.bf16 %v367_v58, %v367_v58 }
  0x1c   :  { %v250_v44 = vunpack.c.l.b16 %v41_v36  ;;  %v419_v45 = vunpack.c.l.b16 %v380_v37  ;;  %v420_v46 = vunpack.c.l.b16 %v381_v38  ;;  %v42_v63 = vpack.c.bf16 %v26_v55, %v26_v55 }
  0x1d   :  { %1058 = vmatmul.msk.bf16.gmra.mxu1 %vm153_vm0, %v130_v3  ;;  %1060 = vmatmul.msk.bf16.gmra.mxu2 %vm153_vm0, %v132_v4  ;;  %v548_v3 = vld [vmem:[%s1706_s0 + $0x33] sm:$0xff]  ;;  %v549_v4 = vld [vmem:[%s1706_s0 + $0x3b] sm:$0xff]  ;;  %v43_v0 = vpack.c.bf16 %v27_v56, %v27_v56  ;;  %v421_v9 = vunpack.c.l.b16 %v382_v1  ;;  %v422_v10 = vunpack.c.l.b16 %v383_v2 }
  0x1e   :  { %1062 = vmatmul.msk.bf16.gmra.mxu3 %vm153_vm0, %v134_v5  ;;  %v734_v5 = vld [vmem:[%s1706_s0 + $0x34] sm:$0xff]  ;;  %v564_v11 = vpack.c.bf16 %v548_v3, %v548_v3  ;;  %v565_v12 = vpack.c.bf16 %v549_v4, %v549_v4  ;;  %v262_v51 = vpack.c.b16 %v250_v44, %v249_v43  ;;  %v432_v52 = vpack.c.b16 %v420_v46, %v419_v45 }
  0x1f   :  { %1056 = vmatmul.msk.bf16.gmra.mxu0 %vm153_vm0, %v128_v6  ;;  %v735_v6 = vld [vmem:[%s1706_s0 + $0x3c] sm:$0xff]  ;;  %v750_v13 = vpack.c.bf16 %v734_v5, %v734_v5  ;;  %v251_v7 = vunpack.c.l.b16 %v42_v63  ;;  %v252_v8 = vunpack.c.l.b16 %v43_v0  ;;  %v433_v16 = vpack.c.b16 %v422_v10, %v421_v9 }
  0x20   :  { %v751_v14 = vpack.c.bf16 %v735_v6, %v735_v6  ;;  %v603_v19 = vunpack.c.l.b16 %v564_v11  ;;  %v604_v20 = vunpack.c.l.b16 %v565_v12 }
  0x21   :  { %v789_v21 = vunpack.c.l.b16 %v750_v13  ;;  %v263_v15 = vpack.c.b16 %v252_v8, %v251_v7 }
  0x22   :  { %v790_v22 = vunpack.c.l.b16 %v751_v14  ;;  %v617_v25 = vpack.c.b16 %v604_v20, %v603_v19  ;;  %v28_v19 = vld [vmem:[%s1706_s0 + $0x78] sm:$0xff]  ;;  %v29_v20 = vld [vmem:[%s1706_s0 + $0x80] sm:$0xff] }
  0x23   :  { %v44_v27 = vpack.c.bf16 %v28_v19, %v28_v19  ;;  %v45_v28 = vpack.c.bf16 %v29_v20, %v29_v20  ;;  %v744_v19 = vld [vmem:[%s1706_s0 + $0xac] sm:$0xff]  ;;  %v745_v20 = vld [vmem:[%s1706_s0 + $0xb4] sm:$0xff] }
  0x24   :  { %v803_v26 = vpack.c.b16 %v790_v22, %v789_v21  ;;  %v368_v21 = vld [vmem:[%s1706_s0 + $0x7a] sm:$0xff]  ;;  %v369_v22 = vld [vmem:[%s1706_s0 + $0x82] sm:$0xff] }
  0x25   :  { %v384_v29 = vpack.c.bf16 %v368_v21, %v368_v21  ;;  %v385_v30 = vpack.c.bf16 %v369_v22, %v369_v22  ;;  %v253_v35 = vunpack.c.l.b16 %v44_v27  ;;  %v254_v36 = vunpack.c.l.b16 %v45_v28 }
  0x27   :  { %v423_v37 = vunpack.c.l.b16 %v384_v29  ;;  %v424_v38 = vunpack.c.l.b16 %v385_v30  ;;  %v264_v43 = vpack.c.b16 %v254_v36, %v253_v35  ;;  %v760_v30 = vpack.c.bf16 %v744_v19, %v744_v19 }
  0x29   :  { %v434_v44 = vpack.c.b16 %v424_v38, %v423_v37 }
  0x2d   :  { %1075 = vmatmul.msk.bf16.vlgmr.msrb.gmra.mxu1 %vm153_vm0, %v259_v31  ;;  %1101 = vmatmul.msk.bf16.vlgmr.msrb.gmra.mxu2 %vm153_vm0, %v429_v32  ;;  %v550_v31 = vld [vmem:[%s1706_s0 + $0x4b] sm:$0xff]  ;;  %v551_v32 = vld [vmem:[%s1706_s0 + $0x53] sm:$0xff] }
  0x2e   :  { %1127 = vmatmul.msk.bf16.vlgmr.msrb.gmra.mxu3 %vm153_vm0, %v615_v33  ;;  %v736_v33 = vld [vmem:[%s1706_s0 + $0x4c] sm:$0xff]  ;;  %v566_v39 = vpack.c.bf16 %v550_v31, %v550_v31  ;;  %v567_v40 = vpack.c.bf16 %v551_v32, %v551_v32 }
  0x2f   :  { %1153 = vmatmul.msk.bf16.vlgmr.msrb.gmra.mxu0 %vm153_vm0, %v801_v34  ;;  %v737_v34 = vld [vmem:[%s1706_s0 + $0x54] sm:$0xff]  ;;  %v752_v41 = vpack.c.bf16 %v736_v33, %v736_v33 }
  0x30   :  { %v753_v42 = vpack.c.bf16 %v737_v34, %v737_v34  ;;  %v605_v47 = vunpack.c.l.b16 %v566_v39  ;;  %v606_v48 = vunpack.c.l.b16 %v567_v40 }
  0x31   :  { %v791_v49 = vunpack.c.l.b16 %v752_v41 }
  0x32   :  { %v792_v50 = vunpack.c.l.b16 %v753_v42  ;;  %v618_v53 = vpack.c.b16 %v606_v48, %v605_v47  ;;  %v30_v47 = vld [vmem:[%s1706_s0 + $0x90] sm:$0xff]  ;;  %v31_v48 = vld [vmem:[%s1706_s0 + $0x98] sm:$0xff] }
  0x33   :  { %v46_v55 = vpack.c.bf16 %v30_v47, %v30_v47  ;;  %v47_v56 = vpack.c.bf16 %v31_v48, %v31_v48 }
  0x34   :  { %v804_v54 = vpack.c.b16 %v792_v50, %v791_v49  ;;  %v370_v49 = vld [vmem:[%s1706_s0 + $0x92] sm:$0xff]  ;;  %v371_v50 = vld [vmem:[%s1706_s0 + $0x9a] sm:$0xff] }
  0x35   :  { %v386_v57 = vpack.c.bf16 %v370_v49, %v370_v49  ;;  %v387_v58 = vpack.c.bf16 %v371_v50, %v371_v50  ;;  %v255_v63 = vunpack.c.l.b16 %v46_v55  ;;  %v256_v0 = vunpack.c.l.b16 %v47_v56 }
  0x37   :  { %v425_v1 = vunpack.c.l.b16 %v386_v57  ;;  %v426_v2 = vunpack.c.l.b16 %v387_v58  ;;  %v265_v7 = vpack.c.b16 %v256_v0, %v255_v63  ;;  %v1563_v63 = vld [vmem:[%s1707_s2] ss:$0 sm:$0xff] }
  0x39   :  { %v435_v8 = vpack.c.b16 %v426_v2, %v425_v1  ;;  %v936_v2 = vld [vmem:[%s1708_s3] sm:$0xff] }
  0x3d   :  { %1076 = vmatmul.msk.bf16.gmra.mxu1 %vm153_vm0, %v260_v59  ;;  %1102 = vmatmul.msk.bf16.gmra.mxu2 %vm153_vm0, %v430_v60  ;;  %v552_v59 = vld [vmem:[%s1706_s0 + $0x63] sm:$0xff]  ;;  %v553_v60 = vld [vmem:[%s1706_s0 + $0x6b] sm:$0xff] }
  0x3e   :  { %1128 = vmatmul.msk.bf16.gmra.mxu3 %vm153_vm0, %v616_v61  ;;  %v738_v61 = vld [vmem:[%s1706_s0 + $0x64] sm:$0xff]  ;;  %v568_v3 = vpack.c.bf16 %v552_v59, %v552_v59  ;;  %v569_v4 = vpack.c.bf16 %v553_v60, %v553_v60 }
  0x3f   :  { %1154 = vmatmul.msk.bf16.gmra.mxu0 %vm153_vm0, %v802_v62  ;;  %v739_v62 = vld [vmem:[%s1706_s0 + $0x6c] sm:$0xff]  ;;  %v754_v5 = vpack.c.bf16 %v738_v61, %v738_v61 }
  0x40   :  { %v755_v6 = vpack.c.bf16 %v739_v62, %v739_v62  ;;  %v607_v11 = vunpack.c.l.b16 %v568_v3  ;;  %v608_v12 = vunpack.c.l.b16 %v569_v4 }
  0x41   :  { %v793_v13 = vunpack.c.l.b16 %v754_v5 }
  0x42   :  { %v794_v14 = vunpack.c.l.b16 %v755_v6  ;;  %v619_v17 = vpack.c.b16 %v608_v12, %v607_v11 }
  0x44   :  { %v805_v18 = vpack.c.b16 %v794_v14, %v793_v13  ;;  %v32_v13 = vld [vmem:[%s1706_s0 + $0xa8] sm:$0xff]  ;;  %v33_v14 = vld [vmem:[%s1706_s0 + $0xb0] sm:$0xff] }
  0x4d   :  { %1077 = vmatmul.msk.bf16.gmra.mxu1 %vm153_vm0, %v261_v23  ;;  %1103 = vmatmul.msk.bf16.gmra.mxu2 %vm153_vm0, %v431_v24  ;;  %v554_v23 = vld [vmem:[%s1706_s0 + $0x7b] sm:$0xff]  ;;  %v555_v24 = vld [vmem:[%s1706_s0 + $0x83] sm:$0xff] }
  0x4e   :  { %1129 = vmatmul.msk.bf16.gmra.mxu3 %vm153_vm0, %v617_v25  ;;  %v740_v25 = vld [vmem:[%s1706_s0 + $0x7c] sm:$0xff]  ;;  %v570_v31 = vpack.c.bf16 %v554_v23, %v554_v23  ;;  %v571_v32 = vpack.c.bf16 %v555_v24, %v555_v24  ;;  %v48_v23 = vpack.c.bf16 %v32_v13, %v32_v13  ;;  %v49_v24 = vpack.c.bf16 %v33_v14, %v33_v14 }
  0x4f   :  { %1155 = vmatmul.msk.bf16.gmra.mxu0 %vm153_vm0, %v803_v26  ;;  %v741_v26 = vld [vmem:[%s1706_s0 + $0x84] sm:$0xff]  ;;  %v756_v33 = vpack.c.bf16 %v740_v25, %v740_v25 }
  0x50   :  { %v757_v34 = vpack.c.bf16 %v741_v26, %v741_v26  ;;  %v609_v39 = vunpack.c.l.b16 %v570_v31  ;;  %v610_v40 = vunpack.c.l.b16 %v571_v32  ;;  %v761_v31 = vpack.c.bf16 %v745_v20, %v745_v20 }
  0x51   :  { %v795_v41 = vunpack.c.l.b16 %v756_v33  ;;  %v257_v33 = vunpack.c.l.b16 %v48_v23 }
  0x52   :  { %v796_v42 = vunpack.c.l.b16 %v757_v34  ;;  %v620_v45 = vpack.c.b16 %v610_v40, %v609_v39  ;;  %v258_v34 = vunpack.c.l.b16 %v49_v24  ;;  %v799_v39 = vunpack.c.l.b16 %v760_v30 }
  0x53   :  { %v800_v40 = vunpack.c.l.b16 %v761_v31 }
  0x54   :  { %v806_v46 = vpack.c.b16 %v796_v42, %v795_v41 }
  0x55   :  { %v808_v47 = vpack.c.b16 %v800_v40, %v799_v39 }
  0x5d   :  { %1078 = vmatmul.msk.bf16.gmra.mxu1 %vm153_vm0, %v262_v51  ;;  %1104 = vmatmul.msk.bf16.gmra.mxu2 %vm153_vm0, %v432_v52  ;;  %v556_v51 = vld [vmem:[%s1706_s0 + $0x93] sm:$0xff]  ;;  %v557_v52 = vld [vmem:[%s1706_s0 + $0x9b] sm:$0xff] }
  0x5e   :  { %1130 = vmatmul.msk.bf16.gmra.mxu3 %vm153_vm0, %v618_v53  ;;  %v742_v53 = vld [vmem:[%s1706_s0 + $0x94] sm:$0xff]  ;;  %v572_v59 = vpack.c.bf16 %v556_v51, %v556_v51  ;;  %v573_v60 = vpack.c.bf16 %v557_v52, %v557_v52 }
  0x5f   :  { %1156 = vmatmul.msk.bf16.gmra.mxu0 %vm153_vm0, %v804_v54  ;;  %v743_v54 = vld [vmem:[%s1706_s0 + $0x9c] sm:$0xff]  ;;  %v758_v61 = vpack.c.bf16 %v742_v53, %v742_v53 }
  0x60   :  { %v759_v62 = vpack.c.bf16 %v743_v54, %v743_v54  ;;  %v611_v3 = vunpack.c.l.b16 %v572_v59  ;;  %v612_v4 = vunpack.c.l.b16 %v573_v60 }
  0x61   :  { %v797_v5 = vunpack.c.l.b16 %v758_v61 }
  0x62   :  { %v798_v6 = vunpack.c.l.b16 %v759_v62  ;;  %v621_v10 = vpack.c.b16 %v612_v4, %v611_v3 }
  0x64   :  { %v807_v11 = vpack.c.b16 %v798_v6, %v797_v5 }
  0x6d   :  { %1079 = vmatmul.msk.bf16.gmra.mxu1 %vm153_vm0, %v263_v15  ;;  %1105 = vmatmul.msk.bf16.gmra.mxu2 %vm153_vm0, %v433_v16  ;;  %v372_v15 = vld [vmem:[%s1706_s0 + $0xaa] sm:$0xff]  ;;  %v373_v16 = vld [vmem:[%s1706_s0 + $0xb2] sm:$0xff] }
  0x6e   :  { %1131 = vmatmul.msk.bf16.gmra.mxu3 %vm153_vm0, %v619_v17  ;;  %v558_v17 = vld [vmem:[%s1706_s0 + $0xab] sm:$0xff]  ;;  %v388_v25 = vpack.c.bf16 %v372_v15, %v372_v15  ;;  %v389_v26 = vpack.c.bf16 %v373_v16, %v373_v16 }
  0x6f   :  { %1157 = vmatmul.msk.bf16.gmra.mxu0 %vm153_vm0, %v805_v18  ;;  %v559_v18 = vld [vmem:[%s1706_s0 + $0xb3] sm:$0xff]  ;;  %v574_v28 = vpack.c.bf16 %v558_v17, %v558_v17  ;;  %v937_v16 = vld [vmem:[%s1708_s3 + $0x8] sm:$0xff] }
  0x70   :  { %v575_v29 = vpack.c.bf16 %v559_v18, %v559_v18  ;;  %v427_v35 = vunpack.c.l.b16 %v388_v25  ;;  %v428_v36 = vunpack.c.l.b16 %v389_v26 }
  0x71   :  { %v613_v37 = vunpack.c.l.b16 %v574_v28 }
  0x72   :  { %v614_v38 = vunpack.c.l.b16 %v575_v29 }
  0x7d   :  { %1080 = vmatmul.msk.bf16.gmra.mxu1 %vm153_vm0, %v264_v43  ;;  %1106 = vmatmul.msk.bf16.gmra.mxu2 %vm153_vm0, %v434_v44  ;;  %v266_v43 = vpack.c.b16 %v258_v34, %v257_v33  ;;  %v436_v44 = vpack.c.b16 %v428_v36, %v427_v35 }
  0x7e   :  { %1132 = vmatmul.msk.bf16.gmra.mxu3 %vm153_vm0, %v620_v45 }
  0x7f   :  { %1158 = vmatmul.msk.bf16.gmra.mxu0 %vm153_vm0, %v806_v46  ;;  %v622_v46 = vpack.c.b16 %v614_v38, %v613_v37 }
  0x8a   :  { %v1504_v9 = vpop.f32.mrf.mxu1 }
  0x8c   :  { %v187_v12 = vpop.f32.mrf.mxu0 }
  0x8d   :  { %1081 = vmatmul.msk.bf16.gmra.mxu1 %vm153_vm0, %v265_v7  ;;  %1107 = vmatmul.msk.bf16.gmra.mxu2 %vm153_vm0, %v435_v8 }
  0x8e   :  { %1133 = vmatmul.msk.bf16.gmra.mxu3 %vm153_vm0, %v621_v10 }
  0x8f   :  { %1159 = vmatmul.msk.bf16.gmra.mxu0 %vm153_vm0, %v807_v11 }
  0x90   :  { %v1534_v21 = vpop.f32.mrf.mxu2 }
  0x91   :  { %v1536_v22 = vpop.f32.mrf.mxu3 }
  0x92   :  { %v1538_v27 = vpop.f32.mrf.mxu1 }
  0x94   :  { %v189_v32 = vpop.f32.mrf.mxu0 }
  0x98   :  { %v1540_v41 = vpop.f32.mrf.mxu2 }
  0x99   :  { %v1542_v42 = vpop.f32.mrf.mxu3 }
  0x9a   :  { %v1544_v45 = vpop.f32.mrf.mxu1 }
  0x9c   :  { %v192_v48 = vpop.f32.mrf.mxu0 }
  0x9d   :  { %1082 = vmatmul.msk.bf16.gmra.mxu1 %vm153_vm0, %v266_v43  ;;  %1108 = vmatmul.msk.bf16.gmra.mxu2 %vm153_vm0, %v436_v44 }
  0x9e   :  { %1134 = vmatmul.msk.bf16.gmra.mxu3 %vm153_vm0, %v622_v46 }
  0x9f   :  { %1160 = vmatmul.msk.bf16.gmra.mxu0 %vm153_vm0, %v808_v47 }
  0xa0   :  { %v1550_v49 = vpop.f32.mrf.mxu2 }
  0xa1   :  { %v1552_v50 = vpop.f32.mrf.mxu3 }
  0xa2   :  { %v1554_v51 = vpop.f32.mrf.mxu1 }
  0xa4   :  { %v194_v52 = vpop.f32.mrf.mxu0 }
  0xa8   :  { %v1556_v53 = vpop.f32.mrf.mxu2 }
  0xa9   :  { %v1558_v54 = vpop.f32.mrf.mxu3 }
  0xaa   :  { %v318_v55 = vpop.f32.mrf.mxu1 }
  0xab   :  { %v319_v57 = vadd.f32 %v318_v55, %v187_v12 }
  0xac   :  { %v860_v56 = vpop.f32.mrf.mxu0 }
  0xb0   :  { %v488_v58 = vpop.f32.mrf.mxu2 }
  0xb1   :  { %v528_v59 = vadd.f32 %v488_v58, %v319_v57  ;;  %v674_v60 = vpop.f32.mrf.mxu3 }
  0xb2   :  { %v320_v61 = vpop.f32.mrf.mxu1 }
  0xb3   :  { %v714_v62 = vadd.f32 %v674_v60, %v528_v59  ;;  %v321_v4 = vadd.f32 %v320_v61, %v189_v32  ;;  %v938_v32 = vld [vmem:[%s1708_s3 + $0x10] sm:$0xff] }
  0xb4   :  { %v862_v0 = vpop.f32.mrf.mxu0 }
  0xb5   :  { %v900_v1 = vadd.f32 %v860_v56, %v714_v62 }
  0xb7   :  { %v920_v3 = vadd.f32 %v1563_v63, %v900_v1 }
  0xb8   :  { %v490_v5 = vpop.f32.mrf.mxu2 }
  0xb9   :  { %v952_v6 = vadd.f32 %v936_v2, %v920_v3  ;;  %v529_v7 = vadd.f32 %v490_v5, %v321_v4  ;;  %v676_v8 = vpop.f32.mrf.mxu3 }
  0xba   :  { %v323_v10 = vpop.f32.mrf.mxu1 }
  0xbb   :  { %vm968_vm1 = vcmp.ge.f32.partialorder %v952_v6, 0.0  ;;  %v984_v11 = vmul.f32 0.1, %v952_v6  ;;  %v715_v12 = vadd.f32 %v676_v8, %v529_v7  ;;  %v324_v18 = vadd.f32 %v323_v10, %v192_v48  ;;  %v939_v48 = vld [vmem:[%s1708_s3 + $0x18] sm:$0xff] }
  0xbc   :  { %v865_v13 = vpop.f32.mrf.mxu0 }
  0xbd   :  { %v1000_v14 = vsel %vm968_vm1, %v952_v6, %v984_v11  ;;  %v901_v15 = vadd.f32 %v862_v0, %v715_v12 }
  0xbe   :  { %1017 = vst.msk [vmem:[%s1709_s4] sm:$0xff] %vm1016_vm2, %v1000_v14 }
  0xbf   :  { %v921_v17 = vadd.f32 %v1563_v63, %v901_v15 }
  0xc0   :  { %v493_v19 = vpop.f32.mrf.mxu2 }
  0xc1   :  { %v953_v20 = vadd.f32 %v937_v16, %v921_v17  ;;  %v530_v23 = vadd.f32 %v493_v19, %v324_v18  ;;  %v679_v24 = vpop.f32.mrf.mxu3 }
  0xc2   :  { %v325_v25 = vpop.f32.mrf.mxu1 }
  0xc3   :  { %vm969_vm3 = vcmp.ge.f32.partialorder %v953_v20, 0.0  ;;  %v985_v26 = vmul.f32 0.1, %v953_v20  ;;  %v716_v28 = vadd.f32 %v679_v24, %v530_v23  ;;  %v326_v34 = vadd.f32 %v325_v25, %v194_v52 }
  0xc4   :  { %v867_v29 = vpop.f32.mrf.mxu0 }
  0xc5   :  { %v1001_v30 = vsel %vm969_vm3, %v953_v20, %v985_v26  ;;  %v902_v31 = vadd.f32 %v865_v13, %v716_v28 }
  0xc6   :  { %1018 = vst.msk [vmem:[%s1709_s4 + $0x8] sm:$0xff] %vm1016_vm2, %v1001_v30 }
  0xc7   :  { %v922_v33 = vadd.f32 %v1563_v63, %v902_v31 }
  0xc8   :  { %v495_v35 = vpop.f32.mrf.mxu2 }
  0xc9   :  { %v954_v36 = vadd.f32 %v938_v32, %v922_v33  ;;  %v531_v37 = vadd.f32 %v495_v35, %v326_v34  ;;  %v681_v38 = vpop.f32.mrf.mxu3 }
  0xca   :  { %v328_v39 = vpop.f32.mrf.mxu1 }
  0xcb   :  { %vm970_vm4 = vcmp.ge.f32.partialorder %v954_v36, 0.0  ;;  %v986_v40 = vmul.f32 0.1, %v954_v36  ;;  %v717_v43 = vadd.f32 %v681_v38, %v531_v37  ;;  %v329_v55 = vadd.f32 %v328_v39, %v1504_v9  ;;  %v940_v9 = vld [vmem:[%s1708_s3 + $0x20] sm:$0xff] }
  0xcc   :  { %v870_v44 = vpop.f32.mrf.mxu0 }
  0xcd   :  { %v1002_v46 = vsel %vm970_vm4, %v954_v36, %v986_v40  ;;  %v903_v47 = vadd.f32 %v867_v29, %v717_v43 }
  0xce   :  { %1019 = vst.msk [vmem:[%s1709_s4 + $0x10] sm:$0xff] %vm1016_vm2, %v1002_v46 }
  0xcf   :  { %v923_v52 = vadd.f32 %v1563_v63, %v903_v47 }
  0xd0   :  { %v498_v56 = vpop.f32.mrf.mxu2 }
  0xd1   :  { %v955_v57 = vadd.f32 %v939_v48, %v923_v52  ;;  %v532_v58 = vadd.f32 %v498_v56, %v329_v55  ;;  %v684_v59 = vpop.f32.mrf.mxu3 }
  0xd2   :  { %v330_v60 = vpop.f32.mrf.mxu1 }
  0xd3   :  { %vm971_vm5 = vcmp.ge.f32.partialorder %v955_v57, 0.0  ;;  %v987_v61 = vmul.f32 0.1, %v955_v57  ;;  %v718_v62 = vadd.f32 %v684_v59, %v532_v58  ;;  %v331_v4 = vadd.f32 %v330_v60, %v1538_v27  ;;  %v941_v27 = vld [vmem:[%s1708_s3 + $0x28] sm:$0xff] }
  0xd4   :  { %v872_v0 = vpop.f32.mrf.mxu0 }
  0xd5   :  { %v1003_v1 = vsel %vm971_vm5, %v955_v57, %v987_v61  ;;  %v904_v2 = vadd.f32 %v870_v44, %v718_v62 }
  0xd6   :  { %1020 = vst.msk [vmem:[%s1709_s4 + $0x18] sm:$0xff] %vm1016_vm2, %v1003_v1 }
  0xd7   :  { %v924_v3 = vadd.f32 %v1563_v63, %v904_v2 }
  0xd8   :  { %v500_v5 = vpop.f32.mrf.mxu2 }
  0xd9   :  { %v956_v6 = vadd.f32 %v940_v9, %v924_v3  ;;  %v533_v7 = vadd.f32 %v500_v5, %v331_v4  ;;  %v686_v8 = vpop.f32.mrf.mxu3 }
  0xda   :  { %v333_v10 = vpop.f32.mrf.mxu1 }
  0xdb   :  { %vm972_vm6 = vcmp.ge.f32.partialorder %v956_v6, 0.0  ;;  %v988_v11 = vmul.f32 0.1, %v956_v6  ;;  %v719_v12 = vadd.f32 %v686_v8, %v533_v7  ;;  %v334_v17 = vadd.f32 %v333_v10, %v1544_v45  ;;  %v942_v45 = vld [vmem:[%s1708_s3 + $0x30] sm:$0xff] }
  0xdc   :  { %v875_v13 = vpop.f32.mrf.mxu0 }
  0xdd   :  { %v1004_v14 = vsel %vm972_vm6, %v956_v6, %v988_v11  ;;  %v905_v15 = vadd.f32 %v872_v0, %v719_v12 }
  0xde   :  { %1021 = vst.msk [vmem:[%s1709_s4 + $0x20] sm:$0xff] %vm1016_vm2, %v1004_v14 }
  0xdf   :  { %v925_v16 = vadd.f32 %v1563_v63, %v905_v15 }
  0xe0   :  { %v503_v18 = vpop.f32.mrf.mxu2 }
  0xe1   :  { %v957_v19 = vadd.f32 %v941_v27, %v925_v16  ;;  %v534_v20 = vadd.f32 %v503_v18, %v334_v17  ;;  %v689_v23 = vpop.f32.mrf.mxu3 }
  0xe2   :  { %v335_v24 = vpop.f32.mrf.mxu1 }
  0xe3   :  { %vm973_vm7 = vcmp.ge.f32.partialorder %v957_v19, 0.0  ;;  %v989_v25 = vmul.f32 0.1, %v957_v19  ;;  %v720_v26 = vadd.f32 %v689_v23, %v534_v20  ;;  %v336_v32 = vadd.f32 %v335_v24, %v1554_v51  ;;  %v943_v51 = vld [vmem:[%s1708_s3 + $0x38] sm:$0xff] }
  0xe4   :  { %v877_v28 = vpop.f32.mrf.mxu0 }
  0xe5   :  { %v1005_v29 = vsel %vm973_vm7, %v957_v19, %v989_v25  ;;  %v906_v30 = vadd.f32 %v875_v13, %v720_v26 }
  0xe6   :  { %1022 = vst.msk [vmem:[%s1709_s4 + $0x28] sm:$0xff] %vm1016_vm2, %v1005_v29 }
  0xe7   :  { %v926_v31 = vadd.f32 %v1563_v63, %v906_v30 }
  0xe8   :  { %v505_v33 = vpop.f32.mrf.mxu2 }
  0xe9   :  { %v958_v34 = vadd.f32 %v942_v45, %v926_v31  ;;  %v535_v35 = vadd.f32 %v505_v33, %v336_v32  ;;  %v691_v36 = vpop.f32.mrf.mxu3 }
  0xea   :  { %v338_v37 = vpop.f32.mrf.mxu1 }
  0xeb   :  { %vm974_vm8 = vcmp.ge.f32.partialorder %v958_v34, 0.0  ;;  %v990_v38 = vmul.f32 0.1, %v958_v34  ;;  %v721_v39 = vadd.f32 %v691_v36, %v535_v35  ;;  %v339_v47 = vadd.f32 %v338_v37, %v1534_v21  ;;  %v944_v21 = vld [vmem:[%s1708_s3 + $0x40] sm:$0xff]  ;;  %v947_v36 = vld [vmem:[%s1708_s3 + $0x58] sm:$0xff] }
  0xec   :  { %v880_v40 = vpop.f32.mrf.mxu0 }
  0xed   :  { %v1006_v43 = vsel %vm974_vm8, %v958_v34, %v990_v38  ;;  %v907_v44 = vadd.f32 %v877_v28, %v721_v39 }
  0xee   :  { %1023 = vst.msk [vmem:[%s1709_s4 + $0x30] sm:$0xff] %vm1016_vm2, %v1006_v43 }
  0xef   :  { %v927_v46 = vadd.f32 %v1563_v63, %v907_v44 }
  0xf0   :  { %v508_v48 = vpop.f32.mrf.mxu2 }
  0xf1   :  { %v959_v52 = vadd.f32 %v943_v51, %v927_v46  ;;  %v536_v55 = vadd.f32 %v508_v48, %v339_v47  ;;  %v694_v56 = vpop.f32.mrf.mxu3 }
  0xf2   :  { %v340_v57 = vpop.f32.mrf.mxu1 }
  0xf3   :  { %vm975_vm9 = vcmp.ge.f32.partialorder %v959_v52, 0.0  ;;  %v991_v58 = vmul.f32 0.1, %v959_v52  ;;  %v722_v59 = vadd.f32 %v694_v56, %v536_v55  ;;  %v341_v1 = vadd.f32 %v340_v57, %v1540_v41  ;;  %v945_v41 = vld [vmem:[%s1708_s3 + $0x48] sm:$0xff]  ;;  %v948_v55 = vld [vmem:[%s1708_s3 + $0x60] sm:$0xff] }
  0xf4   :  { %v882_v60 = vpop.f32.mrf.mxu0 }
  0xf5   :  { %v1007_v61 = vsel %vm975_vm9, %v959_v52, %v991_v58  ;;  %v908_v62 = vadd.f32 %v880_v40, %v722_v59 }
  0xf6   :  { %1024 = vst.msk [vmem:[%s1709_s4 + $0x38] sm:$0xff] %vm1016_vm2, %v1007_v61 }
  0xf7   :  { %v928_v0 = vadd.f32 %v1563_v63, %v908_v62 }
  0xf8   :  { %v510_v2 = vpop.f32.mrf.mxu2 }
  0xf9   :  { %v960_v9 = vadd.f32 %v944_v21, %v928_v0  ;;  %v537_v3 = vadd.f32 %v510_v2, %v341_v1  ;;  %v696_v4 = vpop.f32.mrf.mxu3 }
  0xfa   :  { %v343_v5 = vpop.f32.mrf.mxu1 }
  0xfb   :  { %vm976_vm10 = vcmp.ge.f32.partialorder %v960_v9, 0.0  ;;  %v992_v6 = vmul.f32 0.1, %v960_v9  ;;  %v723_v7 = vadd.f32 %v696_v4, %v537_v3  ;;  %v344_v13 = vadd.f32 %v343_v5, %v1550_v49  ;;  %v946_v49 = vld [vmem:[%s1708_s3 + $0x50] sm:$0xff] }
  0xfc   :  { %v885_v8 = vpop.f32.mrf.mxu0 }
  0xfd   :  { %v1008_v10 = vsel %vm976_vm10, %v960_v9, %v992_v6  ;;  %v909_v11 = vadd.f32 %v882_v60, %v723_v7 }
  0xfe   :  { %1025 = vst.msk [vmem:[%s1709_s4 + $0x40] sm:$0xff] %vm1016_vm2, %v1008_v10 }
  0xff   :  { %v929_v12 = vadd.f32 %v1563_v63, %v909_v11 }
 0x100   :  { %v513_v14 = vpop.f32.mrf.mxu2 }
 0x101   :  { %v961_v15 = vadd.f32 %v945_v41, %v929_v12  ;;  %v538_v27 = vadd.f32 %v513_v14, %v344_v13  ;;  %v699_v16 = vpop.f32.mrf.mxu3 }
 0x102   :  { %v345_v17 = vpop.f32.mrf.mxu1 }
 0x103   :  { %vm977_vm11 = vcmp.ge.f32.partialorder %v961_v15, 0.0  ;;  %v993_v18 = vmul.f32 0.1, %v961_v15  ;;  %v724_v19 = vadd.f32 %v699_v16, %v538_v27  ;;  %v346_v26 = vadd.f32 %v345_v17, %v1556_v53 }
 0x104   :  { %v887_v20 = vpop.f32.mrf.mxu0 }
 0x105   :  { %v1009_v23 = vsel %vm977_vm11, %v961_v15, %v993_v18  ;;  %v910_v24 = vadd.f32 %v885_v8, %v724_v19 }
 0x106   :  { %1026 = vst.msk [vmem:[%s1709_s4 + $0x48] sm:$0xff] %vm1016_vm2, %v1009_v23 }
 0x107   :  { %v930_v25 = vadd.f32 %v1563_v63, %v910_v24 }
 0x108   :  { %v515_v28 = vpop.f32.mrf.mxu2 }
 0x109   :  { %v962_v29 = vadd.f32 %v946_v49, %v930_v25  ;;  %v539_v30 = vadd.f32 %v515_v28, %v346_v26  ;;  %v701_v45 = vpop.f32.mrf.mxu3  ;;  %v951_v25 = vld [vmem:[%s1708_s3 + $0x78] sm:$0xff] }
 0x10a   :  { %v348_v31 = vpop.f32.mrf.mxu1 }
 0x10b   :  { %vm978_vm12 = vcmp.ge.f32.partialorder %v962_v29, 0.0  ;;  %v994_v32 = vmul.f32 0.1, %v962_v29  ;;  %v725_v33 = vadd.f32 %v701_v45, %v539_v30  ;;  %v349_v38 = vadd.f32 %v348_v31, %v1536_v22 }
 0x10c   :  { %v890_v53 = vpop.f32.mrf.mxu0 }
 0x10d   :  { %v1010_v34 = vsel %vm978_vm12, %v962_v29, %v994_v32  ;;  %v911_v35 = vadd.f32 %v887_v20, %v725_v33 }
 0x10e   :  { %1027 = vst.msk [vmem:[%s1709_s4 + $0x50] sm:$0xff] %vm1016_vm2, %v1010_v34 }
 0x10f   :  { %v931_v37 = vadd.f32 %v1563_v63, %v911_v35 }
 0x110   :  { %v518_v39 = vpop.f32.mrf.mxu2 }
 0x111   :  { %v963_v40 = vadd.f32 %v947_v36, %v931_v37  ;;  %v540_v43 = vadd.f32 %v518_v39, %v349_v38  ;;  %v704_v44 = vpop.f32.mrf.mxu3 }
 0x112   :  { %v350_v51 = vpop.f32.mrf.mxu1 }
 0x113   :  { %vm979_vm13 = vcmp.ge.f32.partialorder %v963_v40, 0.0  ;;  %v995_v46 = vmul.f32 0.1, %v963_v40  ;;  %v726_v47 = vadd.f32 %v704_v44, %v540_v43  ;;  %v351_v56 = vadd.f32 %v350_v51, %v1542_v42  ;;  %v949_v42 = vld [vmem:[%s1708_s3 + $0x68] sm:$0xff] }
 0x114   :  { %v892_v57 = vpop.f32.mrf.mxu0 }
 0x115   :  { %v1011_v48 = vsel %vm979_vm13, %v963_v40, %v995_v46  ;;  %v912_v52 = vadd.f32 %v890_v53, %v726_v47 }
 0x116   :  { %1028 = vst.msk [vmem:[%s1709_s4 + $0x58] sm:$0xff] %vm1016_vm2, %v1011_v48 }
 0x117   :  { %v932_v22 = vadd.f32 %v1563_v63, %v912_v52 }
 0x118   :  { %v520_v58 = vpop.f32.mrf.mxu2 }
 0x119   :  { %v964_v59 = vadd.f32 %v948_v55, %v932_v22  ;;  %v541_v60 = vadd.f32 %v520_v58, %v351_v56  ;;  %v706_v61 = vpop.f32.mrf.mxu3 }
 0x11a   :  { %v353_v62 = vpop.f32.mrf.mxu1 }
 0x11b   :  { %vm980_vm14 = vcmp.ge.f32.partialorder %v964_v59, 0.0  ;;  %v996_v21 = vmul.f32 0.1, %v964_v59  ;;  %v727_v0 = vadd.f32 %v706_v61, %v541_v60  ;;  %v354_v3 = vadd.f32 %v353_v62, %v1552_v50  ;;  %v950_v50 = vld [vmem:[%s1708_s3 + $0x70] sm:$0xff] }
 0x11c   :  { %v895_v8 = vpop.f32.mrf.mxu0 }
 0x11d   :  { %v1012_v1 = vsel %vm980_vm14, %v964_v59, %v996_v21  ;;  %v913_v2 = vadd.f32 %v892_v57, %v727_v0 }
 0x11e   :  { %1029 = vst.msk [vmem:[%s1709_s4 + $0x60] sm:$0xff] %vm1016_vm2, %v1012_v1 }
 0x11f   :  { %v933_v9 = vadd.f32 %v1563_v63, %v913_v2 }
 0x120   :  { %v523_v4 = vpop.f32.mrf.mxu2 }
 0x121   :  { %v965_v5 = vadd.f32 %v949_v42, %v933_v9  ;;  %v542_v6 = vadd.f32 %v523_v4, %v354_v3  ;;  %v709_v7 = vpop.f32.mrf.mxu3 }
 0x122   :  { %v355_v41 = vpop.f32.mrf.mxu1 }
 0x123   :  { %vm981_vm15 = vcmp.ge.f32.partialorder %v965_v5, 0.0  ;;  %v997_v10 = vmul.f32 0.1, %v965_v5  ;;  %v728_v11 = vadd.f32 %v709_v7, %v542_v6  ;;  %v356_v15 = vadd.f32 %v355_v41, %v1558_v54 }
 0x124   :  { %v897_v23 = vpop.f32.mrf.mxu0 }
 0x125   :  { %v1013_v12 = vsel %vm981_vm15, %v965_v5, %v997_v10  ;;  %v914_v13 = vadd.f32 %v895_v8, %v728_v11 }
 0x126   :  { %1030 = vst.msk [vmem:[%s1709_s4 + $0x68] sm:$0xff] %vm1016_vm2, %v1013_v12 }
 0x127   :  { %v934_v14 = vadd.f32 %v1563_v63, %v914_v13 }
 0x128   :  { %v525_v27 = vpop.f32.mrf.mxu2 }
 0x129   :  { %v966_v16 = vadd.f32 %v950_v50, %v934_v14  ;;  %v543_v17 = vadd.f32 %v525_v27, %v356_v15  ;;  %v711_v18 = vpop.f32.mrf.mxu3 }
 0x12b   :  { %vm982_vm0 = vcmp.ge.f32.partialorder %v966_v16, 0.0  ;;  %v998_v19 = vmul.f32 0.1, %v966_v16  ;;  %v729_v20 = vadd.f32 %v711_v18, %v543_v17 }
 0x12d   :  { %v1014_v24 = vsel %vm982_vm0, %v966_v16, %v998_v19  ;;  %v915_v49 = vadd.f32 %v897_v23, %v729_v20 }
 0x12e   :  { %1031 = vst.msk [vmem:[%s1709_s4 + $0x70] sm:$0xff] %vm1016_vm2, %v1014_v24 }
 0x12f   :  { %v935_v54 = vadd.f32 %v1563_v63, %v915_v49 }
 0x131   :  { %v967_v26 = vadd.f32 %v951_v25, %v935_v54 }
 0x133   :  { %vm983_vm1 = vcmp.ge.f32.partialorder %v967_v26, 0.0  ;;  %v999_v28 = vmul.f32 0.1, %v967_v26 }
 0x135   :  { %v1015_v29 = vsel %vm983_vm1, %v967_v26, %v999_v28 }
 0x136   :  { %1032 = vst.msk [vmem:[%s1709_s4 + $0x78] sm:$0xff] %vm1016_vm2, %v1015_v29 }

// kernel: _lambda_.19
= control target key start
LH: loop header
LB: loop body
LE: loop exit
PB: predicated region body
PF: predicated region fallthrough
CT: control target
= control target key end

     0   :  { %s572_s15 = smov 0   ;;  %s630_s0 = inlined_call_operand.vmem [shape: f32[3,4,16,16], index: 0, kind: input, shape index: {}]   ;;  %s631_s1 = inlined_call_operand.vmem [shape: bf16[3,16,16], index: 1, kind: input, shape index: {}]   ;;  %s632_s2 = inlined_call_operand.vmem [shape: f32[1,16], index: 2, kind: input, shape index: {}]   ;;  %s633_s3 = inlined_call_operand.vmem [shape: f32[3,2,16,16], index: 3, kind: input, shape index: {}]   ;;  %s634_s4 = inlined_call_operand.vmem [shape: f32[3,2,16,16], index: 4, kind: output, shape index: {}]  }
   0x1 LB: > { %s480_s16 = sadd.s32 4294967295, %s545_s15   ;;  %p484_p0 = scmp.ge.s32.totalorder %s545_s15, 1  ;;  %s545_s15 = sphi %s572_s15, %s14_s15  }
   0x2   : > { %p172_p1 = scmp.lt.s32.totalorder %s545_s15, 4 }
   0x4   : > { %p173_p2 = pnand %p484_p0, %p172_p1 }
   0x5   : > { %p203_p3 = scmp.lt.s32.totalorder (!%p173_p2), %s480_s16, 2 }
   0x6   : > { %176 = sbr.rel (%p173_p2) target bundleno = 189 (0xbd), region = 36 }
   0xb   : > { %v527_v0 = vld [vmem:[%s631_s1 + $0x8] sm:$0xff]  ;;  %v526_v1 = vld [vmem:[%s631_s1] sm:$0xff]  ;;  %v528_v2 = vld [vmem:[%s631_s1 + $0x10] sm:$0xff]  ;;  %s636_s16 = smov (!%p203_p3, %s480_s16), 2  ;;  %vm257_vm0 = vcmask 130048  }
   0xc   : > { %271 = vmatpush.bf16.msra.mxu0 %v527_v0  ;;  %312 = vmatpush.bf16.msra.mxu1 %v526_v1  ;;  %s523_s23 = sshll.u32 %s636_s16, 6  ;;  %s524_s27 = sshll.u32 %s636_s16, 5  ;;  %v538_v34 = vld [vmem:[%s632_s2] ss:$0 sm:$0xff] }
   0xd   : > { %365 = vmatpush.bf16.msra.mxu2 %v528_v2  ;;  %529 = vmatpush.bf16.msra.mxu3 %v527_v0  ;;  %s207_s26 = scalar_lea.vmem %s630_s0, %s523_s23  ;;  %s605_s30 = scalar_lea.vmem %s633_s3, %s524_s27 }
   0xe   : > { %v491_v3 = vld [vmem:[%s207_s26 + $0x10] sm:$0xff]  ;;  %v492_v4 = vld [vmem:[%s207_s26 + $0x18] sm:$0xff]  ;;  %v219_v5 = vld [vmem:[%s207_s26] sm:$0xff]  ;;  %s614_s9 = scalar_lea.vmem %s634_s4, %s524_s27 }
   0xf   : > { %v234_v6 = vpack.c.bf16 %v491_v3, %v491_v3  ;;  %v235_v7 = vpack.c.bf16 %v492_v4, %v492_v4  ;;  %v220_v8 = vld [vmem:[%s207_s26 + $0x8] sm:$0xff]  ;;  %v223_v9 = vpack.c.bf16 %v219_v5, %v219_v5  ;;  %v509_v10 = vld [vmem:[%s207_s26 + $0x20] sm:$0xff]  ;;  %v511_v24 = vld [vmem:[%s207_s26 + $0x30] sm:$0xff] }
  0x10   : > { %v510_v11 = vld [vmem:[%s207_s26 + $0x28] sm:$0xff]  ;;  %v224_v12 = vpack.c.bf16 %v220_v8, %v220_v8  ;;  %v329_v13 = vpack.c.bf16 %v509_v10, %v509_v10  ;;  %v512_v25 = vld [vmem:[%s207_s26 + $0x38] sm:$0xff]  ;;  %v331_v26 = vpack.c.bf16 %v511_v24, %v511_v24  ;;  %v389_v37 = vld [vmem:[%s605_s30] sm:$0xff] }
  0x11   : > { %v330_v14 = vpack.c.bf16 %v510_v11, %v510_v11  ;;  %v245_v15 = vunpack.c.l.b16 %v234_v6  ;;  %v246_v16 = vunpack.c.l.b16 %v235_v7  ;;  %v287_v17 = vunpack.c.l.b16 %v223_v9  ;;  %v390_v47 = vld [vmem:[%s605_s30 + $0x8] sm:$0xff]  ;;  %v391_v57 = vld [vmem:[%s605_s30 + $0x10] sm:$0xff]  ;;  %v392_v3 = vld [vmem:[%s605_s30 + $0x18] sm:$0xff] }
  0x12   : > { %v288_v18 = vunpack.c.l.b16 %v224_v12  ;;  %v340_v19 = vunpack.c.l.b16 %v329_v13  ;;  %v332_v27 = vpack.c.bf16 %v512_v25, %v512_v25  ;;  %v342_v28 = vunpack.c.l.b16 %v331_v26 }
  0x13   : > { %v341_v20 = vunpack.c.l.b16 %v330_v14  ;;  %v249_v21 = vpack.c.b16 %v246_v16, %v245_v15 }
  0x14   : > { %v291_v22 = vpack.c.b16 %v288_v18, %v287_v17  ;;  %v343_v29 = vunpack.c.l.b16 %v332_v27 }
  0x15   : > { %v344_v23 = vpack.c.b16 %v341_v20, %v340_v19  ;;  %501 = vmatmul.msk.bf16.vlgmr.msra.gmra.mxu0 %vm257_vm0, %v249_v21 }
  0x16   : > { %507 = vmatmul.msk.bf16.vlgmr.msra.gmra.mxu1 %vm257_vm0, %v291_v22  ;;  %v345_v30 = vpack.c.b16 %v343_v29, %v342_v28 }
  0x17   : > { %519 = vmatmul.msk.bf16.vlgmr.msra.gmra.mxu2 %vm257_vm0, %v344_v23  ;;  %502 = vmatmul.msk.bf16.vlgmr.msra.gmra.mxu3 %vm257_vm0, %v344_v23 }
  0x26   : > { %508 = vmatmul.msk.bf16.gmra.mxu1 %vm257_vm0, %v249_v21 }
  0x27   : > { %520 = vmatmul.msk.bf16.gmra.mxu2 %vm257_vm0, %v345_v30 }
  0x92   : > { %v273_v31 = vpop.f32.mrf.mxu0 }
  0x93   : > { %v314_v32 = vpop.f32.mrf.mxu1 }
  0x94   : > { %v315_v33 = vadd.f32 %v314_v32, %v273_v31 }
  0x9a   : > { %v367_v35 = vpop.f32.mrf.mxu2  ;;  %v275_v40 = vpop.f32.mrf.mxu0 }
  0x9b   : > { %v377_v36 = vadd.f32 %v367_v35, %v315_v33  ;;  %v316_v38 = vpop.f32.mrf.mxu1  ;;  %v278_v50 = vpop.f32.mrf.mxu3 }
  0x9c   : > { %v317_v43 = vadd.f32 %v316_v38, %v275_v40 }
  0x9d   : > { %v385_v39 = vadd.f32 %v538_v34, %v377_v36 }
  0x9f   : > { %v393_v41 = vadd.f32 %v389_v37, %v385_v39 }
  0xa1   : > { %vm397_vm1 = vcmp.ge.f32.partialorder %v393_v41, 0.0  ;;  %v401_v42 = vmul.f32 0.1, %v393_v41 }
  0xa2   : > { %v369_v44 = vpop.f32.mrf.mxu2 }
  0xa3   : > { %v405_v45 = vsel %vm397_vm1, %v393_v41, %v401_v42  ;;  %v378_v46 = vadd.f32 %v369_v44, %v317_v43  ;;  %v319_v48 = vpop.f32.mrf.mxu1  ;;  %v280_v61 = vpop.f32.mrf.mxu3 }
  0xa4   : > { %409 = vst.msk [vmem:[%s614_s9] sm:$0xff] %vm257_vm0, %v405_v45  ;;  %v320_v52 = vadd.f32 %v319_v48, %v278_v50 }
  0xa5   : > { %v386_v49 = vadd.f32 %v538_v34, %v378_v46 }
  0xa7   : > { %v394_v51 = vadd.f32 %v390_v47, %v386_v49 }
  0xa9   : > { %vm398_vm2 = vcmp.ge.f32.partialorder %v394_v51, 0.0  ;;  %v402_v53 = vmul.f32 0.1, %v394_v51 }
  0xaa   : > { %v372_v54 = vpop.f32.mrf.mxu2 }
  0xab   : > { %v406_v55 = vsel %vm398_vm2, %v394_v51, %v402_v53  ;;  %v379_v56 = vadd.f32 %v372_v54, %v320_v52  ;;  %v321_v59 = vpop.f32.mrf.mxu1 }
  0xac   : > { %410 = vst.msk [vmem:[%s614_s9 + $0x8] sm:$0xff] %vm257_vm0, %v406_v55  ;;  %v322_v63 = vadd.f32 %v321_v59, %v280_v61 }
  0xad   : > { %v387_v58 = vadd.f32 %v538_v34, %v379_v56 }
  0xaf   : > { %v395_v60 = vadd.f32 %v391_v57, %v387_v58 }
  0xb1   : > { %vm399_vm3 = vcmp.ge.f32.partialorder %v395_v60, 0.0  ;;  %v403_v62 = vmul.f32 0.1, %v395_v60 }
  0xb2   : > { %v374_v0 = vpop.f32.mrf.mxu2 }
  0xb3   : > { %v407_v1 = vsel %vm399_vm3, %v395_v60, %v403_v62  ;;  %v380_v2 = vadd.f32 %v374_v0, %v322_v63 }
  0xb4   : > { %411 = vst.msk [vmem:[%s614_s9 + $0x10] sm:$0xff] %vm257_vm0, %v407_v1 }
  0xb5   : > { %v388_v4 = vadd.f32 %v538_v34, %v380_v2 }
  0xb7   : > { %v396_v5 = vadd.f32 %v392_v3, %v388_v4 }
  0xb9   : > { %vm400_vm4 = vcmp.ge.f32.partialorder %v396_v5, 0.0  ;;  %v404_v6 = vmul.f32 0.1, %v396_v5 }
  0xbb   : > { %v408_v7 = vsel %vm400_vm4, %v396_v5, %v404_v6 }
  0xbc   : > { %412 = vst.msk [vmem:[%s614_s9 + $0x18] sm:$0xff] %vm257_vm0, %v408_v7 }
  0xbd PF: > { %s14_s15 = sadd.s32 1, %s545_s15  }
  0xbe   : > { %p11_p4 = scmp.ge.s32.totalorder %s14_s15, 5  }
  0xc0   :  { %13 = sbr.rel (!%p11_p4) target bundleno = 1 (0x1), region = 73 }

// kernel: _lambda_.22
= control target key start
LH: loop header
LB: loop body
LE: loop exit
PB: predicated region body
PF: predicated region fallthrough
CT: control target
= control target key end

     0   :  { %vm45_vm0 = vcmask 130048   ;;  %vm103_vm1 = vcmask 261120   ;;  %s251_s1 = inlined_call_operand.vmem [shape: bf16[16,32], index: 1, kind: input, shape index: {}]   ;;  %s252_s0 = inlined_call_operand.vmem [shape: f32[96,16], index: 0, kind: input, shape index: {}]   ;;  %s253_s2 = inlined_call_operand.vmem [shape: f32[1,32], index: 2, kind: input, shape index: {}]   ;;  %s254_s3 = inlined_call_operand.vmem [shape: f32[96,32], index: 3, kind: output, shape index: {}]  }
   0x1   :  { %v130_v0 = vld [vmem:[%s251_s1] sm:$0xff]  ;;  %v17_v1 = vld [vmem:[%s252_s0 + $0x10] sm:$0xff]  ;;  %v18_v2 = vld [vmem:[%s252_s0 + $0x18] sm:$0xff] }
   0x2   :  { %v28_v3 = vpack.c.bf16 %v18_v2, %v17_v1  ;;  %v21_v4 = vld [vmem:[%s252_s0 + $0x30] sm:$0xff]  ;;  %v22_v5 = vld [vmem:[%s252_s0 + $0x38] sm:$0xff]  ;;  %131 = vmatpush.bf16.msra.mxu1 %v130_v0  ;;  %132 = vmatpush.bf16.msra.mxu2 %v130_v0  ;;  %v15_v9 = vld [vmem:[%s252_s0] sm:$0xff] }
   0x3   :  { %v25_v6 = vld [vmem:[%s252_s0 + $0x50] sm:$0xff]  ;;  %v30_v7 = vpack.c.bf16 %v22_v5, %v21_v4  ;;  %v26_v8 = vld [vmem:[%s252_s0 + $0x58] sm:$0xff]  ;;  %v16_v10 = vld [vmem:[%s252_s0 + $0x8] sm:$0xff]  ;;  %133 = vmatpush.bf16.msra.mxu3 %v130_v0  ;;  %71 = vmatpush.bf16.msra.mxu0 %v130_v0 }
   0x4   :  { %v32_v11 = vpack.c.bf16 %v26_v8, %v25_v6  ;;  %v27_v12 = vpack.c.bf16 %v16_v10, %v15_v9  ;;  %v19_v13 = vld [vmem:[%s252_s0 + $0x20] sm:$0xff]  ;;  %v20_v14 = vld [vmem:[%s252_s0 + $0x28] sm:$0xff] }
   0x5   :  { %125 = vmatmul.msk.bf16.vlgmr.msra.gmra.mxu1 %vm45_vm0, %v28_v3  ;;  %127 = vmatmul.msk.bf16.vlgmr.msra.gmra.mxu2 %vm45_vm0, %v30_v7  ;;  %v23_v15 = vld [vmem:[%s252_s0 + $0x40] sm:$0xff]  ;;  %v24_v16 = vld [vmem:[%s252_s0 + $0x48] sm:$0xff]  ;;  %v29_v17 = vpack.c.bf16 %v20_v14, %v19_v13 }
   0x6   :  { %129 = vmatmul.msk.bf16.vlgmr.msra.gmra.mxu3 %vm45_vm0, %v32_v11  ;;  %124 = vmatmul.msk.bf16.vlgmr.msra.gmra.mxu0 %vm45_vm0, %v27_v12  ;;  %v31_v18 = vpack.c.bf16 %v24_v16, %v23_v15  ;;  %v134_v19 = vld [vmem:[%s253_s2] ss:$0 sm:$0xff] }
  0x15   :  { %126 = vmatmul.msk.bf16.gmra.mxu1 %vm45_vm0, %v29_v17  ;;  %128 = vmatmul.msk.bf16.gmra.mxu2 %vm45_vm0, %v31_v18 }
  0x82   :  { %v78_v20 = vpop.f32.mrf.mxu1 }
  0x83   :  { %v79_v21 = vadd.f32 %v134_v19, %v78_v20  ;;  %v73_v22 = vpop.f32.mrf.mxu0 }
  0x84   :  { %v74_v23 = vadd.f32 %v134_v19, %v73_v22 }
  0x85   :  { %106 = vst.msk [vmem:[%s254_s3 + $0x10] sm:$0xff] %vm103_vm1, %v79_v21 }
  0x86   :  { %104 = vst.msk [vmem:[%s254_s3] sm:$0xff] %vm103_vm1, %v74_v23 }
  0x88   :  { %v88_v24 = vpop.f32.mrf.mxu2 }
  0x89   :  { %v89_v25 = vadd.f32 %v134_v19, %v88_v24  ;;  %v98_v26 = vpop.f32.mrf.mxu3 }
  0x8a   :  { %v80_v27 = vpop.f32.mrf.mxu1  ;;  %v99_v28 = vadd.f32 %v134_v19, %v98_v26 }
  0x8b   :  { %110 = vst.msk [vmem:[%s254_s3 + $0x30] sm:$0xff] %vm103_vm1, %v89_v25  ;;  %v81_v29 = vadd.f32 %v134_v19, %v80_v27  ;;  %v75_v30 = vpop.f32.mrf.mxu0 }
  0x8c   :  { %114 = vst.msk [vmem:[%s254_s3 + $0x50] sm:$0xff] %vm103_vm1, %v99_v28  ;;  %v76_v31 = vadd.f32 %v134_v19, %v75_v30 }
  0x8d   :  { %107 = vst.msk [vmem:[%s254_s3 + $0x18] sm:$0xff] %vm103_vm1, %v81_v29 }
  0x8e   :  { %105 = vst.msk [vmem:[%s254_s3 + $0x8] sm:$0xff] %vm103_vm1, %v76_v31 }
  0x90   :  { %v90_v32 = vpop.f32.mrf.mxu2 }
  0x91   :  { %v91_v33 = vadd.f32 %v134_v19, %v90_v32  ;;  %v100_v34 = vpop.f32.mrf.mxu3 }
  0x92   :  { %v83_v35 = vpop.f32.mrf.mxu1  ;;  %v101_v36 = vadd.f32 %v134_v19, %v100_v34 }
  0x93   :  { %111 = vst.msk [vmem:[%s254_s3 + $0x38] sm:$0xff] %vm103_vm1, %v91_v33  ;;  %v84_v37 = vadd.f32 %v134_v19, %v83_v35 }
  0x94   :  { %115 = vst.msk [vmem:[%s254_s3 + $0x58] sm:$0xff] %vm103_vm1, %v101_v36 }
  0x95   :  { %108 = vst.msk [vmem:[%s254_s3 + $0x20] sm:$0xff] %vm103_vm1, %v84_v37 }
  0x98   :  { %v93_v38 = vpop.f32.mrf.mxu2 }
  0x99   :  { %v94_v39 = vadd.f32 %v134_v19, %v93_v38 }
  0x9a   :  { %v85_v40 = vpop.f32.mrf.mxu1 }
  0x9b   :  { %112 = vst.msk [vmem:[%s254_s3 + $0x40] sm:$0xff] %vm103_vm1, %v94_v39  ;;  %v86_v41 = vadd.f32 %v134_v19, %v85_v40 }
  0x9d   :  { %109 = vst.msk [vmem:[%s254_s3 + $0x28] sm:$0xff] %vm103_vm1, %v86_v41 }
  0xa0   :  { %v95_v42 = vpop.f32.mrf.mxu2 }
  0xa1   :  { %v96_v43 = vadd.f32 %v134_v19, %v95_v42 }
  0xa3   :  { %113 = vst.msk [vmem:[%s254_s3 + $0x48] sm:$0xff] %vm103_vm1, %v96_v43 }

// kernel: _lambda_.24
= control target key start
LH: loop header
LB: loop body
LE: loop exit
PB: predicated region body
PF: predicated region fallthrough
CT: control target
= control target key end

     0   :  { %vm56_vm0 = vcmask 261120   ;;  %s387_s1 = inlined_call_operand.vmem [shape: bf16[32,32], index: 1, kind: input, shape index: {}]   ;;  %s388_s0 = inlined_call_operand.vmem [shape: f32[96,32], index: 0, kind: input, shape index: {}]   ;;  %s389_s2 = inlined_call_operand.vmem [shape: f32[1,32], index: 2, kind: input, shape index: {}]   ;;  %s390_s3 = inlined_call_operand.vmem [shape: f32[96,32], index: 3, kind: input, shape index: {}]   ;;  %s391_s4 = inlined_call_operand.vmem [shape: f32[96,32], index: 4, kind: output, shape index: {}]  }
   0x1   :  { %v205_v0 = vld [vmem:[%s387_s1 + $0x8] sm:$0xff]  ;;  %v204_v1 = vld [vmem:[%s387_s1] sm:$0xff]  ;;  %v20_v2 = vld [vmem:[%s388_s0 + $0x10] sm:$0xff] }
   0x2   :  { %v21_v3 = vld [vmem:[%s388_s0 + $0x18] sm:$0xff]  ;;  %206 = vmatpush.bf16.msra.mxu1 %v205_v0  ;;  %207 = vmatpush.bf16.msra.mxu2 %v205_v0  ;;  %v24_v4 = vld [vmem:[%s388_s0 + $0x30] sm:$0xff]  ;;  %v18_v8 = vld [vmem:[%s388_s0] sm:$0xff] }
   0x3   :  { %v25_v5 = vld [vmem:[%s388_s0 + $0x38] sm:$0xff]  ;;  %v28_v6 = vld [vmem:[%s388_s0 + $0x50] sm:$0xff]  ;;  %208 = vmatpush.bf16.msra.mxu3 %v205_v0  ;;  %81 = vmatpush.bf16.msra.mxu0 %v205_v0  ;;  %v19_v9 = vld [vmem:[%s388_s0 + $0x8] sm:$0xff]  ;;  %v31_v10 = vpack.c.bf16 %v21_v3, %v20_v2 }
   0x4   :  { %v29_v7 = vld [vmem:[%s388_s0 + $0x58] sm:$0xff]  ;;  %v33_v11 = vpack.c.bf16 %v25_v5, %v24_v4  ;;  %v30_v13 = vpack.c.bf16 %v19_v9, %v18_v8  ;;  %v22_v14 = vld [vmem:[%s388_s0 + $0x20] sm:$0xff]  ;;  %v23_v15 = vld [vmem:[%s388_s0 + $0x28] sm:$0xff] }
   0x5   :  { %v35_v12 = vpack.c.bf16 %v29_v7, %v28_v6  ;;  %v26_v16 = vld [vmem:[%s388_s0 + $0x40] sm:$0xff]  ;;  %v27_v17 = vld [vmem:[%s388_s0 + $0x48] sm:$0xff]  ;;  %v32_v18 = vpack.c.bf16 %v23_v15, %v22_v14  ;;  %v116_v22 = vld [vmem:[%s390_s3 + $0x10] sm:$0xff] }
   0x6   :  { %209 = vmatpush.bf16.msra.mxu1 %v204_v1  ;;  %210 = vmatpush.bf16.msra.mxu2 %v204_v1  ;;  %v34_v19 = vpack.c.bf16 %v27_v17, %v26_v16  ;;  %v289_v20 = vld [vmem:[%s389_s2] ss:$0 sm:$0xff]  ;;  %v120_v31 = vld [vmem:[%s390_s3 + $0x30] sm:$0xff]  ;;  %v117_v38 = vld [vmem:[%s390_s3 + $0x18] sm:$0xff] }
   0x7   :  { %211 = vmatpush.bf16.msra.mxu3 %v204_v1  ;;  %82 = vmatpush.bf16.msra.mxu0 %v204_v1  ;;  %v114_v25 = vld [vmem:[%s390_s3] sm:$0xff]  ;;  %v124_v36 = vld [vmem:[%s390_s3 + $0x50] sm:$0xff]  ;;  %v115_v44 = vld [vmem:[%s390_s3 + $0x8] sm:$0xff] }
   0x8   :  { %v121_v55 = vld [vmem:[%s390_s3 + $0x38] sm:$0xff]  ;;  %v118_v62 = vld [vmem:[%s390_s3 + $0x20] sm:$0xff]  ;;  %v119_v15 = vld [vmem:[%s390_s3 + $0x28] sm:$0xff] }
   0x9   :  { %199 = vmatmul.msk.bf16.vlgmr.msra.gmra.mxu1 %vm56_vm0, %v31_v10  ;;  %201 = vmatmul.msk.bf16.vlgmr.msra.gmra.mxu2 %vm56_vm0, %v33_v11  ;;  %v125_v60 = vld [vmem:[%s390_s3 + $0x58] sm:$0xff]  ;;  %v122_v11 = vld [vmem:[%s390_s3 + $0x40] sm:$0xff] }
   0xa   :  { %203 = vmatmul.msk.bf16.vlgmr.msra.gmra.mxu3 %vm56_vm0, %v35_v12  ;;  %198 = vmatmul.msk.bf16.vlgmr.msra.gmra.mxu0 %vm56_vm0, %v30_v13 }
  0x19   :  { %200 = vmatmul.msk.bf16.gmra.mxu1 %vm56_vm0, %v32_v18  ;;  %202 = vmatmul.msk.bf16.gmra.mxu2 %vm56_vm0, %v34_v19 }
  0x86   :  { %v89_v21 = vpop.f32.mrf.mxu1 }
  0x87   :  { %v90_v23 = vadd.f32 %v289_v20, %v89_v21  ;;  %v84_v24 = vpop.f32.mrf.mxu0 }
  0x88   :  { %v85_v26 = vadd.f32 %v289_v20, %v84_v24  ;;  %v123_v24 = vld [vmem:[%s390_s3 + $0x48] sm:$0xff] }
  0x89   :  { %v128_v27 = vadd.f32 %v116_v22, %v90_v23 }
  0x8a   :  { %v126_v28 = vadd.f32 %v114_v25, %v85_v26 }
  0x8b   :  { %vm140_vm1 = vcmp.ge.f32.partialorder %v128_v27, 0.0  ;;  %v152_v29 = vmul.f32 0.1, %v128_v27 }
  0x8c   :  { %v99_v30 = vpop.f32.mrf.mxu2  ;;  %vm138_vm2 = vcmp.ge.f32.partialorder %v126_v28, 0.0  ;;  %v150_v32 = vmul.f32 0.1, %v126_v28 }
  0x8d   :  { %v164_v33 = vsel %vm140_vm1, %v128_v27, %v152_v29  ;;  %v100_v34 = vadd.f32 %v289_v20, %v99_v30  ;;  %v109_v35 = vpop.f32.mrf.mxu3 }
  0x8e   :  { %176 = vst.msk [vmem:[%s391_s4 + $0x10] sm:$0xff] %vm56_vm0, %v164_v33  ;;  %v91_v37 = vpop.f32.mrf.mxu1  ;;  %v162_v39 = vsel %vm138_vm2, %v126_v28, %v150_v32  ;;  %v110_v40 = vadd.f32 %v289_v20, %v109_v35 }
  0x8f   :  { %v132_v41 = vadd.f32 %v120_v31, %v100_v34  ;;  %v92_v42 = vadd.f32 %v289_v20, %v91_v37  ;;  %174 = vst.msk [vmem:[%s391_s4] sm:$0xff] %vm56_vm0, %v162_v39  ;;  %v86_v43 = vpop.f32.mrf.mxu0 }
  0x90   :  { %v136_v45 = vadd.f32 %v124_v36, %v110_v40  ;;  %v87_v46 = vadd.f32 %v289_v20, %v86_v43 }
  0x91   :  { %vm144_vm3 = vcmp.ge.f32.partialorder %v132_v41, 0.0  ;;  %v156_v47 = vmul.f32 0.1, %v132_v41  ;;  %v129_v48 = vadd.f32 %v117_v38, %v92_v42 }
  0x92   :  { %vm148_vm4 = vcmp.ge.f32.partialorder %v136_v45, 0.0  ;;  %v160_v49 = vmul.f32 0.1, %v136_v45  ;;  %v127_v50 = vadd.f32 %v115_v44, %v87_v46 }
  0x93   :  { %v168_v51 = vsel %vm144_vm3, %v132_v41, %v156_v47  ;;  %vm141_vm5 = vcmp.ge.f32.partialorder %v129_v48, 0.0  ;;  %v153_v52 = vmul.f32 0.1, %v129_v48 }
  0x94   :  { %180 = vst.msk [vmem:[%s391_s4 + $0x30] sm:$0xff] %vm56_vm0, %v168_v51  ;;  %v172_v53 = vsel %vm148_vm4, %v136_v45, %v160_v49  ;;  %v101_v54 = vpop.f32.mrf.mxu2  ;;  %vm139_vm6 = vcmp.ge.f32.partialorder %v127_v50, 0.0  ;;  %v151_v56 = vmul.f32 0.1, %v127_v50 }
  0x95   :  { %v165_v57 = vsel %vm141_vm5, %v129_v48, %v153_v52  ;;  %184 = vst.msk [vmem:[%s391_s4 + $0x50] sm:$0xff] %vm56_vm0, %v172_v53  ;;  %v102_v58 = vadd.f32 %v289_v20, %v101_v54  ;;  %v111_v59 = vpop.f32.mrf.mxu3 }
  0x96   :  { %177 = vst.msk [vmem:[%s391_s4 + $0x18] sm:$0xff] %vm56_vm0, %v165_v57  ;;  %v94_v61 = vpop.f32.mrf.mxu1  ;;  %v163_v63 = vsel %vm139_vm6, %v127_v50, %v151_v56  ;;  %v112_v0 = vadd.f32 %v289_v20, %v111_v59 }
  0x97   :  { %v133_v1 = vadd.f32 %v121_v55, %v102_v58  ;;  %v95_v2 = vadd.f32 %v289_v20, %v94_v61  ;;  %175 = vst.msk [vmem:[%s391_s4 + $0x8] sm:$0xff] %vm56_vm0, %v163_v63 }
  0x98   :  { %v137_v3 = vadd.f32 %v125_v60, %v112_v0 }
  0x99   :  { %vm145_vm7 = vcmp.ge.f32.partialorder %v133_v1, 0.0  ;;  %v157_v4 = vmul.f32 0.1, %v133_v1  ;;  %v130_v5 = vadd.f32 %v118_v62, %v95_v2 }
  0x9a   :  { %vm149_vm8 = vcmp.ge.f32.partialorder %v137_v3, 0.0  ;;  %v161_v6 = vmul.f32 0.1, %v137_v3 }
  0x9b   :  { %v169_v7 = vsel %vm145_vm7, %v133_v1, %v157_v4  ;;  %vm142_vm9 = vcmp.ge.f32.partialorder %v130_v5, 0.0  ;;  %v154_v8 = vmul.f32 0.1, %v130_v5 }
  0x9c   :  { %181 = vst.msk [vmem:[%s391_s4 + $0x38] sm:$0xff] %vm56_vm0, %v169_v7  ;;  %v173_v9 = vsel %vm149_vm8, %v137_v3, %v161_v6  ;;  %v104_v10 = vpop.f32.mrf.mxu2 }
  0x9d   :  { %v166_v12 = vsel %vm142_vm9, %v130_v5, %v154_v8  ;;  %185 = vst.msk [vmem:[%s391_s4 + $0x58] sm:$0xff] %vm56_vm0, %v173_v9  ;;  %v105_v13 = vadd.f32 %v289_v20, %v104_v10 }
  0x9e   :  { %178 = vst.msk [vmem:[%s391_s4 + $0x20] sm:$0xff] %vm56_vm0, %v166_v12  ;;  %v96_v14 = vpop.f32.mrf.mxu1 }
  0x9f   :  { %v134_v16 = vadd.f32 %v122_v11, %v105_v13  ;;  %v97_v17 = vadd.f32 %v289_v20, %v96_v14 }
  0xa1   :  { %vm146_vm10 = vcmp.ge.f32.partialorder %v134_v16, 0.0  ;;  %v158_v18 = vmul.f32 0.1, %v134_v16  ;;  %v131_v19 = vadd.f32 %v119_v15, %v97_v17 }
  0xa3   :  { %v170_v21 = vsel %vm146_vm10, %v134_v16, %v158_v18  ;;  %vm143_vm11 = vcmp.ge.f32.partialorder %v131_v19, 0.0  ;;  %v155_v22 = vmul.f32 0.1, %v131_v19 }
  0xa4   :  { %182 = vst.msk [vmem:[%s391_s4 + $0x40] sm:$0xff] %vm56_vm0, %v170_v21  ;;  %v106_v23 = vpop.f32.mrf.mxu2 }
  0xa5   :  { %v167_v25 = vsel %vm143_vm11, %v131_v19, %v155_v22  ;;  %v107_v26 = vadd.f32 %v289_v20, %v106_v23 }
  0xa6   :  { %179 = vst.msk [vmem:[%s391_s4 + $0x28] sm:$0xff] %vm56_vm0, %v167_v25 }
  0xa7   :  { %v135_v27 = vadd.f32 %v123_v24, %v107_v26 }
  0xa9   :  { %vm147_vm12 = vcmp.ge.f32.partialorder %v135_v27, 0.0  ;;  %v159_v28 = vmul.f32 0.1, %v135_v27 }
  0xab   :  { %v171_v29 = vsel %vm147_vm12, %v135_v27, %v159_v28 }
  0xac   :  { %183 = vst.msk [vmem:[%s391_s4 + $0x48] sm:$0xff] %vm56_vm0, %v171_v29 }

// kernel: _lambda_.25
= control target key start
LH: loop header
LB: loop body
LE: loop exit
PB: predicated region body
PF: predicated region fallthrough
CT: control target
= control target key end

     0   :  { %vm53_vm0 = vcmask 261120   ;;  %s269_s1 = inlined_call_operand.vmem [shape: bf16[32,32], index: 1, kind: input, shape index: {}]   ;;  %s270_s0 = inlined_call_operand.vmem [shape: f32[96,32], index: 0, kind: input, shape index: {}]   ;;  %s271_s2 = inlined_call_operand.vmem [shape: f32[1,32], index: 2, kind: input, shape index: {}]   ;;  %s272_s3 = inlined_call_operand.vmem [shape: f32[96,32], index: 3, kind: output, shape index: {}]  }
   0x1   :  { %v142_v0 = vld [vmem:[%s269_s1 + $0x8] sm:$0xff]  ;;  %v141_v1 = vld [vmem:[%s269_s1] sm:$0xff]  ;;  %v17_v2 = vld [vmem:[%s270_s0 + $0x10] sm:$0xff] }
   0x2   :  { %v18_v3 = vld [vmem:[%s270_s0 + $0x18] sm:$0xff]  ;;  %143 = vmatpush.bf16.msra.mxu1 %v142_v0  ;;  %144 = vmatpush.bf16.msra.mxu2 %v142_v0  ;;  %v21_v4 = vld [vmem:[%s270_s0 + $0x30] sm:$0xff]  ;;  %v15_v8 = vld [vmem:[%s270_s0] sm:$0xff] }
   0x3   :  { %v22_v5 = vld [vmem:[%s270_s0 + $0x38] sm:$0xff]  ;;  %v25_v6 = vld [vmem:[%s270_s0 + $0x50] sm:$0xff]  ;;  %145 = vmatpush.bf16.msra.mxu3 %v142_v0  ;;  %78 = vmatpush.bf16.msra.mxu0 %v142_v0  ;;  %v16_v9 = vld [vmem:[%s270_s0 + $0x8] sm:$0xff]  ;;  %v28_v10 = vpack.c.bf16 %v18_v3, %v17_v2 }
   0x4   :  { %v26_v7 = vld [vmem:[%s270_s0 + $0x58] sm:$0xff]  ;;  %v30_v11 = vpack.c.bf16 %v22_v5, %v21_v4  ;;  %v27_v13 = vpack.c.bf16 %v16_v9, %v15_v8  ;;  %v19_v14 = vld [vmem:[%s270_s0 + $0x20] sm:$0xff]  ;;  %v20_v15 = vld [vmem:[%s270_s0 + $0x28] sm:$0xff] }
   0x5   :  { %v32_v12 = vpack.c.bf16 %v26_v7, %v25_v6  ;;  %v23_v16 = vld [vmem:[%s270_s0 + $0x40] sm:$0xff]  ;;  %v24_v17 = vld [vmem:[%s270_s0 + $0x48] sm:$0xff]  ;;  %v29_v18 = vpack.c.bf16 %v20_v15, %v19_v14 }
   0x6   :  { %146 = vmatpush.bf16.msra.mxu1 %v141_v1  ;;  %147 = vmatpush.bf16.msra.mxu2 %v141_v1  ;;  %v31_v19 = vpack.c.bf16 %v24_v17, %v23_v16  ;;  %v149_v20 = vld [vmem:[%s271_s2] ss:$0 sm:$0xff] }
   0x7   :  { %148 = vmatpush.bf16.msra.mxu3 %v141_v1  ;;  %79 = vmatpush.bf16.msra.mxu0 %v141_v1 }
   0x9   :  { %136 = vmatmul.msk.bf16.vlgmr.msra.gmra.mxu1 %vm53_vm0, %v28_v10  ;;  %138 = vmatmul.msk.bf16.vlgmr.msra.gmra.mxu2 %vm53_vm0, %v30_v11 }
   0xa   :  { %140 = vmatmul.msk.bf16.vlgmr.msra.gmra.mxu3 %vm53_vm0, %v32_v12  ;;  %135 = vmatmul.msk.bf16.vlgmr.msra.gmra.mxu0 %vm53_vm0, %v27_v13 }
  0x19   :  { %137 = vmatmul.msk.bf16.gmra.mxu1 %vm53_vm0, %v29_v18  ;;  %139 = vmatmul.msk.bf16.gmra.mxu2 %vm53_vm0, %v31_v19 }
  0x86   :  { %v86_v21 = vpop.f32.mrf.mxu1 }
  0x87   :  { %v87_v22 = vadd.f32 %v149_v20, %v86_v21  ;;  %v81_v23 = vpop.f32.mrf.mxu0 }
  0x88   :  { %v82_v24 = vadd.f32 %v149_v20, %v81_v23 }
  0x89   :  { %113 = vst.msk [vmem:[%s272_s3 + $0x10] sm:$0xff] %vm53_vm0, %v87_v22 }
  0x8a   :  { %111 = vst.msk [vmem:[%s272_s3] sm:$0xff] %vm53_vm0, %v82_v24 }
  0x8c   :  { %v96_v25 = vpop.f32.mrf.mxu2 }
  0x8d   :  { %v97_v26 = vadd.f32 %v149_v20, %v96_v25  ;;  %v106_v27 = vpop.f32.mrf.mxu3 }
  0x8e   :  { %v88_v28 = vpop.f32.mrf.mxu1  ;;  %v107_v29 = vadd.f32 %v149_v20, %v106_v27 }
  0x8f   :  { %117 = vst.msk [vmem:[%s272_s3 + $0x30] sm:$0xff] %vm53_vm0, %v97_v26  ;;  %v89_v30 = vadd.f32 %v149_v20, %v88_v28  ;;  %v83_v31 = vpop.f32.mrf.mxu0 }
  0x90   :  { %121 = vst.msk [vmem:[%s272_s3 + $0x50] sm:$0xff] %vm53_vm0, %v107_v29  ;;  %v84_v32 = vadd.f32 %v149_v20, %v83_v31 }
  0x91   :  { %114 = vst.msk [vmem:[%s272_s3 + $0x18] sm:$0xff] %vm53_vm0, %v89_v30 }
  0x92   :  { %112 = vst.msk [vmem:[%s272_s3 + $0x8] sm:$0xff] %vm53_vm0, %v84_v32 }
  0x94   :  { %v98_v33 = vpop.f32.mrf.mxu2 }
  0x95   :  { %v99_v34 = vadd.f32 %v149_v20, %v98_v33  ;;  %v108_v35 = vpop.f32.mrf.mxu3 }
  0x96   :  { %v91_v36 = vpop.f32.mrf.mxu1  ;;  %v109_v37 = vadd.f32 %v149_v20, %v108_v35 }
  0x97   :  { %118 = vst.msk [vmem:[%s272_s3 + $0x38] sm:$0xff] %vm53_vm0, %v99_v34  ;;  %v92_v38 = vadd.f32 %v149_v20, %v91_v36 }
  0x98   :  { %122 = vst.msk [vmem:[%s272_s3 + $0x58] sm:$0xff] %vm53_vm0, %v109_v37 }
  0x99   :  { %115 = vst.msk [vmem:[%s272_s3 + $0x20] sm:$0xff] %vm53_vm0, %v92_v38 }
  0x9c   :  { %v101_v39 = vpop.f32.mrf.mxu2 }
  0x9d   :  { %v102_v40 = vadd.f32 %v149_v20, %v101_v39 }
  0x9e   :  { %v93_v41 = vpop.f32.mrf.mxu1 }
  0x9f   :  { %119 = vst.msk [vmem:[%s272_s3 + $0x40] sm:$0xff] %vm53_vm0, %v102_v40  ;;  %v94_v42 = vadd.f32 %v149_v20, %v93_v41 }
  0xa1   :  { %116 = vst.msk [vmem:[%s272_s3 + $0x28] sm:$0xff] %vm53_vm0, %v94_v42 }
  0xa4   :  { %v103_v43 = vpop.f32.mrf.mxu2 }
  0xa5   :  { %v104_v44 = vadd.f32 %v149_v20, %v103_v43 }
  0xa7   :  { %120 = vst.msk [vmem:[%s272_s3 + $0x48] sm:$0xff] %vm53_vm0, %v104_v44 }

// kernel: _lambda_.23
= control target key start
LH: loop header
LB: loop body
LE: loop exit
PB: predicated region body
PF: predicated region fallthrough
CT: control target
= control target key end

     0   :  { %vm153_vm0 = vcmask 392192   ;;  %vm1016_vm2 = vcmask 261120   ;;  %s1705_s1 = inlined_call_operand.vmem [shape: bf16[5,48,32], index: 1, kind: input, shape index: {}]   ;;  %s1706_s0 = inlined_call_operand.vmem [shape: f32[8,20,48], index: 0, kind: input, shape index: {}]   ;;  %s1707_s2 = inlined_call_operand.vmem [shape: f32[1,32], index: 2, kind: input, shape index: {}]   ;;  %s1708_s3 = inlined_call_operand.vmem [shape: f32[8,16,32], index: 3, kind: input, shape index: {}]   ;;  %s1709_s4 = inlined_call_operand.vmem [shape: f32[8,16,32], index: 4, kind: output, shape index: {}]  }
   0x1   :  { %v1166_v0 = vld [vmem:[%s1705_s1 + $0x28] sm:$0xff]  ;;  %v1165_v1 = vld [vmem:[%s1705_s1 + $0x20] sm:$0xff]  ;;  %v60_v2 = vld [vmem:[%s1706_s0 + $0x31] sm:$0xff] }
   0x2   :  { %v61_v3 = vld [vmem:[%s1706_s0 + $0x39] sm:$0xff]  ;;  %v64_v4 = vld [vmem:[%s1706_s0 + $0x61] sm:$0xff]  ;;  %1176 = vmatpush.bf16.msra.mxu1 %v1166_v0  ;;  %1177 = vmatpush.bf16.msra.mxu2 %v1166_v0  ;;  %v76_v5 = vpack.c.bf16 %v60_v2, %v60_v2  ;;  %v65_v7 = vld [vmem:[%s1706_s0 + $0x69] sm:$0xff] }
   0x3   :  { %v77_v6 = vpack.c.bf16 %v61_v3, %v61_v3  ;;  %v80_v8 = vpack.c.bf16 %v64_v4, %v64_v4  ;;  %v68_v9 = vld [vmem:[%s1706_s0 + $0x91] sm:$0xff]  ;;  %v69_v10 = vld [vmem:[%s1706_s0 + $0x99] sm:$0xff]  ;;  %1178 = vmatpush.bf16.msra.mxu3 %v1166_v0  ;;  %183 = vmatpush.bf16.msra.mxu0 %v1166_v0  ;;  %v81_v11 = vpack.c.bf16 %v65_v7, %v65_v7  ;;  %v56_v14 = vld [vmem:[%s1706_s0 + $0x1] sm:$0xff] }
   0x4   :  { %v84_v12 = vpack.c.bf16 %v68_v9, %v68_v9  ;;  %v85_v13 = vpack.c.bf16 %v69_v10, %v69_v10  ;;  %v57_v15 = vld [vmem:[%s1706_s0 + $0x9] sm:$0xff]  ;;  %v115_v16 = vunpack.c.l.b16 %v76_v5  ;;  %v72_v17 = vpack.c.bf16 %v56_v14, %v56_v14  ;;  %v1164_v22 = vld [vmem:[%s1705_s1 + $0x18] sm:$0xff]  ;;  %v1169_v27 = vld [vmem:[%s1705_s1 + $0x40] sm:$0xff] }
   0x5   :  { %v116_v18 = vunpack.c.l.b16 %v77_v6  ;;  %v119_v19 = vunpack.c.l.b16 %v80_v8  ;;  %v120_v20 = vunpack.c.l.b16 %v81_v11  ;;  %v73_v21 = vpack.c.bf16 %v57_v15, %v57_v15  ;;  %v1172_v28 = vld [vmem:[%s1705_s1 + $0x58] sm:$0xff]  ;;  %v1163_v33 = vld [vmem:[%s1705_s1 + $0x10] sm:$0xff]  ;;  %v1162_v37 = vld [vmem:[%s1705_s1 + $0x8] sm:$0xff] }
   0x6   :  { %1179 = vmatpush.bf16.msra.mxu1 %v1165_v1  ;;  %1180 = vmatpush.bf16.msra.mxu2 %v1165_v1  ;;  %v123_v23 = vunpack.c.l.b16 %v84_v12  ;;  %v124_v24 = vunpack.c.l.b16 %v85_v13  ;;  %v111_v25 = vunpack.c.l.b16 %v72_v17  ;;  %v1175_v34 = vld [vmem:[%s1705_s1 + $0x70] sm:$0xff]  ;;  %v1168_v35 = vld [vmem:[%s1705_s1 + $0x38] sm:$0xff]  ;;  %v67_v41 = vld [vmem:[%s1706_s0 + $0x81] sm:$0xff] }
   0x7   :  { %1181 = vmatpush.bf16.msra.mxu3 %v1165_v1  ;;  %184 = vmatpush.bf16.msra.mxu0 %v1165_v1  ;;  %v112_v26 = vunpack.c.l.b16 %v73_v21  ;;  %v129_v29 = vpack.c.b16 %v116_v18, %v115_v16  ;;  %v131_v30 = vpack.c.b16 %v120_v20, %v119_v19  ;;  %v1171_v36 = vld [vmem:[%s1705_s1 + $0x50] sm:$0xff]  ;;  %v66_v40 = vld [vmem:[%s1706_s0 + $0x79] sm:$0xff]  ;;  %v59_v45 = vld [vmem:[%s1706_s0 + $0x21] sm:$0xff]  ;;  %v83_v52 = vpack.c.bf16 %v67_v41, %v67_v41 }
   0x8   :  { %v133_v31 = vpack.c.b16 %v124_v24, %v123_v23  ;;  %v62_v38 = vld [vmem:[%s1706_s0 + $0x49] sm:$0xff]  ;;  %v63_v39 = vld [vmem:[%s1706_s0 + $0x51] sm:$0xff]  ;;  %v58_v44 = vld [vmem:[%s1706_s0 + $0x19] sm:$0xff]  ;;  %v82_v51 = vpack.c.bf16 %v66_v40, %v66_v40  ;;  %v75_v56 = vpack.c.bf16 %v59_v45, %v59_v45 }
   0x9   :  { %v127_v32 = vpack.c.b16 %v112_v26, %v111_v25  ;;  %v70_v42 = vld [vmem:[%s1706_s0 + $0xa9] sm:$0xff]  ;;  %v71_v43 = vld [vmem:[%s1706_s0 + $0xb1] sm:$0xff]  ;;  %v78_v49 = vpack.c.bf16 %v62_v38, %v62_v38  ;;  %v79_v50 = vpack.c.bf16 %v63_v39, %v63_v39  ;;  %v74_v55 = vpack.c.bf16 %v58_v44, %v58_v44  ;;  %v1161_v57 = vld [vmem:[%s1705_s1] sm:$0xff] }
   0xa   :  { %1182 = vmatpush.bf16.msra.mxu1 %v1164_v22  ;;  %1183 = vmatpush.bf16.msra.mxu2 %v1164_v22  ;;  %v1174_v46 = vld [vmem:[%s1705_s1 + $0x68] sm:$0xff]  ;;  %v1167_v47 = vld [vmem:[%s1705_s1 + $0x30] sm:$0xff]  ;;  %v86_v53 = vpack.c.bf16 %v70_v42, %v70_v42  ;;  %v87_v54 = vpack.c.bf16 %v71_v43, %v71_v43  ;;  %v1173_v58 = vld [vmem:[%s1705_s1 + $0x60] sm:$0xff]  ;;  %v121_v61 = vunpack.c.l.b16 %v82_v51  ;;  %v122_v62 = vunpack.c.l.b16 %v83_v52 }
   0xb   :  { %1184 = vmatpush.bf16.msra.mxu3 %v1164_v22  ;;  %185 = vmatpush.bf16.msra.mxu0 %v1164_v22  ;;  %v1170_v48 = vld [vmem:[%s1705_s1 + $0x48] sm:$0xff]  ;;  %v117_v59 = vunpack.c.l.b16 %v78_v49  ;;  %v118_v60 = vunpack.c.l.b16 %v79_v50  ;;  %v113_v1 = vunpack.c.l.b16 %v74_v55  ;;  %v114_v2 = vunpack.c.l.b16 %v75_v56  ;;  %v18_v7 = vld [vmem:[%s1706_s0] sm:$0xff] }
   0xc   :  { %v125_v63 = vunpack.c.l.b16 %v86_v53  ;;  %v126_v0 = vunpack.c.l.b16 %v87_v54  ;;  %v132_v4 = vpack.c.b16 %v122_v62, %v121_v61  ;;  %v19_v8 = vld [vmem:[%s1706_s0 + $0x8] sm:$0xff]  ;;  %v34_v15 = vpack.c.bf16 %v18_v7, %v18_v7  ;;  %v546_v39 = vld [vmem:[%s1706_s0 + $0x1b] sm:$0xff] }
   0xd   :  { %1057 = vmatmul.msk.bf16.vlgmr.msra.gmra.mxu1 %vm153_vm0, %v129_v29  ;;  %1059 = vmatmul.msk.bf16.vlgmr.msra.gmra.mxu2 %vm153_vm0, %v131_v30  ;;  %v130_v3 = vpack.c.b16 %v118_v60, %v117_v59  ;;  %v128_v6 = vpack.c.b16 %v114_v2, %v113_v1  ;;  %v358_v9 = vld [vmem:[%s1706_s0 + $0x2] sm:$0xff]  ;;  %v359_v10 = vld [vmem:[%s1706_s0 + $0xa] sm:$0xff]  ;;  %v35_v16 = vpack.c.bf16 %v19_v8, %v19_v8  ;;  %v362_v1 = vld [vmem:[%s1706_s0 + $0x32] sm:$0xff] }
   0xe   :  { %484 = vmatpush.bf16.msrb.mxu2 %v1169_v27  ;;  %1061 = vmatmul.msk.bf16.vlgmr.msra.gmra.mxu3 %vm153_vm0, %v133_v31  ;;  %v134_v5 = vpack.c.b16 %v126_v0, %v125_v63  ;;  %v544_v11 = vld [vmem:[%s1706_s0 + $0x3] sm:$0xff]  ;;  %v545_v12 = vld [vmem:[%s1706_s0 + $0xb] sm:$0xff]  ;;  %v374_v17 = vpack.c.bf16 %v358_v9, %v358_v9  ;;  %v375_v18 = vpack.c.bf16 %v359_v10, %v359_v10  ;;  %v243_v23 = vunpack.c.l.b16 %v34_v15  ;;  %v23_v0 = vld [vmem:[%s1706_s0 + $0x38] sm:$0xff] }
   0xf   :  { %670 = vmatpush.bf16.msrb.mxu3 %v1172_v28  ;;  %1055 = vmatmul.msk.bf16.vlgmr.msra.gmra.mxu0 %vm153_vm0, %v127_v32  ;;  %v730_v13 = vld [vmem:[%s1706_s0 + $0x4] sm:$0xff]  ;;  %v731_v14 = vld [vmem:[%s1706_s0 + $0xc] sm:$0xff]  ;;  %v560_v19 = vpack.c.bf16 %v544_v11, %v544_v11  ;;  %v561_v20 = vpack.c.bf16 %v545_v12, %v545_v12  ;;  %v244_v24 = vunpack.c.l.b16 %v35_v16  ;;  %v732_v41 = vld [vmem:[%s1706_s0 + $0x1c] sm:$0xff]  ;;  %v39_v8 = vpack.c.bf16 %v23_v0, %v23_v0 }
  0x10   :  { %314 = vmatpush.bf16.msrb.mxu1 %v1163_v33  ;;  %856 = vmatpush.bf16.msrb.mxu0 %v1175_v34  ;;  %v746_v21 = vpack.c.bf16 %v730_v13, %v730_v13  ;;  %v747_v22 = vpack.c.bf16 %v731_v14, %v731_v14  ;;  %v413_v25 = vunpack.c.l.b16 %v374_v17  ;;  %v414_v26 = vunpack.c.l.b16 %v375_v18  ;;  %v361_v38 = vld [vmem:[%s1706_s0 + $0x22] sm:$0xff]  ;;  %v22_v63 = vld [vmem:[%s1706_s0 + $0x30] sm:$0xff]  ;;  %v363_v2 = vld [vmem:[%s1706_s0 + $0x3a] sm:$0xff] }
  0x11   :  { %v599_v27 = vunpack.c.l.b16 %v560_v19  ;;  %v600_v28 = vunpack.c.l.b16 %v561_v20  ;;  %v259_v31 = vpack.c.b16 %v244_v24, %v243_v23  ;;  %v547_v40 = vld [vmem:[%s1706_s0 + $0x23] sm:$0xff]  ;;  %v748_v49 = vpack.c.bf16 %v732_v41, %v732_v41 }
  0x12   :  { %485 = vmatpush.bf16.msrb.mxu2 %v1168_v35  ;;  %v785_v29 = vunpack.c.l.b16 %v746_v21  ;;  %v786_v30 = vunpack.c.l.b16 %v747_v22  ;;  %v429_v32 = vpack.c.b16 %v414_v26, %v413_v25  ;;  %v20_v35 = vld [vmem:[%s1706_s0 + $0x18] sm:$0xff]  ;;  %v733_v42 = vld [vmem:[%s1706_s0 + $0x24] sm:$0xff]  ;;  %v38_v7 = vpack.c.bf16 %v22_v63, %v22_v63 }
  0x13   :  { %671 = vmatpush.bf16.msrb.mxu3 %v1171_v36  ;;  %v615_v33 = vpack.c.b16 %v600_v28, %v599_v27  ;;  %v21_v36 = vld [vmem:[%s1706_s0 + $0x20] sm:$0xff]  ;;  %v36_v43 = vpack.c.bf16 %v20_v35, %v20_v35  ;;  %v749_v50 = vpack.c.bf16 %v733_v42, %v733_v42  ;;  %v378_v9 = vpack.c.bf16 %v362_v1, %v362_v1  ;;  %v24_v27 = vld [vmem:[%s1706_s0 + $0x48] sm:$0xff]  ;;  %v25_v28 = vld [vmem:[%s1706_s0 + $0x50] sm:$0xff] }
  0x14   :  { %315 = vmatpush.bf16.msrb.mxu1 %v1162_v37  ;;  %857 = vmatpush.bf16.msrb.mxu0 %v1174_v46  ;;  %v801_v34 = vpack.c.b16 %v786_v30, %v785_v29  ;;  %v360_v37 = vld [vmem:[%s1706_s0 + $0x1a] sm:$0xff]  ;;  %v37_v44 = vpack.c.bf16 %v21_v36, %v21_v36  ;;  %v377_v46 = vpack.c.bf16 %v361_v38, %v361_v38  ;;  %v247_v15 = vunpack.c.l.b16 %v38_v7  ;;  %v364_v29 = vld [vmem:[%s1706_s0 + $0x4a] sm:$0xff]  ;;  %v365_v30 = vld [vmem:[%s1706_s0 + $0x52] sm:$0xff] }
  0x15   :  { %v376_v45 = vpack.c.bf16 %v360_v37, %v360_v37  ;;  %v245_v51 = vunpack.c.l.b16 %v36_v43  ;;  %v379_v10 = vpack.c.bf16 %v363_v2, %v363_v2  ;;  %v248_v16 = vunpack.c.l.b16 %v39_v8 }
  0x16   :  { %486 = vmatpush.bf16.msrb.mxu2 %v1167_v47  ;;  %v562_v47 = vpack.c.bf16 %v546_v39, %v546_v39  ;;  %v246_v52 = vunpack.c.l.b16 %v37_v44  ;;  %v416_v54 = vunpack.c.l.b16 %v377_v46  ;;  %v417_v17 = vunpack.c.l.b16 %v378_v9 }
  0x17   :  { %672 = vmatpush.bf16.msrb.mxu3 %v1170_v48  ;;  %v563_v48 = vpack.c.bf16 %v547_v40, %v547_v40  ;;  %v415_v53 = vunpack.c.l.b16 %v376_v45  ;;  %v418_v18 = vunpack.c.l.b16 %v379_v10  ;;  %v261_v23 = vpack.c.b16 %v248_v16, %v247_v15 }
  0x18   :  { %316 = vmatpush.bf16.msrb.mxu1 %v1161_v57  ;;  %858 = vmatpush.bf16.msrb.mxu0 %v1173_v58  ;;  %v601_v55 = vunpack.c.l.b16 %v562_v47  ;;  %v787_v57 = vunpack.c.l.b16 %v748_v49  ;;  %v788_v58 = vunpack.c.l.b16 %v749_v50  ;;  %v260_v59 = vpack.c.b16 %v246_v52, %v245_v51 }
  0x19   :  { %v602_v56 = vunpack.c.l.b16 %v563_v48  ;;  %v430_v60 = vpack.c.b16 %v416_v54, %v415_v53  ;;  %v431_v24 = vpack.c.b16 %v418_v18, %v417_v17  ;;  %v40_v35 = vpack.c.bf16 %v24_v27, %v24_v27 }
  0x1a   :  { %v802_v62 = vpack.c.b16 %v788_v58, %v787_v57  ;;  %v41_v36 = vpack.c.bf16 %v25_v28, %v25_v28  ;;  %v380_v37 = vpack.c.bf16 %v364_v29, %v364_v29  ;;  %v381_v38 = vpack.c.bf16 %v365_v30, %v365_v30  ;;  %v366_v57 = vld [vmem:[%s1706_s0 + $0x62] sm:$0xff]  ;;  %v367_v58 = vld [vmem:[%s1706_s0 + $0x6a] sm:$0xff] }
  0x1b   :  { %v616_v61 = vpack.c.b16 %v602_v56, %v601_v55  ;;  %v249_v43 = vunpack.c.l.b16 %v40_v35  ;;  %v26_v55 = vld [vmem:[%s1706_s0 + $0x60] sm:$0xff]  ;;  %v27_v56 = vld [vmem:[%s1706_s0 + $0x68] sm:$0xff]  ;;  %v382_v1 = vpack.c.bf16 %v366_v57, %v366_v57  ;;  %v383_v2 = vpack.c.bf16 %v367_v58, %v367_v58 }
  0x1c   :  { %v250_v44 = vunpack.c.l.b16 %v41_v36  ;;  %v419_v45 = vunpack.c.l.b16 %v380_v37  ;;  %v420_v46 = vunpack.c.l.b16 %v381_v38  ;;  %v42_v63 = vpack.c.bf16 %v26_v55, %v26_v55 }
  0x1d   :  { %1058 = vmatmul.msk.bf16.gmra.mxu1 %vm153_vm0, %v130_v3  ;;  %1060 = vmatmul.msk.bf16.gmra.mxu2 %vm153_vm0, %v132_v4  ;;  %v548_v3 = vld [vmem:[%s1706_s0 + $0x33] sm:$0xff]  ;;  %v549_v4 = vld [vmem:[%s1706_s0 + $0x3b] sm:$0xff]  ;;  %v43_v0 = vpack.c.bf16 %v27_v56, %v27_v56  ;;  %v421_v9 = vunpack.c.l.b16 %v382_v1  ;;  %v422_v10 = vunpack.c.l.b16 %v383_v2 }
  0x1e   :  { %1062 = vmatmul.msk.bf16.gmra.mxu3 %vm153_vm0, %v134_v5  ;;  %v734_v5 = vld [vmem:[%s1706_s0 + $0x34] sm:$0xff]  ;;  %v564_v11 = vpack.c.bf16 %v548_v3, %v548_v3  ;;  %v565_v12 = vpack.c.bf16 %v549_v4, %v549_v4  ;;  %v262_v51 = vpack.c.b16 %v250_v44, %v249_v43  ;;  %v432_v52 = vpack.c.b16 %v420_v46, %v419_v45 }
  0x1f   :  { %1056 = vmatmul.msk.bf16.gmra.mxu0 %vm153_vm0, %v128_v6  ;;  %v735_v6 = vld [vmem:[%s1706_s0 + $0x3c] sm:$0xff]  ;;  %v750_v13 = vpack.c.bf16 %v734_v5, %v734_v5  ;;  %v251_v7 = vunpack.c.l.b16 %v42_v63  ;;  %v252_v8 = vunpack.c.l.b16 %v43_v0  ;;  %v433_v16 = vpack.c.b16 %v422_v10, %v421_v9 }
  0x20   :  { %v751_v14 = vpack.c.bf16 %v735_v6, %v735_v6  ;;  %v603_v19 = vunpack.c.l.b16 %v564_v11  ;;  %v604_v20 = vunpack.c.l.b16 %v565_v12 }
  0x21   :  { %v789_v21 = vunpack.c.l.b16 %v750_v13  ;;  %v263_v15 = vpack.c.b16 %v252_v8, %v251_v7 }
  0x22   :  { %v790_v22 = vunpack.c.l.b16 %v751_v14  ;;  %v617_v25 = vpack.c.b16 %v604_v20, %v603_v19  ;;  %v28_v19 = vld [vmem:[%s1706_s0 + $0x78] sm:$0xff]  ;;  %v29_v20 = vld [vmem:[%s1706_s0 + $0x80] sm:$0xff] }
  0x23   :  { %v44_v27 = vpack.c.bf16 %v28_v19, %v28_v19  ;;  %v45_v28 = vpack.c.bf16 %v29_v20, %v29_v20  ;;  %v744_v19 = vld [vmem:[%s1706_s0 + $0xac] sm:$0xff]  ;;  %v745_v20 = vld [vmem:[%s1706_s0 + $0xb4] sm:$0xff] }
  0x24   :  { %v803_v26 = vpack.c.b16 %v790_v22, %v789_v21  ;;  %v368_v21 = vld [vmem:[%s1706_s0 + $0x7a] sm:$0xff]  ;;  %v369_v22 = vld [vmem:[%s1706_s0 + $0x82] sm:$0xff] }
  0x25   :  { %v384_v29 = vpack.c.bf16 %v368_v21, %v368_v21  ;;  %v385_v30 = vpack.c.bf16 %v369_v22, %v369_v22  ;;  %v253_v35 = vunpack.c.l.b16 %v44_v27  ;;  %v254_v36 = vunpack.c.l.b16 %v45_v28 }
  0x27   :  { %v423_v37 = vunpack.c.l.b16 %v384_v29  ;;  %v424_v38 = vunpack.c.l.b16 %v385_v30  ;;  %v264_v43 = vpack.c.b16 %v254_v36, %v253_v35  ;;  %v760_v30 = vpack.c.bf16 %v744_v19, %v744_v19 }
  0x29   :  { %v434_v44 = vpack.c.b16 %v424_v38, %v423_v37 }
  0x2d   :  { %1075 = vmatmul.msk.bf16.vlgmr.msrb.gmra.mxu1 %vm153_vm0, %v259_v31  ;;  %1101 = vmatmul.msk.bf16.vlgmr.msrb.gmra.mxu2 %vm153_vm0, %v429_v32  ;;  %v550_v31 = vld [vmem:[%s1706_s0 + $0x4b] sm:$0xff]  ;;  %v551_v32 = vld [vmem:[%s1706_s0 + $0x53] sm:$0xff] }
  0x2e   :  { %1127 = vmatmul.msk.bf16.vlgmr.msrb.gmra.mxu3 %vm153_vm0, %v615_v33  ;;  %v736_v33 = vld [vmem:[%s1706_s0 + $0x4c] sm:$0xff]  ;;  %v566_v39 = vpack.c.bf16 %v550_v31, %v550_v31  ;;  %v567_v40 = vpack.c.bf16 %v551_v32, %v551_v32 }
  0x2f   :  { %1153 = vmatmul.msk.bf16.vlgmr.msrb.gmra.mxu0 %vm153_vm0, %v801_v34  ;;  %v737_v34 = vld [vmem:[%s1706_s0 + $0x54] sm:$0xff]  ;;  %v752_v41 = vpack.c.bf16 %v736_v33, %v736_v33 }
  0x30   :  { %v753_v42 = vpack.c.bf16 %v737_v34, %v737_v34  ;;  %v605_v47 = vunpack.c.l.b16 %v566_v39  ;;  %v606_v48 = vunpack.c.l.b16 %v567_v40 }
  0x31   :  { %v791_v49 = vunpack.c.l.b16 %v752_v41 }
  0x32   :  { %v792_v50 = vunpack.c.l.b16 %v753_v42  ;;  %v618_v53 = vpack.c.b16 %v606_v48, %v605_v47  ;;  %v30_v47 = vld [vmem:[%s1706_s0 + $0x90] sm:$0xff]  ;;  %v31_v48 = vld [vmem:[%s1706_s0 + $0x98] sm:$0xff] }
  0x33   :  { %v46_v55 = vpack.c.bf16 %v30_v47, %v30_v47  ;;  %v47_v56 = vpack.c.bf16 %v31_v48, %v31_v48 }
  0x34   :  { %v804_v54 = vpack.c.b16 %v792_v50, %v791_v49  ;;  %v370_v49 = vld [vmem:[%s1706_s0 + $0x92] sm:$0xff]  ;;  %v371_v50 = vld [vmem:[%s1706_s0 + $0x9a] sm:$0xff] }
  0x35   :  { %v386_v57 = vpack.c.bf16 %v370_v49, %v370_v49  ;;  %v387_v58 = vpack.c.bf16 %v371_v50, %v371_v50  ;;  %v255_v63 = vunpack.c.l.b16 %v46_v55  ;;  %v256_v0 = vunpack.c.l.b16 %v47_v56 }
  0x37   :  { %v425_v1 = vunpack.c.l.b16 %v386_v57  ;;  %v426_v2 = vunpack.c.l.b16 %v387_v58  ;;  %v265_v7 = vpack.c.b16 %v256_v0, %v255_v63  ;;  %v1563_v63 = vld [vmem:[%s1707_s2] ss:$0 sm:$0xff] }
  0x39   :  { %v435_v8 = vpack.c.b16 %v426_v2, %v425_v1  ;;  %v936_v2 = vld [vmem:[%s1708_s3] sm:$0xff] }
  0x3d   :  { %1076 = vmatmul.msk.bf16.gmra.mxu1 %vm153_vm0, %v260_v59  ;;  %1102 = vmatmul.msk.bf16.gmra.mxu2 %vm153_vm0, %v430_v60  ;;  %v552_v59 = vld [vmem:[%s1706_s0 + $0x63] sm:$0xff]  ;;  %v553_v60 = vld [vmem:[%s1706_s0 + $0x6b] sm:$0xff] }
  0x3e   :  { %1128 = vmatmul.msk.bf16.gmra.mxu3 %vm153_vm0, %v616_v61  ;;  %v738_v61 = vld [vmem:[%s1706_s0 + $0x64] sm:$0xff]  ;;  %v568_v3 = vpack.c.bf16 %v552_v59, %v552_v59  ;;  %v569_v4 = vpack.c.bf16 %v553_v60, %v553_v60 }
  0x3f   :  { %1154 = vmatmul.msk.bf16.gmra.mxu0 %vm153_vm0, %v802_v62  ;;  %v739_v62 = vld [vmem:[%s1706_s0 + $0x6c] sm:$0xff]  ;;  %v754_v5 = vpack.c.bf16 %v738_v61, %v738_v61 }
  0x40   :  { %v755_v6 = vpack.c.bf16 %v739_v62, %v739_v62  ;;  %v607_v11 = vunpack.c.l.b16 %v568_v3  ;;  %v608_v12 = vunpack.c.l.b16 %v569_v4 }
  0x41   :  { %v793_v13 = vunpack.c.l.b16 %v754_v5 }
  0x42   :  { %v794_v14 = vunpack.c.l.b16 %v755_v6  ;;  %v619_v17 = vpack.c.b16 %v608_v12, %v607_v11 }
  0x44   :  { %v805_v18 = vpack.c.b16 %v794_v14, %v793_v13  ;;  %v32_v13 = vld [vmem:[%s1706_s0 + $0xa8] sm:$0xff]  ;;  %v33_v14 = vld [vmem:[%s1706_s0 + $0xb0] sm:$0xff] }
  0x4d   :  { %1077 = vmatmul.msk.bf16.gmra.mxu1 %vm153_vm0, %v261_v23  ;;  %1103 = vmatmul.msk.bf16.gmra.mxu2 %vm153_vm0, %v431_v24  ;;  %v554_v23 = vld [vmem:[%s1706_s0 + $0x7b] sm:$0xff]  ;;  %v555_v24 = vld [vmem:[%s1706_s0 + $0x83] sm:$0xff] }
  0x4e   :  { %1129 = vmatmul.msk.bf16.gmra.mxu3 %vm153_vm0, %v617_v25  ;;  %v740_v25 = vld [vmem:[%s1706_s0 + $0x7c] sm:$0xff]  ;;  %v570_v31 = vpack.c.bf16 %v554_v23, %v554_v23  ;;  %v571_v32 = vpack.c.bf16 %v555_v24, %v555_v24  ;;  %v48_v23 = vpack.c.bf16 %v32_v13, %v32_v13  ;;  %v49_v24 = vpack.c.bf16 %v33_v14, %v33_v14 }
  0x4f   :  { %1155 = vmatmul.msk.bf16.gmra.mxu0 %vm153_vm0, %v803_v26  ;;  %v741_v26 = vld [vmem:[%s1706_s0 + $0x84] sm:$0xff]  ;;  %v756_v33 = vpack.c.bf16 %v740_v25, %v740_v25 }
  0x50   :  { %v757_v34 = vpack.c.bf16 %v741_v26, %v741_v26  ;;  %v609_v39 = vunpack.c.l.b16 %v570_v31  ;;  %v610_v40 = vunpack.c.l.b16 %v571_v32  ;;  %v761_v31 = vpack.c.bf16 %v745_v20, %v745_v20 }
  0x51   :  { %v795_v41 = vunpack.c.l.b16 %v756_v33  ;;  %v257_v33 = vunpack.c.l.b16 %v48_v23 }
  0x52   :  { %v796_v42 = vunpack.c.l.b16 %v757_v34  ;;  %v620_v45 = vpack.c.b16 %v610_v40, %v609_v39  ;;  %v258_v34 = vunpack.c.l.b16 %v49_v24  ;;  %v799_v39 = vunpack.c.l.b16 %v760_v30 }
  0x53   :  { %v800_v40 = vunpack.c.l.b16 %v761_v31 }
  0x54   :  { %v806_v46 = vpack.c.b16 %v796_v42, %v795_v41 }
  0x55   :  { %v808_v47 = vpack.c.b16 %v800_v40, %v799_v39 }
  0x5d   :  { %1078 = vmatmul.msk.bf16.gmra.mxu1 %vm153_vm0, %v262_v51  ;;  %1104 = vmatmul.msk.bf16.gmra.mxu2 %vm153_vm0, %v432_v52  ;;  %v556_v51 = vld [vmem:[%s1706_s0 + $0x93] sm:$0xff]  ;;  %v557_v52 = vld [vmem:[%s1706_s0 + $0x9b] sm:$0xff] }
  0x5e   :  { %1130 = vmatmul.msk.bf16.gmra.mxu3 %vm153_vm0, %v618_v53  ;;  %v742_v53 = vld [vmem:[%s1706_s0 + $0x94] sm:$0xff]  ;;  %v572_v59 = vpack.c.bf16 %v556_v51, %v556_v51  ;;  %v573_v60 = vpack.c.bf16 %v557_v52, %v557_v52 }
  0x5f   :  { %1156 = vmatmul.msk.bf16.gmra.mxu0 %vm153_vm0, %v804_v54  ;;  %v743_v54 = vld [vmem:[%s1706_s0 + $0x9c] sm:$0xff]  ;;  %v758_v61 = vpack.c.bf16 %v742_v53, %v742_v53 }
  0x60   :  { %v759_v62 = vpack.c.bf16 %v743_v54, %v743_v54  ;;  %v611_v3 = vunpack.c.l.b16 %v572_v59  ;;  %v612_v4 = vunpack.c.l.b16 %v573_v60 }
  0x61   :  { %v797_v5 = vunpack.c.l.b16 %v758_v61 }
  0x62   :  { %v798_v6 = vunpack.c.l.b16 %v759_v62  ;;  %v621_v10 = vpack.c.b16 %v612_v4, %v611_v3 }
  0x64   :  { %v807_v11 = vpack.c.b16 %v798_v6, %v797_v5 }
  0x6d   :  { %1079 = vmatmul.msk.bf16.gmra.mxu1 %vm153_vm0, %v263_v15  ;;  %1105 = vmatmul.msk.bf16.gmra.mxu2 %vm153_vm0, %v433_v16  ;;  %v372_v15 = vld [vmem:[%s1706_s0 + $0xaa] sm:$0xff]  ;;  %v373_v16 = vld [vmem:[%s1706_s0 + $0xb2] sm:$0xff] }
  0x6e   :  { %1131 = vmatmul.msk.bf16.gmra.mxu3 %vm153_vm0, %v619_v17  ;;  %v558_v17 = vld [vmem:[%s1706_s0 + $0xab] sm:$0xff]  ;;  %v388_v25 = vpack.c.bf16 %v372_v15, %v372_v15  ;;  %v389_v26 = vpack.c.bf16 %v373_v16, %v373_v16 }
  0x6f   :  { %1157 = vmatmul.msk.bf16.gmra.mxu0 %vm153_vm0, %v805_v18  ;;  %v559_v18 = vld [vmem:[%s1706_s0 + $0xb3] sm:$0xff]  ;;  %v574_v28 = vpack.c.bf16 %v558_v17, %v558_v17  ;;  %v937_v16 = vld [vmem:[%s1708_s3 + $0x8] sm:$0xff] }
  0x70   :  { %v575_v29 = vpack.c.bf16 %v559_v18, %v559_v18  ;;  %v427_v35 = vunpack.c.l.b16 %v388_v25  ;;  %v428_v36 = vunpack.c.l.b16 %v389_v26 }
  0x71   :  { %v613_v37 = vunpack.c.l.b16 %v574_v28 }
  0x72   :  { %v614_v38 = vunpack.c.l.b16 %v575_v29 }
  0x7d   :  { %1080 = vmatmul.msk.bf16.gmra.mxu1 %vm153_vm0, %v264_v43  ;;  %1106 = vmatmul.msk.bf16.gmra.mxu2 %vm153_vm0, %v434_v44  ;;  %v266_v43 = vpack.c.b16 %v258_v34, %v257_v33  ;;  %v436_v44 = vpack.c.b16 %v428_v36, %v427_v35 }
  0x7e   :  { %1132 = vmatmul.msk.bf16.gmra.mxu3 %vm153_vm0, %v620_v45 }
  0x7f   :  { %1158 = vmatmul.msk.bf16.gmra.mxu0 %vm153_vm0, %v806_v46  ;;  %v622_v46 = vpack.c.b16 %v614_v38, %v613_v37 }
  0x8a   :  { %v1504_v9 = vpop.f32.mrf.mxu1 }
  0x8c   :  { %v187_v12 = vpop.f32.mrf.mxu0 }
  0x8d   :  { %1081 = vmatmul.msk.bf16.gmra.mxu1 %vm153_vm0, %v265_v7  ;;  %1107 = vmatmul.msk.bf16.gmra.mxu2 %vm153_vm0, %v435_v8 }
  0x8e   :  { %1133 = vmatmul.msk.bf16.gmra.mxu3 %vm153_vm0, %v621_v10 }
  0x8f   :  { %1159 = vmatmul.msk.bf16.gmra.mxu0 %vm153_vm0, %v807_v11 }
  0x90   :  { %v1534_v21 = vpop.f32.mrf.mxu2 }
  0x91   :  { %v1536_v22 = vpop.f32.mrf.mxu3 }
  0x92   :  { %v1538_v27 = vpop.f32.mrf.mxu1 }
  0x94   :  { %v189_v32 = vpop.f32.mrf.mxu0 }
  0x98   :  { %v1540_v41 = vpop.f32.mrf.mxu2 }
  0x99   :  { %v1542_v42 = vpop.f32.mrf.mxu3 }
  0x9a   :  { %v1544_v45 = vpop.f32.mrf.mxu1 }
  0x9c   :  { %v192_v48 = vpop.f32.mrf.mxu0 }
  0x9d   :  { %1082 = vmatmul.msk.bf16.gmra.mxu1 %vm153_vm0, %v266_v43  ;;  %1108 = vmatmul.msk.bf16.gmra.mxu2 %vm153_vm0, %v436_v44 }
  0x9e   :  { %1134 = vmatmul.msk.bf16.gmra.mxu3 %vm153_vm0, %v622_v46 }
  0x9f   :  { %1160 = vmatmul.msk.bf16.gmra.mxu0 %vm153_vm0, %v808_v47 }
  0xa0   :  { %v1550_v49 = vpop.f32.mrf.mxu2 }
  0xa1   :  { %v1552_v50 = vpop.f32.mrf.mxu3 }
  0xa2   :  { %v1554_v51 = vpop.f32.mrf.mxu1 }
  0xa4   :  { %v194_v52 = vpop.f32.mrf.mxu0 }
  0xa8   :  { %v1556_v53 = vpop.f32.mrf.mxu2 }
  0xa9   :  { %v1558_v54 = vpop.f32.mrf.mxu3 }
  0xaa   :  { %v318_v55 = vpop.f32.mrf.mxu1 }
  0xab   :  { %v319_v57 = vadd.f32 %v318_v55, %v187_v12 }
  0xac   :  { %v860_v56 = vpop.f32.mrf.mxu0 }
  0xb0   :  { %v488_v58 = vpop.f32.mrf.mxu2 }
  0xb1   :  { %v528_v59 = vadd.f32 %v488_v58, %v319_v57  ;;  %v674_v60 = vpop.f32.mrf.mxu3 }
  0xb2   :  { %v320_v61 = vpop.f32.mrf.mxu1 }
  0xb3   :  { %v714_v62 = vadd.f32 %v674_v60, %v528_v59  ;;  %v321_v4 = vadd.f32 %v320_v61, %v189_v32  ;;  %v938_v32 = vld [vmem:[%s1708_s3 + $0x10] sm:$0xff] }
  0xb4   :  { %v862_v0 = vpop.f32.mrf.mxu0 }
  0xb5   :  { %v900_v1 = vadd.f32 %v860_v56, %v714_v62 }
  0xb7   :  { %v920_v3 = vadd.f32 %v1563_v63, %v900_v1 }
  0xb8   :  { %v490_v5 = vpop.f32.mrf.mxu2 }
  0xb9   :  { %v952_v6 = vadd.f32 %v936_v2, %v920_v3  ;;  %v529_v7 = vadd.f32 %v490_v5, %v321_v4  ;;  %v676_v8 = vpop.f32.mrf.mxu3 }
  0xba   :  { %v323_v10 = vpop.f32.mrf.mxu1 }
  0xbb   :  { %vm968_vm1 = vcmp.ge.f32.partialorder %v952_v6, 0.0  ;;  %v984_v11 = vmul.f32 0.1, %v952_v6  ;;  %v715_v12 = vadd.f32 %v676_v8, %v529_v7  ;;  %v324_v18 = vadd.f32 %v323_v10, %v192_v48  ;;  %v939_v48 = vld [vmem:[%s1708_s3 + $0x18] sm:$0xff] }
  0xbc   :  { %v865_v13 = vpop.f32.mrf.mxu0 }
  0xbd   :  { %v1000_v14 = vsel %vm968_vm1, %v952_v6, %v984_v11  ;;  %v901_v15 = vadd.f32 %v862_v0, %v715_v12 }
  0xbe   :  { %1017 = vst.msk [vmem:[%s1709_s4] sm:$0xff] %vm1016_vm2, %v1000_v14 }
  0xbf   :  { %v921_v17 = vadd.f32 %v1563_v63, %v901_v15 }
  0xc0   :  { %v493_v19 = vpop.f32.mrf.mxu2 }
  0xc1   :  { %v953_v20 = vadd.f32 %v937_v16, %v921_v17  ;;  %v530_v23 = vadd.f32 %v493_v19, %v324_v18  ;;  %v679_v24 = vpop.f32.mrf.mxu3 }
  0xc2   :  { %v325_v25 = vpop.f32.mrf.mxu1 }
  0xc3   :  { %vm969_vm3 = vcmp.ge.f32.partialorder %v953_v20, 0.0  ;;  %v985_v26 = vmul.f32 0.1, %v953_v20  ;;  %v716_v28 = vadd.f32 %v679_v24, %v530_v23  ;;  %v326_v34 = vadd.f32 %v325_v25, %v194_v52 }
  0xc4   :  { %v867_v29 = vpop.f32.mrf.mxu0 }
  0xc5   :  { %v1001_v30 = vsel %vm969_vm3, %v953_v20, %v985_v26  ;;  %v902_v31 = vadd.f32 %v865_v13, %v716_v28 }
  0xc6   :  { %1018 = vst.msk [vmem:[%s1709_s4 + $0x8] sm:$0xff] %vm1016_vm2, %v1001_v30 }
  0xc7   :  { %v922_v33 = vadd.f32 %v1563_v63, %v902_v31 }
  0xc8   :  { %v495_v35 = vpop.f32.mrf.mxu2 }
  0xc9   :  { %v954_v36 = vadd.f32 %v938_v32, %v922_v33  ;;  %v531_v37 = vadd.f32 %v495_v35, %v326_v34  ;;  %v681_v38 = vpop.f32.mrf.mxu3 }
  0xca   :  { %v328_v39 = vpop.f32.mrf.mxu1 }
  0xcb   :  { %vm970_vm4 = vcmp.ge.f32.partialorder %v954_v36, 0.0  ;;  %v986_v40 = vmul.f32 0.1, %v954_v36  ;;  %v717_v43 = vadd.f32 %v681_v38, %v531_v37  ;;  %v329_v55 = vadd.f32 %v328_v39, %v1504_v9  ;;  %v940_v9 = vld [vmem:[%s1708_s3 + $0x20] sm:$0xff] }
  0xcc   :  { %v870_v44 = vpop.f32.mrf.mxu0 }
  0xcd   :  { %v1002_v46 = vsel %vm970_vm4, %v954_v36, %v986_v40  ;;  %v903_v47 = vadd.f32 %v867_v29, %v717_v43 }
  0xce   :  { %1019 = vst.msk [vmem:[%s1709_s4 + $0x10] sm:$0xff] %vm1016_vm2, %v1002_v46 }
  0xcf   :  { %v923_v52 = vadd.f32 %v1563_v63, %v903_v47 }
  0xd0   :  { %v498_v56 = vpop.f32.mrf.mxu2 }
  0xd1   :  { %v955_v57 = vadd.f32 %v939_v48, %v923_v52  ;;  %v532_v58 = vadd.f32 %v498_v56, %v329_v55  ;;  %v684_v59 = vpop.f32.mrf.mxu3 }
  0xd2   :  { %v330_v60 = vpop.f32.mrf.mxu1 }
  0xd3   :  { %vm971_vm5 = vcmp.ge.f32.partialorder %v955_v57, 0.0  ;;  %v987_v61 = vmul.f32 0.1, %v955_v57  ;;  %v718_v62 = vadd.f32 %v684_v59, %v532_v58  ;;  %v331_v4 = vadd.f32 %v330_v60, %v1538_v27  ;;  %v941_v27 = vld [vmem:[%s1708_s3 + $0x28] sm:$0xff] }
  0xd4   :  { %v872_v0 = vpop.f32.mrf.mxu0 }
  0xd5   :  { %v1003_v1 = vsel %vm971_vm5, %v955_v57, %v987_v61  ;;  %v904_v2 = vadd.f32 %v870_v44, %v718_v62 }
  0xd6   :  { %1020 = vst.msk [vmem:[%s1709_s4 + $0x18] sm:$0xff] %vm1016_vm2, %v1003_v1 }
  0xd7   :  { %v924_v3 = vadd.f32 %v1563_v63, %v904_v2 }
  0xd8   :  { %v500_v5 = vpop.f32.mrf.mxu2 }
  0xd9   :  { %v956_v6 = vadd.f32 %v940_v9, %v924_v3  ;;  %v533_v7 = vadd.f32 %v500_v5, %v331_v4  ;;  %v686_v8 = vpop.f32.mrf.mxu3 }
  0xda   :  { %v333_v10 = vpop.f32.mrf.mxu1 }
  0xdb   :  { %vm972_vm6 = vcmp.ge.f32.partialorder %v956_v6, 0.0  ;;  %v988_v11 = vmul.f32 0.1, %v956_v6  ;;  %v719_v12 = vadd.f32 %v686_v8, %v533_v7  ;;  %v334_v17 = vadd.f32 %v333_v10, %v1544_v45  ;;  %v942_v45 = vld [vmem:[%s1708_s3 + $0x30] sm:$0xff] }
  0xdc   :  { %v875_v13 = vpop.f32.mrf.mxu0 }
  0xdd   :  { %v1004_v14 = vsel %vm972_vm6, %v956_v6, %v988_v11  ;;  %v905_v15 = vadd.f32 %v872_v0, %v719_v12 }
  0xde   :  { %1021 = vst.msk [vmem:[%s1709_s4 + $0x20] sm:$0xff] %vm1016_vm2, %v1004_v14 }
  0xdf   :  { %v925_v16 = vadd.f32 %v1563_v63, %v905_v15 }
  0xe0   :  { %v503_v18 = vpop.f32.mrf.mxu2 }
  0xe1   :  { %v957_v19 = vadd.f32 %v941_v27, %v925_v16  ;;  %v534_v20 = vadd.f32 %v503_v18, %v334_v17  ;;  %v689_v23 = vpop.f32.mrf.mxu3 }
  0xe2   :  { %v335_v24 = vpop.f32.mrf.mxu1 }
  0xe3   :  { %vm973_vm7 = vcmp.ge.f32.partialorder %v957_v19, 0.0  ;;  %v989_v25 = vmul.f32 0.1, %v957_v19  ;;  %v720_v26 = vadd.f32 %v689_v23, %v534_v20  ;;  %v336_v32 = vadd.f32 %v335_v24, %v1554_v51  ;;  %v943_v51 = vld [vmem:[%s1708_s3 + $0x38] sm:$0xff] }
  0xe4   :  { %v877_v28 = vpop.f32.mrf.mxu0 }
  0xe5   :  { %v1005_v29 = vsel %vm973_vm7, %v957_v19, %v989_v25  ;;  %v906_v30 = vadd.f32 %v875_v13, %v720_v26 }
  0xe6   :  { %1022 = vst.msk [vmem:[%s1709_s4 + $0x28] sm:$0xff] %vm1016_vm2, %v1005_v29 }
  0xe7   :  { %v926_v31 = vadd.f32 %v1563_v63, %v906_v30 }
  0xe8   :  { %v505_v33 = vpop.f32.mrf.mxu2 }
  0xe9   :  { %v958_v34 = vadd.f32 %v942_v45, %v926_v31  ;;  %v535_v35 = vadd.f32 %v505_v33, %v336_v32  ;;  %v691_v36 = vpop.f32.mrf.mxu3 }
  0xea   :  { %v338_v37 = vpop.f32.mrf.mxu1 }
  0xeb   :  { %vm974_vm8 = vcmp.ge.f32.partialorder %v958_v34, 0.0  ;;  %v990_v38 = vmul.f32 0.1, %v958_v34  ;;  %v721_v39 = vadd.f32 %v691_v36, %v535_v35  ;;  %v339_v47 = vadd.f32 %v338_v37, %v1534_v21  ;;  %v944_v21 = vld [vmem:[%s1708_s3 + $0x40] sm:$0xff]  ;;  %v947_v36 = vld [vmem:[%s1708_s3 + $0x58] sm:$0xff] }
  0xec   :  { %v880_v40 = vpop.f32.mrf.mxu0 }
  0xed   :  { %v1006_v43 = vsel %vm974_vm8, %v958_v34, %v990_v38  ;;  %v907_v44 = vadd.f32 %v877_v28, %v721_v39 }
  0xee   :  { %1023 = vst.msk [vmem:[%s1709_s4 + $0x30] sm:$0xff] %vm1016_vm2, %v1006_v43 }
  0xef   :  { %v927_v46 = vadd.f32 %v1563_v63, %v907_v44 }
  0xf0   :  { %v508_v48 = vpop.f32.mrf.mxu2 }
  0xf1   :  { %v959_v52 = vadd.f32 %v943_v51, %v927_v46  ;;  %v536_v55 = vadd.f32 %v508_v48, %v339_v47  ;;  %v694_v56 = vpop.f32.mrf.mxu3 }
  0xf2   :  { %v340_v57 = vpop.f32.mrf.mxu1 }
  0xf3   :  { %vm975_vm9 = vcmp.ge.f32.partialorder %v959_v52, 0.0  ;;  %v991_v58 = vmul.f32 0.1, %v959_v52  ;;  %v722_v59 = vadd.f32 %v694_v56, %v536_v55  ;;  %v341_v1 = vadd.f32 %v340_v57, %v1540_v41  ;;  %v945_v41 = vld [vmem:[%s1708_s3 + $0x48] sm:$0xff]  ;;  %v948_v55 = vld [vmem:[%s1708_s3 + $0x60] sm:$0xff] }
  0xf4   :  { %v882_v60 = vpop.f32.mrf.mxu0 }
  0xf5   :  { %v1007_v61 = vsel %vm975_vm9, %v959_v52, %v991_v58  ;;  %v908_v62 = vadd.f32 %v880_v40, %v722_v59 }
  0xf6   :  { %1024 = vst.msk [vmem:[%s1709_s4 + $0x38] sm:$0xff] %vm1016_vm2, %v1007_v61 }
  0xf7   :  { %v928_v0 = vadd.f32 %v1563_v63, %v908_v62 }
  0xf8   :  { %v510_v2 = vpop.f32.mrf.mxu2 }
  0xf9   :  { %v960_v9 = vadd.f32 %v944_v21, %v928_v0  ;;  %v537_v3 = vadd.f32 %v510_v2, %v341_v1  ;;  %v696_v4 = vpop.f32.mrf.mxu3 }
  0xfa   :  { %v343_v5 = vpop.f32.mrf.mxu1 }
  0xfb   :  { %vm976_vm10 = vcmp.ge.f32.partialorder %v960_v9, 0.0  ;;  %v992_v6 = vmul.f32 0.1, %v960_v9  ;;  %v723_v7 = vadd.f32 %v696_v4, %v537_v3  ;;  %v344_v13 = vadd.f32 %v343_v5, %v1550_v49  ;;  %v946_v49 = vld [vmem:[%s1708_s3 + $0x50] sm:$0xff] }
  0xfc   :  { %v885_v8 = vpop.f32.mrf.mxu0 }
  0xfd   :  { %v1008_v10 = vsel %vm976_vm10, %v960_v9, %v992_v6  ;;  %v909_v11 = vadd.f32 %v882_v60, %v723_v7 }
  0xfe   :  { %1025 = vst.msk [vmem:[%s1709_s4 + $0x40] sm:$0xff] %vm1016_vm2, %v1008_v10 }
  0xff   :  { %v929_v12 = vadd.f32 %v1563_v63, %v909_v11 }
 0x100   :  { %v513_v14 = vpop.f32.mrf.mxu2 }
 0x101   :  { %v961_v15 = vadd.f32 %v945_v41, %v929_v12  ;;  %v538_v27 = vadd.f32 %v513_v14, %v344_v13  ;;  %v699_v16 = vpop.f32.mrf.mxu3 }
 0x102   :  { %v345_v17 = vpop.f32.mrf.mxu1 }
 0x103   :  { %vm977_vm11 = vcmp.ge.f32.partialorder %v961_v15, 0.0  ;;  %v993_v18 = vmul.f32 0.1, %v961_v15  ;;  %v724_v19 = vadd.f32 %v699_v16, %v538_v27  ;;  %v346_v26 = vadd.f32 %v345_v17, %v1556_v53 }
 0x104   :  { %v887_v20 = vpop.f32.mrf.mxu0 }
 0x105   :  { %v1009_v23 = vsel %vm977_vm11, %v961_v15, %v993_v18  ;;  %v910_v24 = vadd.f32 %v885_v8, %v724_v19 }
 0x106   :  { %1026 = vst.msk [vmem:[%s1709_s4 + $0x48] sm:$0xff] %vm1016_vm2, %v1009_v23 }
 0x107   :  { %v930_v25 = vadd.f32 %v1563_v63, %v910_v24 }
 0x108   :  { %v515_v28 = vpop.f32.mrf.mxu2 }
 0x109   :  { %v962_v29 = vadd.f32 %v946_v49, %v930_v25  ;;  %v539_v30 = vadd.f32 %v515_v28, %v346_v26  ;;  %v701_v45 = vpop.f32.mrf.mxu3  ;;  %v951_v25 = vld [vmem:[%s1708_s3 + $0x78] sm:$0xff] }
 0x10a   :  { %v348_v31 = vpop.f32.mrf.mxu1 }
 0x10b   :  { %vm978_vm12 = vcmp.ge.f32.partialorder %v962_v29, 0.0  ;;  %v994_v32 = vmul.f32 0.1, %v962_v29  ;;  %v725_v33 = vadd.f32 %v701_v45, %v539_v30  ;;  %v349_v38 = vadd.f32 %v348_v31, %v1536_v22 }
 0x10c   :  { %v890_v53 = vpop.f32.mrf.mxu0 }
 0x10d   :  { %v1010_v34 = vsel %vm978_vm12, %v962_v29, %v994_v32  ;;  %v911_v35 = vadd.f32 %v887_v20, %v725_v33 }
 0x10e   :  { %1027 = vst.msk [vmem:[%s1709_s4 + $0x50] sm:$0xff] %vm1016_vm2, %v1010_v34 }
 0x10f   :  { %v931_v37 = vadd.f32 %v1563_v63, %v911_v35 }
 0x110   :  { %v518_v39 = vpop.f32.mrf.mxu2 }
 0x111   :  { %v963_v40 = vadd.f32 %v947_v36, %v931_v37  ;;  %v540_v43 = vadd.f32 %v518_v39, %v349_v38  ;;  %v704_v44 = vpop.f32.mrf.mxu3 }
 0x112   :  { %v350_v51 = vpop.f32.mrf.mxu1 }
 0x113   :  { %vm979_vm13 = vcmp.ge.f32.partialorder %v963_v40, 0.0  ;;  %v995_v46 = vmul.f32 0.1, %v963_v40  ;;  %v726_v47 = vadd.f32 %v704_v44, %v540_v43  ;;  %v351_v56 = vadd.f32 %v350_v51, %v1542_v42  ;;  %v949_v42 = vld [vmem:[%s1708_s3 + $0x68] sm:$0xff] }
 0x114   :  { %v892_v57 = vpop.f32.mrf.mxu0 }
 0x115   :  { %v1011_v48 = vsel %vm979_vm13, %v963_v40, %v995_v46  ;;  %v912_v52 = vadd.f32 %v890_v53, %v726_v47 }
 0x116   :  { %1028 = vst.msk [vmem:[%s1709_s4 + $0x58] sm:$0xff] %vm1016_vm2, %v1011_v48 }
 0x117   :  { %v932_v22 = vadd.f32 %v1563_v63, %v912_v52 }
 0x118   :  { %v520_v58 = vpop.f32.mrf.mxu2 }
 0x119   :  { %v964_v59 = vadd.f32 %v948_v55, %v932_v22  ;;  %v541_v60 = vadd.f32 %v520_v58, %v351_v56  ;;  %v706_v61 = vpop.f32.mrf.mxu3 }
 0x11a   :  { %v353_v62 = vpop.f32.mrf.mxu1 }
 0x11b   :  { %vm980_vm14 = vcmp.ge.f32.partialorder %v964_v59, 0.0  ;;  %v996_v21 = vmul.f32 0.1, %v964_v59  ;;  %v727_v0 = vadd.f32 %v706_v61, %v541_v60  ;;  %v354_v3 = vadd.f32 %v353_v62, %v1552_v50  ;;  %v950_v50 = vld [vmem:[%s1708_s3 + $0x70] sm:$0xff] }
 0x11c   :  { %v895_v8 = vpop.f32.mrf.mxu0 }
 0x11d   :  { %v1012_v1 = vsel %vm980_vm14, %v964_v59, %v996_v21  ;;  %v913_v2 = vadd.f32 %v892_v57, %v727_v0 }
 0x11e   :  { %1029 = vst.msk [vmem:[%s1709_s4 + $0x60] sm:$0xff] %vm1016_vm2, %v1012_v1 }
 0x11f   :  { %v933_v9 = vadd.f32 %v1563_v63, %v913_v2 }
 0x120   :  { %v523_v4 = vpop.f32.mrf.mxu2 }
 0x121   :  { %v965_v5 = vadd.f32 %v949_v42, %v933_v9  ;;  %v542_v6 = vadd.f32 %v523_v4, %v354_v3  ;;  %v709_v7 = vpop.f32.mrf.mxu3 }
 0x122   :  { %v355_v41 = vpop.f32.mrf.mxu1 }
 0x123   :  { %vm981_vm15 = vcmp.ge.f32.partialorder %v965_v5, 0.0  ;;  %v997_v10 = vmul.f32 0.1, %v965_v5  ;;  %v728_v11 = vadd.f32 %v709_v7, %v542_v6  ;;  %v356_v15 = vadd.f32 %v355_v41, %v1558_v54 }
 0x124   :  { %v897_v23 = vpop.f32.mrf.mxu0 }
 0x125   :  { %v1013_v12 = vsel %vm981_vm15, %v965_v5, %v997_v10  ;;  %v914_v13 = vadd.f32 %v895_v8, %v728_v11 }
 0x126   :  { %1030 = vst.msk [vmem:[%s1709_s4 + $0x68] sm:$0xff] %vm1016_vm2, %v1013_v12 }
 0x127   :  { %v934_v14 = vadd.f32 %v1563_v63, %v914_v13 }
 0x128   :  { %v525_v27 = vpop.f32.mrf.mxu2 }
 0x129   :  { %v966_v16 = vadd.f32 %v950_v50, %v934_v14  ;;  %v543_v17 = vadd.f32 %v525_v27, %v356_v15  ;;  %v711_v18 = vpop.f32.mrf.mxu3 }
 0x12b   :  { %vm982_vm0 = vcmp.ge.f32.partialorder %v966_v16, 0.0  ;;  %v998_v19 = vmul.f32 0.1, %v966_v16  ;;  %v729_v20 = vadd.f32 %v711_v18, %v543_v17 }
 0x12d   :  { %v1014_v24 = vsel %vm982_vm0, %v966_v16, %v998_v19  ;;  %v915_v49 = vadd.f32 %v897_v23, %v729_v20 }
 0x12e   :  { %1031 = vst.msk [vmem:[%s1709_s4 + $0x70] sm:$0xff] %vm1016_vm2, %v1014_v24 }
 0x12f   :  { %v935_v54 = vadd.f32 %v1563_v63, %v915_v49 }
 0x131   :  { %v967_v26 = vadd.f32 %v951_v25, %v935_v54 }
 0x133   :  { %vm983_vm1 = vcmp.ge.f32.partialorder %v967_v26, 0.0  ;;  %v999_v28 = vmul.f32 0.1, %v967_v26 }
 0x135   :  { %v1015_v29 = vsel %vm983_vm1, %v967_v26, %v999_v28 }
 0x136   :  { %1032 = vst.msk [vmem:[%s1709_s4 + $0x78] sm:$0xff] %vm1016_vm2, %v1015_v29 }

// kernel: _lambda_.27
= control target key start
LH: loop header
LB: loop body
LE: loop exit
PB: predicated region body
PF: predicated region fallthrough
CT: control target
= control target key end

     0   :  { %s217_s6 = smov 0   ;;  %s234_s0 = inlined_call_operand.vmem [shape: f32[3,32,32], index: 0, kind: input, shape index: {}]   ;;  %s235_s1 = inlined_call_operand.vmem [shape: f32[3,1,32], index: 1, kind: output, shape index: {}]  }
   0x1 LB: > { %s181_s7 = sadd.s32 4294967295, %s205_s6   ;;  %p185_p0 = scmp.ge.s32.totalorder %s205_s6, 1  ;;  %s205_s6 = sphi %s217_s6, %s11_s6  }
   0x2   : > { %p87_p1 = scmp.lt.s32.totalorder %s205_s6, 4 }
   0x4   : > { %p88_p2 = pnand %p185_p0, %p87_p1 }
   0x5   : > { %p105_p3 = scmp.lt.s32.totalorder (!%p88_p2), %s181_s7, 2 }
   0x6   : > { %91 = sbr.rel (%p88_p2) target bundleno = 37 (0x25), region = 24 }
   0xb   : > { %s237_s7 = smov (!%p105_p3, %s181_s7), 2  ;;  %vm117_vm0 = vcmask 261120   ;;  %vm132_vm1 = vcmask 253952  }
   0xc   : > { %s190_s8 = sshll.u32 %s237_s7, 5  ;;  %s112_s14 = scalar_lea.vmem %s235_s1, %s237_s7 }
   0xd   : > { %s109_s11 = scalar_lea.vmem %s234_s0, %s190_s8 }
   0xe   : > { %v113_v0 = vld [vmem:[%s109_s11] sm:$0xff]  ;;  %v114_v1 = vld [vmem:[%s109_s11 + $0x8] sm:$0xff]  ;;  %v115_v2 = vld [vmem:[%s109_s11 + $0x10] sm:$0xff] }
   0xf   : > { %v116_v3 = vld [vmem:[%s109_s11 + $0x18] sm:$0xff]  ;;  %v118_v4 = vsel %vm117_vm0, %v113_v0, 0.0  ;;  %v119_v5 = vsel %vm117_vm0, %v114_v1, 0.0  ;;  %v121_v6 = vsel %vm117_vm0, %v115_v2, 0.0 }
  0x10   : > { %v120_v7 = vadd.f32 %v119_v5, %v118_v4  ;;  %v123_v8 = vsel %vm117_vm0, %v116_v3, 0.0 }
  0x12   : > { %v122_v9 = vadd.f32 %v121_v6, %v120_v7 }
  0x14   : > { %v124_v10 = vadd.f32 %v123_v8, %v122_v9 }
  0x16   : > { %v125_v11 = vrot.slane %v124_v10, 4 }
  0x18   : > { %v126_v12 = vadd.f32 %v125_v11, %v124_v10 }
  0x1a   : > { %v127_v13 = vrot.slane %v126_v12, 2 }
  0x1c   : > { %v128_v14 = vadd.f32 %v127_v13, %v126_v12 }
  0x1e   : > { %v129_v15 = vrot.slane %v128_v14, 1 }
  0x20   : > { %v130_v16 = vadd.f32 %v129_v15, %v128_v14 }
  0x22   : > { %v131_v17 = vmul.f32 0.03125, %v130_v16 }
  0x24   : > { %133 = vst.msk [vmem:[%s112_s14] sm:$0x1] %vm132_vm1, %v131_v17 }
  0x25 PF: > { %s11_s6 = sadd.s32 1, %s205_s6  }
  0x26   : > { %p8_p4 = scmp.ge.s32.totalorder %s11_s6, 5  }
  0x28   :  { %10 = sbr.rel (!%p8_p4) target bundleno = 1 (0x1), region = 54 }

// kernel: _lambda_.26
= control target key start
LH: loop header
LB: loop body
LE: loop exit
PB: predicated region body
PF: predicated region fallthrough
CT: control target
= control target key end

     0   :  { %s616_s15 = smov 0   ;;  %s693_s0 = inlined_call_operand.vmem [shape: f32[3,4,16,32], index: 0, kind: input, shape index: {}]   ;;  %s694_s1 = inlined_call_operand.vmem [shape: bf16[3,32,32], index: 1, kind: input, shape index: {}]   ;;  %s695_s2 = inlined_call_operand.vmem [shape: f32[1,32], index: 2, kind: input, shape index: {}]   ;;  %s696_s3 = inlined_call_operand.vmem [shape: f32[3,2,16,32], index: 3, kind: input, shape index: {}]   ;;  %s697_s4 = inlined_call_operand.vmem [shape: f32[3,2,16,32], index: 4, kind: output, shape index: {}]  }
   0x1 LB: > { %s504_s16 = sadd.s32 4294967295, %s589_s15   ;;  %p508_p0 = scmp.ge.s32.totalorder %s589_s15, 1  ;;  %s589_s15 = sphi %s616_s15, %s14_s15  }
   0x2   : > { %p172_p1 = scmp.lt.s32.totalorder %s589_s15, 4 }
   0x4   : > { %p173_p2 = pnand %p508_p0, %p172_p1 }
   0x5   : > { %p203_p3 = scmp.lt.s32.totalorder (!%p173_p2), %s504_s16, 2 }
   0x6   : > { %176 = sbr.rel (%p173_p2) target bundleno = 189 (0xbd), region = 36 }
   0xb   : > { %v569_v0 = vld [vmem:[%s694_s1 + $0x18] sm:$0xff]  ;;  %v567_v1 = vld [vmem:[%s694_s1 + $0x8] sm:$0xff]  ;;  %v568_v3 = vld [vmem:[%s694_s1 + $0x10] sm:$0xff]  ;;  %s699_s16 = smov (!%p203_p3, %s504_s16), 2  ;;  %vm267_vm0 = vcmask 261120  }
   0xc   : > { %v571_v2 = vld [vmem:[%s694_s1 + $0x28] sm:$0xff]  ;;  %280 = vmatpush.bf16.msra.mxu0 %v569_v0  ;;  %327 = vmatpush.bf16.msra.mxu1 %v567_v1  ;;  %v566_v4 = vld [vmem:[%s694_s1] sm:$0xff]  ;;  %s563_s29 = sshll.u32 %s699_s16, 6  ;;  %s564_s7 = sshll.u32 %s699_s16, 5 }
   0xd   : > { %388 = vmatpush.bf16.msra.mxu2 %v571_v2  ;;  %v570_v5 = vld [vmem:[%s694_s1 + $0x20] sm:$0xff]  ;;  %572 = vmatpush.bf16.msra.mxu3 %v569_v0  ;;  %s648_s6 = scalar_lea.vmem %s693_s0, %s563_s29  ;;  %s668_s10 = scalar_lea.vmem %s696_s3, %s564_s7 }
   0xe   : > { %v515_v6 = vld [vmem:[%s648_s6 + $0x10] sm:$0xff]  ;;  %v516_v7 = vld [vmem:[%s648_s6 + $0x18] sm:$0xff]  ;;  %v219_v8 = vld [vmem:[%s648_s6] sm:$0xff]  ;;  %s677_s16 = scalar_lea.vmem %s697_s4, %s564_s7 }
   0xf   : > { %v236_v9 = vpack.c.bf16 %v515_v6, %v515_v6  ;;  %v237_v10 = vpack.c.bf16 %v516_v7, %v516_v7  ;;  %v220_v11 = vld [vmem:[%s648_s6 + $0x8] sm:$0xff]  ;;  %v223_v12 = vpack.c.bf16 %v219_v8, %v219_v8  ;;  %v543_v13 = vld [vmem:[%s648_s6 + $0x20] sm:$0xff]  ;;  %v545_v27 = vld [vmem:[%s648_s6 + $0x30] sm:$0xff] }
  0x10   : > { %281 = vmatpush.bf16.msra.mxu0 %v568_v3  ;;  %328 = vmatpush.bf16.msra.mxu1 %v566_v4  ;;  %v544_v14 = vld [vmem:[%s648_s6 + $0x28] sm:$0xff]  ;;  %v224_v15 = vpack.c.bf16 %v220_v11, %v220_v11  ;;  %v345_v16 = vpack.c.bf16 %v543_v13, %v543_v13  ;;  %v546_v28 = vld [vmem:[%s648_s6 + $0x38] sm:$0xff]  ;;  %v347_v29 = vpack.c.bf16 %v545_v27, %v545_v27  ;;  %v582_v37 = vld [vmem:[%s695_s2] ss:$0 sm:$0xff] }
  0x11   : > { %389 = vmatpush.bf16.msra.mxu2 %v570_v5  ;;  %573 = vmatpush.bf16.msra.mxu3 %v568_v3  ;;  %v346_v17 = vpack.c.bf16 %v544_v14, %v544_v14  ;;  %v249_v18 = vunpack.c.l.b16 %v236_v9  ;;  %v250_v19 = vunpack.c.l.b16 %v237_v10  ;;  %v297_v20 = vunpack.c.l.b16 %v223_v12  ;;  %v413_v40 = vld [vmem:[%s668_s10] sm:$0xff]  ;;  %v414_v50 = vld [vmem:[%s668_s10 + $0x8] sm:$0xff]  ;;  %v415_v60 = vld [vmem:[%s668_s10 + $0x10] sm:$0xff] }
  0x12   : > { %v298_v21 = vunpack.c.l.b16 %v224_v15  ;;  %v358_v22 = vunpack.c.l.b16 %v345_v16  ;;  %v348_v30 = vpack.c.bf16 %v546_v28, %v546_v28  ;;  %v360_v31 = vunpack.c.l.b16 %v347_v29  ;;  %v416_v6 = vld [vmem:[%s668_s10 + $0x18] sm:$0xff] }
  0x13   : > { %v359_v23 = vunpack.c.l.b16 %v346_v17  ;;  %v253_v24 = vpack.c.b16 %v250_v19, %v249_v18 }
  0x14   : > { %v301_v25 = vpack.c.b16 %v298_v21, %v297_v20  ;;  %v361_v32 = vunpack.c.l.b16 %v348_v30 }
  0x15   : > { %v362_v26 = vpack.c.b16 %v359_v23, %v358_v22  ;;  %531 = vmatmul.msk.bf16.vlgmr.msra.gmra.mxu0 %vm267_vm0, %v253_v24 }
  0x16   : > { %541 = vmatmul.msk.bf16.vlgmr.msra.gmra.mxu1 %vm267_vm0, %v301_v25  ;;  %v363_v33 = vpack.c.b16 %v361_v32, %v360_v31 }
  0x17   : > { %559 = vmatmul.msk.bf16.vlgmr.msra.gmra.mxu2 %vm267_vm0, %v362_v26  ;;  %532 = vmatmul.msk.bf16.vlgmr.msra.gmra.mxu3 %vm267_vm0, %v362_v26 }
  0x26   : > { %542 = vmatmul.msk.bf16.gmra.mxu1 %vm267_vm0, %v253_v24 }
  0x27   : > { %560 = vmatmul.msk.bf16.gmra.mxu2 %vm267_vm0, %v363_v33 }
  0x92   : > { %v283_v34 = vpop.f32.mrf.mxu0 }
  0x93   : > { %v330_v35 = vpop.f32.mrf.mxu1 }
  0x94   : > { %v331_v36 = vadd.f32 %v330_v35, %v283_v34 }
  0x9a   : > { %v391_v38 = vpop.f32.mrf.mxu2  ;;  %v285_v43 = vpop.f32.mrf.mxu0 }
  0x9b   : > { %v401_v39 = vadd.f32 %v391_v38, %v331_v36  ;;  %v332_v41 = vpop.f32.mrf.mxu1  ;;  %v288_v53 = vpop.f32.mrf.mxu3 }
  0x9c   : > { %v333_v46 = vadd.f32 %v332_v41, %v285_v43 }
  0x9d   : > { %v409_v42 = vadd.f32 %v582_v37, %v401_v39 }
  0x9f   : > { %v417_v44 = vadd.f32 %v413_v40, %v409_v42 }
  0xa1   : > { %vm421_vm1 = vcmp.ge.f32.partialorder %v417_v44, 0.0  ;;  %v425_v45 = vmul.f32 0.1, %v417_v44 }
  0xa2   : > { %v393_v47 = vpop.f32.mrf.mxu2 }
  0xa3   : > { %v429_v48 = vsel %vm421_vm1, %v417_v44, %v425_v45  ;;  %v402_v49 = vadd.f32 %v393_v47, %v333_v46  ;;  %v335_v51 = vpop.f32.mrf.mxu1  ;;  %v290_v0 = vpop.f32.mrf.mxu3 }
  0xa4   : > { %433 = vst.msk [vmem:[%s677_s16] sm:$0xff] %vm267_vm0, %v429_v48  ;;  %v336_v55 = vadd.f32 %v335_v51, %v288_v53 }
  0xa5   : > { %v410_v52 = vadd.f32 %v582_v37, %v402_v49 }
  0xa7   : > { %v418_v54 = vadd.f32 %v414_v50, %v410_v52 }
  0xa9   : > { %vm422_vm2 = vcmp.ge.f32.partialorder %v418_v54, 0.0  ;;  %v426_v56 = vmul.f32 0.1, %v418_v54 }
  0xaa   : > { %v396_v57 = vpop.f32.mrf.mxu2 }
  0xab   : > { %v430_v58 = vsel %vm422_vm2, %v418_v54, %v426_v56  ;;  %v403_v59 = vadd.f32 %v396_v57, %v336_v55  ;;  %v337_v62 = vpop.f32.mrf.mxu1 }
  0xac   : > { %434 = vst.msk [vmem:[%s677_s16 + $0x8] sm:$0xff] %vm267_vm0, %v430_v58  ;;  %v338_v2 = vadd.f32 %v337_v62, %v290_v0 }
  0xad   : > { %v411_v61 = vadd.f32 %v582_v37, %v403_v59 }
  0xaf   : > { %v419_v63 = vadd.f32 %v415_v60, %v411_v61 }
  0xb1   : > { %vm423_vm3 = vcmp.ge.f32.partialorder %v419_v63, 0.0  ;;  %v427_v1 = vmul.f32 0.1, %v419_v63 }
  0xb2   : > { %v398_v3 = vpop.f32.mrf.mxu2 }
  0xb3   : > { %v431_v4 = vsel %vm423_vm3, %v419_v63, %v427_v1  ;;  %v404_v5 = vadd.f32 %v398_v3, %v338_v2 }
  0xb4   : > { %435 = vst.msk [vmem:[%s677_s16 + $0x10] sm:$0xff] %vm267_vm0, %v431_v4 }
  0xb5   : > { %v412_v7 = vadd.f32 %v582_v37, %v404_v5 }
  0xb7   : > { %v420_v8 = vadd.f32 %v416_v6, %v412_v7 }
  0xb9   : > { %vm424_vm4 = vcmp.ge.f32.partialorder %v420_v8, 0.0  ;;  %v428_v9 = vmul.f32 0.1, %v420_v8 }
  0xbb   : > { %v432_v10 = vsel %vm424_vm4, %v420_v8, %v428_v9 }
  0xbc   : > { %436 = vst.msk [vmem:[%s677_s16 + $0x18] sm:$0xff] %vm267_vm0, %v432_v10 }
  0xbd PF: > { %s14_s15 = sadd.s32 1, %s589_s15  }
  0xbe   : > { %p11_p4 = scmp.ge.s32.totalorder %s14_s15, 5  }
  0xc0   :  { %13 = sbr.rel (!%p11_p4) target bundleno = 1 (0x1), region = 73 }

</bundles_post_ra>
